<compile_context>
chip_gen: v6e
topology: v6e:2x2x1
jax: 0.10.0
libtpu: 0.0.40
codegen_flags: <defaults>
</compile_context>

<pallas_src>
import functools
import math

import numpy as np
import jax
import jax.numpy as jnp
from jax import lax
from jax.experimental import pallas as pl
from jax.experimental.pallas import tpu as pltpu

# ----------------------------- static config --------------------------------
NFFT = 64
HIDDEN = 8
DEPTH = 3
KERNEL = 8
STRIDE = 2
PAD = KERNEL // STRIDE - 1
GROWTH = 2
MAX_HIDDEN = 10000

VMEM_SPEC = pl.BlockSpec(memory_space=pltpu.MemorySpace.VMEM)

# bf16 MXU operands on all generations (review item); accumulation stays f32
# through preferred_element_type at every dot site.
MXU_DTYPE = jnp.bfloat16


def _mxu(a):
    return jnp.asarray(a).astype(MXU_DTYPE)


# --------------------------- host-side weight folding ------------------------
def _fold_conv_freq(w, b, K, S, P, F_in):
    """Conv2d([K,1],[S,1],[P,0]) along freq -> dense GEMM on (freq, chan)-flat rows.
    w: (H, Cin, K) torch layout.  Returns (F_in*Cin, F_out*H), (1, F_out*H), F_out."""
    H, Cin, _ = w.shape
    F_out = (F_in + 2 * P - K) // S + 1
    wn = np.asarray(w, np.float32)
    Wb = np.zeros((F_in, Cin, F_out, H), np.float32)
    for o in range(F_out):
        for k in range(K):
            f = o * S + k - P
            if 0 <= f < F_in:
                Wb[f, :, o, :] = wn[:, :, k].T
    bb = np.tile(np.asarray(b, np.float32), F_out).reshape(1, -1)
    return jnp.asarray(Wb.reshape(F_in * Cin, F_out * H)), jnp.asarray(bb), F_out


def _fold_glu(w, b, F, Cin):
    """1x1 Conv2d(Cin, 2*Cout) as a block-diagonal GEMM; columns are laid out as
    [a-half flattened (F, Cout)] ++ [gate-half flattened (F, Cout)] so the GLU
    split in-kernel is a contiguous 128-lane split."""
    Cout = w.shape[0] // 2
    wn = np.asarray(w, np.float32)
    Wb = np.zeros((F, Cin, 2, F, Cout), np.float32)
    for f in range(F):
        Wb[f, :, 0, f, :] = wn[:Cout, :].T
        Wb[f, :, 1, f, :] = wn[Cout:, :].T
    bn = np.asarray(b, np.float32)
    bb = np.concatenate([np.tile(bn[:Cout], F), np.tile(bn[Cout:], F)]).reshape(1, -1)
    return jnp.asarray(Wb.reshape(F * Cin, 2 * F * Cout)), jnp.asarray(bb)


def _fold_convt_freq(w, b, K, S, P, F_in):
    """ConvTranspose2d([K,1],[S,1],[P,0]) along freq (incl. overlap-add + crop)
    folded into one dense GEMM.  w: (Cin, Cout, K) torch layout."""
    Cin, Cout, _ = w.shape
    F_out = (F_in - 1) * S + K - 2 * P
    wn = np.asarray(w, np.float32)
    Wb = np.zeros((F_in, Cin, F_out, Cout), np.float32)
    for i in range(F_in):
        for k in range(K):
            o = i * S + k - P
            if 0 <= o < F_out:
                Wb[i, :, o, :] = wn[:, :, k]
    bb = np.tile(np.asarray(b, np.float32), F_out).reshape(1, -1)
    return jnp.asarray(Wb.reshape(F_in * Cin, F_out * Cout)), jnp.asarray(bb), F_out


# ------------------------------ STFT DFT GEMM --------------------------------
def _mm_kernel(x_ref, w_ref, o_ref):
    o_ref[...] = jnp.dot(x_ref[...], w_ref[...], preferred_element_type=jnp.float32)


def pallas_mm(x, w):
    M = x.shape[0]
    N = w.shape[1]
    return pl.pallas_call(
        _mm_kernel,
        out_shape=jax.ShapeDtypeStruct((M, N), jnp.float32),
        in_specs=[VMEM_SPEC, VMEM_SPEC],
        out_specs=VMEM_SPEC,
    )(_mxu(x), _mxu(w))


# ------------- fused magnorm + 3 encoder layers (one pallas_call) ------------
def _encoder_kernel(*refs, depth, fr):
    re_ref, im_ref, am_ref, av_ref = refs[0], refs[1], refs[2], refs[3]
    wrefs = refs[4:4 + 4 * depth]
    skip_refs = refs[4 + 4 * depth:4 + 5 * depth]
    aux_ref = refs[4 + 5 * depth]

    re = re_ref[...]
    im = im_ref[...]
    sq = re * re + im * im
    mag = jnp.sqrt(sq + 1e-8)                       # torch: sqrt(re^2+im^2+1e-8)
    r = jnp.sqrt(sq)                                # cos/sin follow atan2 semantics
    safe = jnp.where(r > 0.0, r, 1.0)
    cosv = jnp.where(r > 0.0, re / safe, 1.0)
    sinv = jnp.where(r > 0.0, im / safe, 0.0)

    # per-batch mean / unbiased std via a tiny f32 group-averaging matmul
    mean_rows = jnp.sum(jnp.dot(am_ref[...], mag, preferred_element_type=jnp.float32),
                        axis=1, keepdims=True)
    diff = mag - mean_rows
    var_rows = jnp.sum(jnp.dot(av_ref[...], diff * diff,
                               preferred_element_type=jnp.float32),
                       axis=1, keepdims=True)
    std_rows = jnp.sqrt(var_rows)
    x = diff / (1e-5 + std_rows)

    # auxiliary output consumed by the decoder kernel: [cos | sin | mean | std | 0...]
    aux_ref[...] = jnp.zeros_like(aux_ref)
    aux_ref[:, 0:fr] = cosv
    aux_ref[:, fr:2 * fr] = sinv
    aux_ref[:, 2 * fr:2 * fr + 1] = mean_rows
    aux_ref[:, 2 * fr + 1:2 * fr + 2] = std_rows

    # encoder chain: (folded freq-conv GEMM + bias + ReLU) -> (block-diag GLU GEMM)
    for l in range(depth):
        wc, bc, wg, bg = wrefs[4 * l:4 * l + 4]
        y = jnp.dot(x.astype(wc.dtype), wc[...],
                    preferred_element_type=jnp.float32) + bc[...]
        y = jnp.maximum(y, 0.0)
        z = jnp.dot(y.astype(wg.dtype), wg[...],
                    preferred_element_type=jnp.float32) + bg[...]
        half = z.shape[1] // 2
        x = z[:, :half] * jax.nn.sigmoid(z[:, half:])
        skip_refs[l][...] = x


def run_encoder(p, re2, im2, amean, avar):
    depth = len(p["enc"])
    M, fr = re2.shape
    aux_w = max(128, ((2 * fr + 2 + 127) // 128) * 128)
    ins = [re2, im2, amean, avar]
    for lp in p["enc"]:
        ins += [lp["wc"], lp["bc"], lp["wg"], lp["bg"]]
    out_shape = tuple([jax.ShapeDtypeStruct((M, lp["width"]), jnp.float32)
                       for lp in p["enc"]]
                      + [jax.ShapeDtypeStruct((M, aux_w), jnp.float32)])
    outs = pl.pallas_call(
        functools.partial(_encoder_kernel, depth=depth, fr=fr),
        out_shape=out_shape,
        in_specs=[VMEM_SPEC] * len(ins),
        out_specs=tuple([VMEM_SPEC] * (depth + 1)),
    )(*ins)
    return list(outs[:depth]), outs[depth]


# ----- fused 3 decoder layers + denorm + tanh mask + phase + IDFT GEMM --------
def _decoder_kernel(*refs, depth, fr):
    x_ref = refs[0]
    aux_ref = refs[1]
    skip_refs = refs[2:2 + depth]
    wrefs = refs[2 + depth:2 + 5 * depth]
    idft_ref = refs[2 + 5 * depth]
    o_ref = refs[3 + 5 * depth]

    x = x_ref[...]
    for l in range(depth):
        wg, bg, wt, bt = wrefs[4 * l:4 * l + 4]
        x = x + skip_refs[l][...]                    # fused skip connection
        z = jnp.dot(x.astype(wg.dtype), wg[...],
                    preferred_element_type=jnp.float32) + bg[...]
        half = z.shape[1] // 2
        h = z[:, :half] * jax.nn.sigmoid(z[:, half:])
        x = jnp.dot(h.astype(wt.dtype), wt[...],     # folded convT (+overlap-add+crop)
                    preferred_element_type=jnp.float32) + bt[...]
        if l < depth - 1:                            # trailing ReLU on all but last
            x = jnp.maximum(x, 0.0)

    # denorm + tanh mask + phase re-application + single merged IDFT matmul
    cosv = aux_ref[:, 0:fr]
    sinv = aux_ref[:, fr:2 * fr]
    mean_r = aux_ref[:, 2 * fr:2 * fr + 1]
    std_r = aux_ref[:, 2 * fr + 1:2 * fr + 2]
    mask = jnp.tanh(x * std_r + mean_r)
    reim = jnp.concatenate([mask * cosv, mask * sinv], axis=1)
    o_ref[...] = jnp.dot(reim.astype(idft_ref.dtype), idft_ref[...],
                         preferred_element_type=jnp.float32)


def run_decoder(p, x, aux, skips, idft, fr):
    depth = len(p["dec"])
    M = x.shape[0]
    ins = [x, aux]
    ins += [skips[d] for d in reversed(range(depth))]      # applied order: innermost first
    for lp in reversed(p["dec"]):
        ins += [lp["wg"], lp["bg"], lp["wt"], lp["bt"]]
    ins.append(idft)
    N = idft.shape[1]
    return pl.pallas_call(
        functools.partial(_decoder_kernel, depth=depth, fr=fr),
        out_shape=jax.ShapeDtypeStruct((M, N), jnp.float32),
        in_specs=[VMEM_SPEC] * len(ins),
        out_specs=VMEM_SPEC,
    )(*ins)


# ------------------- fused 2-layer LSTM (one pallas_call) --------------------
def _lstm_kernel(x_ref, wih1_ref, whh1_ref, b1_ref, wih2_ref, whh2_ref, b2_ref,
                 o_ref, g_scr, h_scr, *, B, D, Seq, U):
    def recurrence(g_ref, whh_ref, out_ref):
        whh = whh_ref[...]                          # hoisted out of the loop

        def body(iu, carry):
            h, c = carry
            for u in range(U):                      # static unroll inside the body
                row = (iu * U + u) * B
                g = g_ref[pl.ds(row, B), :] + jnp.dot(
                    h.astype(whh.dtype), whh, preferred_element_type=jnp.float32)
                i = jax.nn.sigmoid(g[:, 0:D])
                f = jax.nn.sigmoid(g[:, D:2 * D])
                gc = jnp.tanh(g[:, 2 * D:3 * D])
                o = jax.nn.sigmoid(g[:, 3 * D:4 * D])
                c = f * c + i * gc
                h = o * jnp.tanh(c)
                out_ref[pl.ds(row, B), :] = h
            return (h, c)

        init = (jnp.zeros((B, D), jnp.float32), jnp.zeros((B, D), jnp.float32))
        lax.fori_loop(0, Seq // U, body, init)

    # hoisted input projections: one (Seq*B, D)x(D, 4D) GEMM per layer
    g_scr[...] = jnp.dot(x_ref[...].astype(wih1_ref.dtype), wih1_ref[...],
                         preferred_element_type=jnp.float32) + b1_ref[...]
    recurrence(g_scr, whh1_ref, h_scr)
    g_scr[...] = jnp.dot(h_scr[...].astype(wih2_ref.dtype), wih2_ref[...],
                         preferred_element_type=jnp.float32) + b2_ref[...]
    recurrence(g_scr, whh2_ref, o_ref)


def run_lstm(p, x2d, batch):
    seqb, d = x2d.shape
    seq = seqb // batch
    u = 4
    while seq % u:
        u //= 2
    l1, l2 = p["lstm"]
    return pl.pallas_call(
        functools.partial(_lstm_kernel, B=batch, D=d, Seq=seq, U=max(u, 1)),
        out_shape=jax.ShapeDtypeStruct((seqb, d), jnp.float32),
        in_specs=[VMEM_SPEC] * 7,
        out_specs=VMEM_SPEC,
        scratch_shapes=[pltpu.VMEM((seqb, 4 * d), jnp.float32),
                        pltpu.VMEM((seqb, d), jnp.float32)],
    )(x2d, l1["wih"], l1["whh"], l1["b"], l2["wih"], l2["whh"], l2["b"])


# ------------------------------- STFT / ISTFT --------------------------------
def _pad1d(x, paddings, mode="constant", value=0.0):
    length = x.shape[-1]
    left, right = paddings
    if mode == "reflect":
        max_pad = max(left, right)
        if length <= max_pad:
            extra = max_pad - length + 1
            er = min(right, extra)
            el = extra - er
            paddings = (left - el, right - er)
            x = jnp.pad(x, ((0, 0), (el, er)))
        return jnp.pad(x, ((0, 0), paddings), mode="reflect")
    return jnp.pad(x, ((0, 0), (left, right)), constant_values=value)


def _hann(n):
    return 0.5 - 0.5 * jnp.cos(2.0 * jnp.pi * jnp.arange(n, dtype=jnp.float32) / n)


def _spec(mix, nfft, hop):
    """torch.stft(center, reflect, hann, normalized) + demucs hybrid slicing.
    Dense shifted-concatenation framing (no gather) -> one DFT GEMM."""
    B, L = mix.shape
    le = int(math.ceil(L / hop))
    pad = hop // 2 * 3
    x = _pad1d(mix, (pad, pad + le * hop - L), mode="reflect")
    xp = jnp.pad(x, ((0, 0), (nfft // 2, nfft // 2)), mode="reflect")
    total = xp.shape[-1]
    assert total % hop == 0 and nfft % hop == 0
    n_frames = 1 + (total - nfft) // hop
    c = xp.reshape(B, total // hop, hop)
    frames = jnp.concatenate([c[:, j:j + n_frames, :] for j in range(nfft // hop)],
                             axis=-1)                              # (B, n_frames, nfft)
    win = _hann(nfft)
    nbins = nfft // 2 + 1
    n = jnp.arange(nfft, dtype=jnp.float32)[:, None]
    f = jnp.arange(nbins, dtype=jnp.float32)[None, :]
    ang = 2.0 * jnp.pi * n * f / nfft
    dft = jnp.concatenate([jnp.cos(ang), -jnp.sin(ang)], axis=1)   # (nfft, 2*nbins)
    dft = (win[:, None] * dft) / math.sqrt(float(nfft))
    ncols = 2 * nbins
    ncols_pad = ((ncols + 127) // 128) * 128                       # lane-dense output
    dft = jnp.pad(dft, ((0, 0), (0, ncols_pad - ncols)))
    z = pallas_mm(frames.reshape(B * n_frames, nfft), dft)
    z = z.reshape(B, n_frames, ncols_pad)
    re = z[:, 2:2 + le, :nbins - 1]                                # drop Nyquist bin
    im = z[:, 2:2 + le, nbins:2 * nbins - 1]
    return re, im, le


def _build_idft(freqs, hop):
    """Stacked [idft_re ; idft_im] matrix (windowed, normalized istft), padded to
    128 output lanes; merged-matmul operand for the decoder kernel epilogue."""
    n_fft = 2 * freqs - 2
    win = _hann(n_fft)
    f = jnp.arange(freqs, dtype=jnp.float32)[:, None]
    n = jnp.arange(n_fft, dtype=jnp.float32)[None, :]
    ang = 2.0 * jnp.pi * f * n / n_fft
    coef = jnp.where((jnp.arange(freqs) == 0) | (jnp.arange(freqs) == freqs - 1),
                     1.0, 2.0)[:, None]
    scale = math.sqrt(float(n_fft)) / n_fft
    idft_re = coef * jnp.cos(ang) * scale * win[None, :]
    idft_im = -coef * jnp.sin(ang) * scale * win[None, :]
    G = -(-n_fft // hop)
    n_pad = G * hop
    ncols = ((n_pad + 127) // 128) * 128
    idft_re = jnp.pad(idft_re, ((0, 0), (0, ncols - n_fft)))
    idft_im = jnp.pad(idft_im, ((0, 0), (0, ncols - n_fft)))
    w = jnp.concatenate([idft_re, idft_im], axis=0)                # (2*freqs, ncols)
    return _mxu(w), n_pad, n_fft


def _istft_overlap_add(xf, hop, length, n_fft):
    """torch.istft tail (vectorized shift-add overlap-add, window-envelope
    normalization) + demucs _ispec cropping.  xf: (B, T, n_pad) windowed frames."""
    B, T, n_pad = xf.shape
    G = n_pad // hop
    pad = hop // 2 * 3
    le = hop * int(math.ceil(length / hop)) + 2 * pad
    xf = jnp.pad(xf, ((0, 0), (2, 2), (0, 0)))                     # _ispec: F.pad(z,(2,2))
    frames = T + 4
    xfg = xf.reshape(B, frames, G, hop)
    y = None
    for j in range(G):
        part = jnp.pad(xfg[:, :, j, :], ((0, 0), (j, G - 1 - j), (0, 0)))
        y = part if y is None else y + part
    y = y.reshape(B, (frames + G - 1) * hop)
    win = _hann(n_fft)
    w2 = jnp.pad(win * win, (0, n_pad - n_fft)).reshape(G, hop)
    env = None
    for j in range(G):
        part = jnp.pad(jnp.broadcast_to(w2[j], (frames, hop)), ((j, G - 1 - j), (0, 0)))
        env = part if env is None else env + part
    env = env.reshape((frames + G - 1) * hop)
    out_len = n_fft + hop * (frames - 1)
    y = y[:, :out_len]
    env = env[:out_len]
    env = jnp.where(env > 1e-11, env, 1.0)
    y = y / env[None, :]
    start = n_fft // 2
    y = y[:, start:start + le]
    return y[:, pad:pad + length]


# -------------------------------- parameters ---------------------------------
def build_params(key, chin, chout, hidden, depth, K, S, P, growth, max_hidden, freqs):
    keys = jax.random.split(key, 8 * depth + 8)
    ki = iter(keys)

    def u(shape, scale):
        return jax.random.uniform(next(ki), shape, jnp.float32, -scale, scale)

    enc, dec = [], []
    F = freqs
    ch_in, ch_out = chin, chout
    h = hidden
    for _ in range(depth):
        s0 = 1.0 / math.sqrt(ch_in * K)
        w0 = u((h, ch_in, K), s0)
        b0 = u((h,), s0)
        s1 = 1.0 / math.sqrt(h)
        w1 = u((2 * h, h), s1)
        b1 = u((2 * h,), s1)
        wc, bc, Fo = _fold_conv_freq(w0, b0, K, S, P, F)
        wg, bg = _fold_glu(w1, b1, Fo, h)
        enc.append(dict(wc=_mxu(wc), bc=bc, wg=_mxu(wg), bg=bg, width=Fo * h))

        wgd = u((2 * h, h), s1)
        bgd = u((2 * h,), s1)
        st = 1.0 / math.sqrt(ch_out * K)
        wt = u((h, ch_out, K), st)
        bt = u((ch_out,), st)
        wgd_f, bgd_f = _fold_glu(wgd, bgd, Fo, h)
        wt_f, bt_f, F_back = _fold_convt_freq(wt, bt, K, S, P, Fo)
        assert F_back == F
        dec.append(dict(wg=_mxu(wgd_f), bg=bgd_f, wt=_mxu(wt_f), bt=bt_f))

        ch_out = h
        ch_in = h
        h = min(int(growth * h), max_hidden)
        F = Fo

    D = ch_in
    s_l = 1.0 / math.sqrt(D)
    lstm = []
    for _ in range(2):
        wih = u((4 * D, D), s_l)
        whh = u((4 * D, D), s_l)
        bih = u((4 * D,), s_l)
        bhh = u((4 * D,), s_l)
        lstm.append(dict(wih=_mxu(jnp.transpose(wih)),            # (D, 4D), [i,f,g,o]
                         whh=_mxu(jnp.transpose(whh)),
                         b=(bih + bhh).reshape(1, 4 * D)))
    return dict(enc=enc, dec=dec, lstm=lstm, F2=F, C2=D)


# --------------------------------- forward -----------------------------------
def demucs_tf_forward(params, mix):
    B, L = mix.shape
    hop = NFFT // 4
    fr = NFFT // 2

    # STFT (one DFT GEMM)
    re, im, T = _spec(mix, NFFT, hop)                              # (B, T, fr)
    M = B * T
    re2 = re.reshape(M, fr)
    im2 = im.reshape(M, fr)

    # per-batch group averaging matrices (constant-folded under jit)
    grp = ((jnp.arange(M)[:, None] // T) == (jnp.arange(M)[None, :] // T)
           ).astype(jnp.float32)
    amean = grp / (T * fr)
    avar = grp / (T * fr - 1)                                      # torch.std unbiased

    # fused magnorm + encoder
    skips, aux = run_encoder(params, re2, im2, amean, avar)

    # LSTM bottleneck: torch 'b c t f -> b (t f) c' (t = freq axis, f = frames)
    F2, C2 = params["F2"], params["C2"]
    s2 = skips[-1]
    seq = jnp.transpose(s2.reshape(B, T, F2, C2), (2, 1, 0, 3)).reshape(F2 * T * B, C2)
    hseq = run_lstm(params, seq, B)
    x = jnp.transpose(hseq.reshape(F2, T, B, C2), (2, 1, 0, 3)).reshape(M, F2 * C2)

    # fused decoder + denorm + tanh mask + phase + IDFT
    idft, n_pad, n_fft_i = _build_idft(fr, hop)
    frames_t = run_decoder(params, x, aux, skips, idft, fr)        # (M, 128)
    xf = frames_t[:, :n_pad].reshape(B, T, n_pad)

    # ISTFT overlap-add + crop (dense shift-adds in glue)
    # TODO(synk): time-frame overlap-add stays in XLA glue; it spans rows of the
    # lane-dense decoder output and is a handful of tiny dense adds.
    y = _istft_overlap_add(xf, hop, L, n_fft_i)
    return y.reshape(B, 1, L)


# ----------------------------------- main -------------------------------------
if __name__ == "__main__":
    B, L = 2, 256
    key = jax.random.PRNGKey(0)
    kp, kx = jax.random.split(key)
    params = build_params(kp, chin=1, chout=1, hidden=HIDDEN, depth=DEPTH,
                          K=KERNEL, S=STRIDE, P=PAD, growth=GROWTH,
                          max_hidden=MAX_HIDDEN, freqs=NFFT // 2)
    mix = jax.random.normal(kx, (B, L), dtype=jnp.float32)

    fwd = jax.jit(lambda m: demucs_tf_forward(params, m))
    out = jax.block_until_ready(fwd(mix))
    assert out.shape == (B, 1, L), out.shape
    assert bool(jnp.all(jnp.isfinite(out)))
    print("KERNEL_OK")
</pallas_src>

<mosaic_0001>
module attributes {stable_mosaic.version = 11 : i64} {
  func.func @_mm_kernel(%arg0: memref<40x64xbf16, #tpu.memory_space<vmem>>, %arg1: memref<64x128xbf16, #tpu.memory_space<vmem>>, %arg2: memref<40x128xf32, #tpu.memory_space<vmem>>) attributes {dimension_semantics = [], scalar_prefetch = 0 : i64, scratch_operands = 0 : i64, tpu.core_type = #tpu.core_type<tc>} {
    %c0 = arith.constant 0 : index
    %c0_0 = arith.constant 0 : index
    %0 = vector.load %arg0[%c0, %c0_0] : memref<40x64xbf16, #tpu.memory_space<vmem>>, vector<40x64xbf16>
    %c0_1 = arith.constant 0 : index
    %c0_2 = arith.constant 0 : index
    %1 = vector.load %arg1[%c0_1, %c0_2] : memref<64x128xbf16, #tpu.memory_space<vmem>>, vector<64x128xbf16>
    %cst = arith.constant dense<0.000000e+00> : vector<40x128xf32>
    %2 = tpu.matmul %0, %1, %cst {dimension_numbers = #tpu.dot_dimension_numbers<[1], [0], [0], [1], [0, 0, 1, 1], [], []>} : vector<40x64xbf16>, vector<64x128xbf16>, vector<40x128xf32> -> vector<40x128xf32>
    %c0_3 = arith.constant 0 : index
    %c0_4 = arith.constant 0 : index
    %3 = vector.load %arg2[%c0_3, %c0_4] : memref<40x128xf32, #tpu.memory_space<vmem>>, vector<40x128xf32>
    tpu.vector_store %arg2[%c0_3, %c0_4], %2 {strides = array<i32>} : memref<40x128xf32, #tpu.memory_space<vmem>>, vector<40x128xf32>,
    return
  }
}

module attributes {stable_mosaic.version = 11 : i64} {
  func.func @_encoder_kernel(%arg0: memref<32x32xf32, #tpu.memory_space<vmem>>, %arg1: memref<32x32xf32, #tpu.memory_space<vmem>>, %arg2: memref<32x32xf32, #tpu.memory_space<vmem>>, %arg3: memref<32x32xf32, #tpu.memory_space<vmem>>, %arg4: memref<32x128xbf16, #tpu.memory_space<vmem>>, %arg5: memref<1x128xf32, #tpu.memory_space<vmem>>, %arg6: memref<128x256xbf16, #tpu.memory_space<vmem>>, %arg7: memref<1x256xf32, #tpu.memory_space<vmem>>, %arg8: memref<128x128xbf16, #tpu.memory_space<vmem>>, %arg9: memref<1x128xf32, #tpu.memory_space<vmem>>, %arg10: memref<128x256xbf16, #tpu.memory_space<vmem>>, %arg11: memref<1x256xf32, #tpu.memory_space<vmem>>, %arg12: memref<128x128xbf16, #tpu.memory_space<vmem>>, %arg13: memref<1x128xf32, #tpu.memory_space<vmem>>, %arg14: memref<128x256xbf16, #tpu.memory_space<vmem>>, %arg15: memref<1x256xf32, #tpu.memory_space<vmem>>, %arg16: memref<32x128xf32, #tpu.memory_space<vmem>>, %arg17: memref<32x128xf32, #tpu.memory_space<vmem>>, %arg18: memref<32x128xf32, #tpu.memory_space<vmem>>, %arg19: memref<32x128xf32, #tpu.memory_space<vmem>>) attributes {dimension_semantics = [], scalar_prefetch = 0 : i64, scratch_operands = 0 : i64, tpu.core_type = #tpu.core_type<tc>} {
    %c0 = arith.constant 0 : index
    %c0_0 = arith.constant 0 : index
    %0 = vector.load %arg0[%c0, %c0_0] : memref<32x32xf32, #tpu.memory_space<vmem>>, vector<32x32xf32>
    %c0_1 = arith.constant 0 : index
    %c0_2 = arith.constant 0 : index
    %1 = vector.load %arg1[%c0_1, %c0_2] : memref<32x32xf32, #tpu.memory_space<vmem>>, vector<32x32xf32>
    %2 = arith.mulf %0, %0 : vector<32x32xf32>
    %3 = arith.mulf %1, %1 : vector<32x32xf32>
    %4 = arith.addf %2, %3 : vector<32x32xf32>
    %cst = arith.constant 9.99999993E-9 : f32
    %5 = vector.broadcast %cst : f32 to vector<32x32xf32>
    %6 = arith.addf %4, %5 : vector<32x32xf32>
    %7 = math.sqrt %6 : vector<32x32xf32>
    %8 = math.sqrt %4 : vector<32x32xf32>
    %cst_3 = arith.constant 0.000000e+00 : f32
    %9 = vector.broadcast %cst_3 : f32 to vector<32x32xf32>
    %10 = arith.cmpf ogt, %8, %9 : vector<32x32xf32>
    %cst_4 = arith.constant 1.000000e+00 : f32
    %11 = vector.broadcast %cst_4 : f32 to vector<32x32xf32>
    %12 = arith.select %10, %8, %11 : vector<32x32xi1>, vector<32x32xf32>
    %cst_5 = arith.constant 0.000000e+00 : f32
    %13 = vector.broadcast %cst_5 : f32 to vector<32x32xf32>
    %14 = arith.cmpf ogt, %8, %13 : vector<32x32xf32>
    %15 = arith.divf %0, %12 : vector<32x32xf32>
    %cst_6 = arith.constant 1.000000e+00 : f32
    %16 = vector.broadcast %cst_6 : f32 to vector<32x32xf32>
    %17 = arith.select %14, %15, %16 : vector<32x32xi1>, vector<32x32xf32>
    %cst_7 = arith.constant 0.000000e+00 : f32
    %18 = vector.broadcast %cst_7 : f32 to vector<32x32xf32>
    %19 = arith.cmpf ogt, %8, %18 : vector<32x32xf32>
    %20 = arith.divf %1, %12 : vector<32x32xf32>
    %cst_8 = arith.constant 0.000000e+00 : f32
    %21 = vector.broadcast %cst_8 : f32 to vector<32x32xf32>
    %22 = arith.select %19, %20, %21 : vector<32x32xi1>, vector<32x32xf32>
    %c0_9 = arith.constant 0 : index
    %c0_10 = arith.constant 0 : index
    %23 = vector.load %arg2[%c0_9, %c0_10] : memref<32x32xf32, #tpu.memory_space<vmem>>, vector<32x32xf32>
    %cst_11 = arith.constant dense<0.000000e+00> : vector<32x32xf32>
    %24 = tpu.matmul %23, %7, %cst_11 {dimension_numbers = #tpu.dot_dimension_numbers<[1], [0], [0], [1], [0, 0, 1, 1], [], []>} : vector<32x32xf32>, vector<32x32xf32>, vector<32x32xf32> -> vector<32x32xf32>
    %cst_12 = arith.constant dense<0.000000e+00> : vector<32xf32>
    %25 = vector.multi_reduction <add>, %24, %cst_12 [1] : vector<32x32xf32> to vector<32xf32>
    %26 = vector.shape_cast %25 : vector<32xf32> to vector<32x1xf32>
    %27 = vector.broadcast %26 : vector<32x1xf32> to vector<32x32xf32>
    %28 = arith.subf %7, %27 : vector<32x32xf32>
    %c0_13 = arith.constant 0 : index
    %c0_14 = arith.constant 0 : index
    %29 = vector.load %arg3[%c0_13, %c0_14] : memref<32x32xf32, #tpu.memory_space<vmem>>, vector<32x32xf32>
    %30 = arith.mulf %28, %28 : vector<32x32xf32>
    %cst_15 = arith.constant dense<0.000000e+00> : vector<32x32xf32>
    %31 = tpu.matmul %29, %30, %cst_15 {dimension_numbers = #tpu.dot_dimension_numbers<[1], [0], [0], [1], [0, 0, 1, 1], [], []>} : vector<32x32xf32>, vector<32x32xf32>, vector<32x32xf32> -> vector<32x32xf32>
    %cst_16 = arith.constant dense<0.000000e+00> : vector<32xf32>
    %32 = vector.multi_reduction <add>, %31, %cst_16 [1] : vector<32x32xf32> to vector<32xf32>
    %33 = vector.shape_cast %32 : vector<32xf32> to vector<32x1xf32>
    %34 = math.sqrt %33 : vector<32x1xf32>
    %cst_17 = arith.constant 9.99999974E-6 : f32
    %35 = vector.broadcast %cst_17 : f32 to vector<32x1xf32>
    %36 = arith.addf %35, %34 : vector<32x1xf32>
    %37 = vector.broadcast %36 : vector<32x1xf32> to vector<32x32xf32>
    %38 = arith.divf %28, %37 : vector<32x32xf32>
    %cst_18 = arith.constant 0.000000e+00 : f32
    %39 = vector.broadcast %cst_18 : f32 to vector<32x128xf32>
    %c0_19 = arith.constant 0 : index
    %c0_20 = arith.constant 0 : index
    %40 = vector.load %arg19[%c0_19, %c0_20] : memref<32x128xf32, #tpu.memory_space<vmem>>, vector<32x128xf32>
    tpu.vector_store %arg19[%c0_19, %c0_20], %39 {strides = array<i32>} : memref<32x128xf32, #tpu.memory_space<vmem>>, vector<32x128xf32>,
    %c0_21 = arith.constant 0 : index
    %c0_22 = arith.constant 0 : index
    %41 = vector.load %arg19[%c0_21, %c0_22] : memref<32x128xf32, #tpu.memory_space<vmem>>, vector<32x32xf32>
    tpu.vector_store %arg19[%c0_21, %c0_22], %17 {strides = array<i32>} : memref<32x128xf32, #tpu.memory_space<vmem>>, vector<32x32xf32>,
    %c0_23 = arith.constant 0 : index
    %c32 = arith.constant 32 : index
    %42 = vector.load %arg19[%c0_23, %c32] : memref<32x128xf32, #tpu.memory_space<vmem>>, vector<32x32xf32>
    tpu.vector_store %arg19[%c0_23, %c32], %22 {strides = array<i32>} : memref<32x128xf32, #tpu.memory_space<vmem>>, vector<32x32xf32>,
    %c0_24 = arith.constant 0 : index
    %c64 = arith.constant 64 : index
    %43 = vector.load %arg19[%c0_24, %c64] : memref<32x128xf32, #tpu.memory_space<vmem>>, vector<32x1xf32>
    tpu.vector_store %arg19[%c0_24, %c64], %26 {strides = array<i32>} : memref<32x128xf32, #tpu.memory_space<vmem>>, vector<32x1xf32>,
    %c0_25 = arith.constant 0 : index
    %c65 = arith.constant 65 : index
    %44 = vector.load %arg19[%c0_25, %c65] : memref<32x128xf32, #tpu.memory_space<vmem>>, vector<32x1xf32>
    tpu.vector_store %arg19[%c0_25, %c65], %34 {strides = array<i32>} : memref<32x128xf32, #tpu.memory_space<vmem>>, vector<32x1xf32>,
    %45 = arith.truncf %38 : vector<32x32xf32> to vector<32x32xbf16>
    %c0_26 = arith.constant 0 : index
    %c0_27 = arith.constant 0 : index
    %46 = vector.load %arg4[%c0_26, %c0_27] : memref<32x128xbf16, #tpu.memory_space<vmem>>, vector<32x128xbf16>
    %cst_28 = arith.constant dense<0.000000e+00> : vector<32x128xf32>
    %47 = tpu.matmul %45, %46, %cst_28 {dimension_numbers = #tpu.dot_dimension_numbers<[1], [0], [0], [1], [0, 0, 1, 1], [], []>} : vector<32x32xbf16>, vector<32x128xbf16>, vector<32x128xf32> -> vector<32x128xf32>
    %c0_29 = arith.constant 0 : index
    %c0_30 = arith.constant 0 : index
    %48 = vector.load %arg5[%c0_29, %c0_30] : memref<1x128xf32, #tpu.memory_space<vmem>>, vector<1x128xf32>
    %49 = vector.broadcast %48 : vector<1x128xf32> to vector<32x128xf32>
    %50 = arith.addf %47, %49 : vector<32x128xf32>
    %cst_31 = arith.constant 0.000000e+00 : f32
    %51 = vector.broadcast %cst_31 : f32 to vector<32x128xf32>
    %52 = arith.maximumf %50, %51 : vector<32x128xf32>
    %53 = arith.truncf %52 : vector<32x128xf32> to vector<32x128xbf16>
    %c0_32 = arith.constant 0 : index
    %c0_33 = arith.constant 0 : index
    %54 = vector.load %arg6[%c0_32, %c0_33] : memref<128x256xbf16, #tpu.memory_space<vmem>>, vector<128x256xbf16>
    %cst_34 = arith.constant dense<0.000000e+00> : vector<32x256xf32>
    %55 = tpu.matmul %53, %54, %cst_34 {dimension_numbers = #tpu.dot_dimension_numbers<[1], [0], [0], [1], [0, 0, 1, 1], [], []>} : vector<32x128xbf16>, vector<128x256xbf16>, vector<32x256xf32> -> vector<32x256xf32>
    %c0_35 = arith.constant 0 : index
    %c0_36 = arith.constant 0 : index
    %56 = vector.load %arg7[%c0_35, %c0_36] : memref<1x256xf32, #tpu.memory_space<vmem>>, vector<1x256xf32>
    %57 = vector.broadcast %56 : vector<1x256xf32> to vector<32x256xf32>
    %58 = arith.addf %55, %57 : vector<32x256xf32>
    %59 = vector.extract_strided_slice %58 {offsets = [0, 0], sizes = [32, 128], strides = [1, 1]} : vector<32x256xf32> to vector<32x128xf32>
    %60 = vector.extract_strided_slice %58 {offsets = [0, 128], sizes = [32, 128], strides = [1, 1]} : vector<32x256xf32> to vector<32x128xf32>
    %61 = arith.negf %60 : vector<32x128xf32>
    %62 = math.exp %61 : vector<32x128xf32>
    %cst_37 = arith.constant 1.000000e+00 : f32
    %63 = vector.broadcast %cst_37 : f32 to vector<32x128xf32>
    %64 = arith.addf %63, %62 : vector<32x128xf32>
    %65 = arith.divf %63, %64 : vector<32x128xf32>
    %66 = arith.mulf %59, %65 : vector<32x128xf32>
    %c0_38 = arith.constant 0 : index
    %c0_39 = arith.constant 0 : index
    %67 = vector.load %arg16[%c0_38, %c0_39] : memref<32x128xf32, #tpu.memory_space<vmem>>, vector<32x128xf32>
    tpu.vector_store %arg16[%c0_38, %c0_39], %66 {strides = array<i32>} : memref<32x128xf32, #tpu.memory_space<vmem>>, vector<32x128xf32>,
    %68 = arith.truncf %66 : vector<32x128xf32> to vector<32x128xbf16>
    %c0_40 = arith.constant 0 : index
    %c0_41 = arith.constant 0 : index
    %69 = vector.load %arg8[%c0_40, %c0_41] : memref<128x128xbf16, #tpu.memory_space<vmem>>, vector<128x128xbf16>
    %cst_42 = arith.constant dense<0.000000e+00> : vector<32x128xf32>
    %70 = tpu.matmul %68, %69, %cst_42 {dimension_numbers = #tpu.dot_dimension_numbers<[1], [0], [0], [1], [0, 0, 1, 1], [], []>} : vector<32x128xbf16>, vector<128x128xbf16>, vector<32x128xf32> -> vector<32x128xf32>
    %c0_43 = arith.constant 0 : index
    %c0_44 = arith.constant 0 : index
    %71 = vector.load %arg9[%c0_43, %c0_44] : memref<1x128xf32, #tpu.memory_space<vmem>>, vector<1x128xf32>
    %72 = vector.broadcast %71 : vector<1x128xf32> to vector<32x128xf32>
    %73 = arith.addf %70, %72 : vector<32x128xf32>
    %cst_45 = arith.constant 0.000000e+00 : f32
    %74 = vector.broadcast %cst_45 : f32 to vector<32x128xf32>
    %75 = arith.maximumf %73, %74 : vector<32x128xf32>
    %76 = arith.truncf %75 : vector<32x128xf32> to vector<32x128xbf16>
    %c0_46 = arith.constant 0 : index
    %c0_47 = arith.constant 0 : index
    %77 = vector.load %arg10[%c0_46, %c0_47] : memref<128x256xbf16, #tpu.memory_space<vmem>>, vector<128x256xbf16>
    %cst_48 = arith.constant dense<0.000000e+00> : vector<32x256xf32>
    %78 = tpu.matmul %76, %77, %cst_48 {dimension_numbers = #tpu.dot_dimension_numbers<[1], [0], [0], [1], [0, 0, 1, 1], [], []>} : vector<32x128xbf16>, vector<128x256xbf16>, vector<32x256xf32> -> vector<32x256xf32>
    %c0_49 = arith.constant 0 : index
    %c0_50 = arith.constant 0 : index
    %79 = vector.load %arg11[%c0_49, %c0_50] : memref<1x256xf32, #tpu.memory_space<vmem>>, vector<1x256xf32>
    %80 = vector.broadcast %79 : vector<1x256xf32> to vector<32x256xf32>
    %81 = arith.addf %78, %80 : vector<32x256xf32>
    %82 = vector.extract_strided_slice %81 {offsets = [0, 0], sizes = [32, 128], strides = [1, 1]} : vector<32x256xf32> to vector<32x128xf32>
    %83 = vector.extract_strided_slice %81 {offsets = [0, 128], sizes = [32, 128], strides = [1, 1]} : vector<32x256xf32> to vector<32x128xf32>
    %84 = arith.negf %83 : vector<32x128xf32>
    %85 = math.exp %84 : vector<32x128xf32>
    %cst_51 = arith.constant 1.000000e+00 : f32
    %86 = vector.broadcast %cst_51 : f32 to vector<32x128xf32>
    %87 = arith.addf %86, %85 : vector<32x128xf32>
    %88 = arith.divf %86, %87 : vector<32x128xf32>
    %89 = arith.mulf %82, %88 : vector<32x128xf32>
    %c0_52 = arith.constant 0 : index
    %c0_53 = arith.constant 0 : index
    %90 = vector.load %arg17[%c0_52, %c0_53] : memref<32x128xf32, #tpu.memory_space<vmem>>, vector<32x128xf32>
    tpu.vector_store %arg17[%c0_52, %c0_53], %89 {strides = array<i32>} : memref<32x128xf32, #tpu.memory_space<vmem>>, vector<32x128xf32>,
    %91 = arith.truncf %89 : vector<32x128xf32> to vector<32x128xbf16>
    %c0_54 = arith.constant 0 : index
    %c0_55 = arith.constant 0 : index
    %92 = vector.load %arg12[%c0_54, %c0_55] : memref<128x128xbf16, #tpu.memory_space<vmem>>, vector<128x128xbf16>
    %cst_56 = arith.constant dense<0.000000e+00> : vector<32x128xf32>
    %93 = tpu.matmul %91, %92, %cst_56 {dimension_numbers = #tpu.dot_dimension_numbers<[1], [0], [0], [1], [0, 0, 1, 1], [], []>} : vector<32x128xbf16>, vector<128x128xbf16>, vector<32x128xf32> -> vector<32x128xf32>
    %c0_57 = arith.constant 0 : index
    %c0_58 = arith.constant 0 : index
    %94 = vector.load %arg13[%c0_57, %c0_58] : memref<1x128xf32, #tpu.memory_space<vmem>>, vector<1x128xf32>
    %95 = vector.broadcast %94 : vector<1x128xf32> to vector<32x128xf32>
    %96 = arith.addf %93, %95 : vector<32x128xf32>
    %cst_59 = arith.constant 0.000000e+00 : f32
    %97 = vector.broadcast %cst_59 : f32 to vector<32x128xf32>
    %98 = arith.maximumf %96, %97 : vector<32x128xf32>
    %99 = arith.truncf %98 : vector<32x128xf32> to vector<32x128xbf16>
    %c0_60 = arith.constant 0 : index
    %c0_61 = arith.constant 0 : index
    %100 = vector.load %arg14[%c0_60, %c0_61] : memref<128x256xbf16, #tpu.memory_space<vmem>>, vector<128x256xbf16>
    %cst_62 = arith.constant dense<0.000000e+00> : vector<32x256xf32>
    %101 = tpu.matmul %99, %100, %cst_62 {dimension_numbers = #tpu.dot_dimension_numbers<[1], [0], [0], [1], [0, 0, 1, 1], [], []>} : vector<32x128xbf16>, vector<128x256xbf16>, vector<32x256xf32> -> vector<32x256xf32>
    %c0_63 = arith.constant 0 : index
    %c0_64 = arith.constant 0 : index
    %102 = vector.load %arg15[%c0_63, %c0_64] : memref<1x256xf32, #tpu.memory_space<vmem>>, vector<1x256xf32>
    %103 = vector.broadcast %102 : vector<1x256xf32> to vector<32x256xf32>
    %104 = arith.addf %101, %103 : vector<32x256xf32>
    %105 = vector.extract_strided_slice %104 {offsets = [0, 0], sizes = [32, 128], strides = [1, 1]} : vector<32x256xf32> to vector<32x128xf32>
    %106 = vector.extract_strided_slice %104 {offsets = [0, 128], sizes = [32, 128], strides = [1, 1]} : vector<32x256xf32> to vector<32x128xf32>
    %107 = arith.negf %106 : vector<32x128xf32>
    %108 = math.exp %107 : vector<32x128xf32>
    %cst_65 = arith.constant 1.000000e+00 : f32
    %109 = vector.broadcast %cst_65 : f32 to vector<32x128xf32>
    %110 = arith.addf %109, %108 : vector<32x128xf32>
    %111 = arith.divf %109, %110 : vector<32x128xf32>
    %112 = arith.mulf %105, %111 : vector<32x128xf32>
    %c0_66 = arith.constant 0 : index
    %c0_67 = arith.constant 0 : index
    %113 = vector.load %arg18[%c0_66, %c0_67] : memref<32x128xf32, #tpu.memory_space<vmem>>, vector<32x128xf32>
    tpu.vector_store %arg18[%c0_66, %c0_67], %112 {strides = array<i32>} : memref<32x128xf32, #tpu.memory_space<vmem>>, vector<32x128xf32>,
    return
  }
}

module attributes {stable_mosaic.version = 11 : i64} {
  func.func @_lstm_kernel(%arg0: memref<128x32xf32, #tpu.memory_space<vmem>>, %arg1: memref<32x128xbf16, #tpu.memory_space<vmem>>, %arg2: memref<32x128xbf16, #tpu.memory_space<vmem>>, %arg3: memref<1x128xf32, #tpu.memory_space<vmem>>, %arg4: memref<32x128xbf16, #tpu.memory_space<vmem>>, %arg5: memref<32x128xbf16, #tpu.memory_space<vmem>>, %arg6: memref<1x128xf32, #tpu.memory_space<vmem>>, %arg7: memref<128x32xf32, #tpu.memory_space<vmem>>, %arg8: memref<128x128xf32, #tpu.memory_space<vmem>>, %arg9: memref<128x32xf32, #tpu.memory_space<vmem>>) attributes {dimension_semantics = [], scalar_prefetch = 0 : i64, scratch_operands = 2 : i64, tpu.core_type = #tpu.core_type<tc>} {
    %c0 = arith.constant 0 : index
    %c0_0 = arith.constant 0 : index
    %0 = vector.load %arg0[%c0, %c0_0] : memref<128x32xf32, #tpu.memory_space<vmem>>, vector<128x32xf32>
    %1 = arith.truncf %0 : vector<128x32xf32> to vector<128x32xbf16>
    %c0_1 = arith.constant 0 : index
    %c0_2 = arith.constant 0 : index
    %2 = vector.load %arg1[%c0_1, %c0_2] : memref<32x128xbf16, #tpu.memory_space<vmem>>, vector<32x128xbf16>
    %cst = arith.constant dense<0.000000e+00> : vector<128x128xf32>
    %3 = tpu.matmul %1, %2, %cst {dimension_numbers = #tpu.dot_dimension_numbers<[1], [0], [0], [1], [0, 0, 1, 1], [], []>} : vector<128x32xbf16>, vector<32x128xbf16>, vector<128x128xf32> -> vector<128x128xf32>
    %c0_3 = arith.constant 0 : index
    %c0_4 = arith.constant 0 : index
    %4 = vector.load %arg3[%c0_3, %c0_4] : memref<1x128xf32, #tpu.memory_space<vmem>>, vector<1x128xf32>
    %5 = vector.broadcast %4 : vector<1x128xf32> to vector<128x128xf32>
    %6 = arith.addf %3, %5 : vector<128x128xf32>
    %c0_5 = arith.constant 0 : index
    %c0_6 = arith.constant 0 : index
    %7 = vector.load %arg8[%c0_5, %c0_6] : memref<128x128xf32, #tpu.memory_space<vmem>>, vector<128x128xf32>
    tpu.vector_store %arg8[%c0_5, %c0_6], %6 {strides = array<i32>} : memref<128x128xf32, #tpu.memory_space<vmem>>, vector<128x128xf32>,
    %c0_7 = arith.constant 0 : index
    %c0_8 = arith.constant 0 : index
    %8 = vector.load %arg2[%c0_7, %c0_8] : memref<32x128xbf16, #tpu.memory_space<vmem>>, vector<32x128xbf16>
    %cst_9 = arith.constant 0.000000e+00 : f32
    %9 = vector.broadcast %cst_9 : f32 to vector<2x32xf32>
    %cst_10 = arith.constant 0.000000e+00 : f32
    %10 = vector.broadcast %cst_10 : f32 to vector<2x32xf32>
    %c0_i32 = arith.constant 0 : i32
    %c16_i32 = arith.constant 16 : i32
    %11 = arith.addi %c0_i32, %c16_i32 : i32
    %c1_i32 = arith.constant 1 : i32
    %12:2 = scf.for %arg10 = %c0_i32 to %11 step %c1_i32 iter_args(%arg11 = %9, %arg12 = %10) -> (vector<2x32xf32>, vector<2x32xf32>)  : i32 {
      %c4_i32 = arith.constant 4 : i32
      %26 = arith.muli %arg10, %c4_i32 : i32
      %c0_i32_29 = arith.constant 0 : i32
      %27 = arith.addi %26, %c0_i32_29 : i32
      %c2_i32 = arith.constant 2 : i32
      %28 = arith.muli %27, %c2_i32 : i32
      %29 = arith.index_cast %28 : i32 to index
      %c0_30 = arith.constant 0 : index
      %30 = vector.load %arg8[%29, %c0_30] : memref<128x128xf32, #tpu.memory_space<vmem>>, vector<2x128xf32>
      %31 = arith.truncf %arg11 : vector<2x32xf32> to vector<2x32xbf16>
      %cst_31 = arith.constant dense<0.000000e+00> : vector<2x128xf32>
      %32 = tpu.matmul %31, %8, %cst_31 {dimension_numbers = #tpu.dot_dimension_numbers<[1], [0], [0], [1], [0, 0, 1, 1], [], []>} : vector<2x32xbf16>, vector<32x128xbf16>, vector<2x128xf32> -> vector<2x128xf32>
      %33 = arith.addf %30, %32 : vector<2x128xf32>
      %34 = vector.extract_strided_slice %33 {offsets = [0, 0], sizes = [2, 32], strides = [1, 1]} : vector<2x128xf32> to vector<2x32xf32>
      %35 = arith.negf %34 : vector<2x32xf32>
      %36 = math.exp %35 : vector<2x32xf32>
      %cst_32 = arith.constant 1.000000e+00 : f32
      %37 = vector.broadcast %cst_32 : f32 to vector<2x32xf32>
      %38 = arith.addf %37, %36 : vector<2x32xf32>
      %39 = arith.divf %37, %38 : vector<2x32xf32>
      %40 = vector.extract_strided_slice %33 {offsets = [0, 32], sizes = [2, 32], strides = [1, 1]} : vector<2x128xf32> to vector<2x32xf32>
      %41 = arith.negf %40 : vector<2x32xf32>
      %42 = math.exp %41 : vector<2x32xf32>
      %cst_33 = arith.constant 1.000000e+00 : f32
      %43 = vector.broadcast %cst_33 : f32 to vector<2x32xf32>
      %44 = arith.addf %43, %42 : vector<2x32xf32>
      %45 = arith.divf %43, %44 : vector<2x32xf32>
      %46 = vector.extract_strided_slice %33 {offsets = [0, 64], sizes = [2, 32], strides = [1, 1]} : vector<2x128xf32> to vector<2x32xf32>
      %47 = math.tanh %46 : vector<2x32xf32>
      %48 = vector.extract_strided_slice %33 {offsets = [0, 96], sizes = [2, 32], strides = [1, 1]} : vector<2x128xf32> to vector<2x32xf32>
      %49 = arith.negf %48 : vector<2x32xf32>
      %50 = math.exp %49 : vector<2x32xf32>
      %cst_34 = arith.constant 1.000000e+00 : f32
      %51 = vector.broadcast %cst_34 : f32 to vector<2x32xf32>
      %52 = arith.addf %51, %50 : vector<2x32xf32>
      %53 = arith.divf %51, %52 : vector<2x32xf32>
      %54 = arith.mulf %45, %arg12 : vector<2x32xf32>
      %55 = arith.mulf %39, %47 : vector<2x32xf32>
      %56 = arith.addf %54, %55 : vector<2x32xf32>
      %57 = math.tanh %56 : vector<2x32xf32>
      %58 = arith.mulf %53, %57 : vector<2x32xf32>
      %59 = arith.index_cast %28 : i32 to index
      %c0_35 = arith.constant 0 : index
      %60 = vector.load %arg9[%59, %c0_35] : memref<128x32xf32, #tpu.memory_space<vmem>>, vector<2x32xf32>
      tpu.vector_store %arg9[%59, %c0_35], %58 {strides = array<i32>} : memref<128x32xf32, #tpu.memory_space<vmem>>, vector<2x32xf32>,
      %c4_i32_36 = arith.constant 4 : i32
      %61 = arith.muli %arg10, %c4_i32_36 : i32
      %c1_i32_37 = arith.constant 1 : i32
      %62 = arith.addi %61, %c1_i32_37 : i32
      %c2_i32_38 = arith.constant 2 : i32
      %63 = arith.muli %62, %c2_i32_38 : i32
      %64 = arith.index_cast %63 : i32 to index
      %c0_39 = arith.constant 0 : index
      %65 = vector.load %arg8[%64, %c0_39] : memref<128x128xf32, #tpu.memory_space<vmem>>, vector<2x128xf32>
      %66 = arith.truncf %58 : vector<2x32xf32> to vector<2x32xbf16>
      %cst_40 = arith.constant dense<0.000000e+00> : vector<2x128xf32>
      %67 = tpu.matmul %66, %8, %cst_40 {dimension_numbers = #tpu.dot_dimension_numbers<[1], [0], [0], [1], [0, 0, 1, 1], [], []>} : vector<2x32xbf16>, vector<32x128xbf16>, vector<2x128xf32> -> vector<2x128xf32>
      %68 = arith.addf %65, %67 : vector<2x128xf32>
      %69 = vector.extract_strided_slice %68 {offsets = [0, 0], sizes = [2, 32], strides = [1, 1]} : vector<2x128xf32> to vector<2x32xf32>
      %70 = arith.negf %69 : vector<2x32xf32>
      %71 = math.exp %70 : vector<2x32xf32>
      %cst_41 = arith.constant 1.000000e+00 : f32
      %72 = vector.broadcast %cst_41 : f32 to vector<2x32xf32>
      %73 = arith.addf %72, %71 : vector<2x32xf32>
      %74 = arith.divf %72, %73 : vector<2x32xf32>
      %75 = vector.extract_strided_slice %68 {offsets = [0, 32], sizes = [2, 32], strides = [1, 1]} : vector<2x128xf32> to vector<2x32xf32>
      %76 = arith.negf %75 : vector<2x32xf32>
      %77 = math.exp %76 : vector<2x32xf32>
      %cst_42 = arith.constant 1.000000e+00 : f32
      %78 = vector.broadcast %cst_42 : f32 to vector<2x32xf32>
      %79 = arith.addf %78, %77 : vector<2x32xf32>
      %80 = arith.divf %78, %79 : vector<2x32xf32>
      %81 = vector.extract_strided_slice %68 {offsets = [0, 64], sizes = [2, 32], strides = [1, 1]} : vector<2x128xf32> to vector<2x32xf32>
      %82 = math.tanh %81 : vector<2x32xf32>
      %83 = vector.extract_strided_slice %68 {offsets = [0, 96], sizes = [2, 32], strides = [1, 1]} : vector<2x128xf32> to vector<2x32xf32>
      %84 = arith.negf %83 : vector<2x32xf32>
      %85 = math.exp %84 : vector<2x32xf32>
      %cst_43 = arith.constant 1.000000e+00 : f32
      %86 = vector.broadcast %cst_43 : f32 to vector<2x32xf32>
      %87 = arith.addf %86, %85 : vector<2x32xf32>
      %88 = arith.divf %86, %87 : vector<2x32xf32>
      %89 = arith.mulf %80, %56 : vector<2x32xf32>
      %90 = arith.mulf %74, %82 : vector<2x32xf32>
      %91 = arith.addf %89, %90 : vector<2x32xf32>
      %92 = math.tanh %91 : vector<2x32xf32>
      %93 = arith.mulf %88, %92 : vector<2x32xf32>
      %94 = arith.index_cast %63 : i32 to index
      %c0_44 = arith.constant 0 : index
      %95 = vector.load %arg9[%94, %c0_44] : memref<128x32xf32, #tpu.memory_space<vmem>>, vector<2x32xf32>
      tpu.vector_store %arg9[%94, %c0_44], %93 {strides = array<i32>} : memref<128x32xf32, #tpu.memory_space<vmem>>, vector<2x32xf32>,
      %c4_i32_45 = arith.constant 4 : i32
      %96 = arith.muli %arg10, %c4_i32_45 : i32
      %c2_i32_46 = arith.constant 2 : i32
      %97 = arith.addi %96, %c2_i32_46 : i32
      %c2_i32_47 = arith.constant 2 : i32
      %98 = arith.muli %97, %c2_i32_47 : i32
      %99 = arith.index_cast %98 : i32 to index
      %c0_48 = arith.constant 0 : index
      %100 = vector.load %arg8[%99, %c0_48] : memref<128x128xf32, #tpu.memory_space<vmem>>, vector<2x128xf32>
      %101 = arith.truncf %93 : vector<2x32xf32> to vector<2x32xbf16>
      %cst_49 = arith.constant dense<0.000000e+00> : vector<2x128xf32>
      %102 = tpu.matmul %101, %8, %cst_49 {dimension_numbers = #tpu.dot_dimension_numbers<[1], [0], [0], [1], [0, 0, 1, 1], [], []>} : vector<2x32xbf16>, vector<32x128xbf16>, vector<2x128xf32> -> vector<2x128xf32>
      %103 = arith.addf %100, %102 : vector<2x128xf32>
      %104 = vector.extract_strided_slice %103 {offsets = [0, 0], sizes = [2, 32], strides = [1, 1]} : vector<2x128xf32> to vector<2x32xf32>
      %105 = arith.negf %104 : vector<2x32xf32>
      %106 = math.exp %105 : vector<2x32xf32>
      %cst_50 = arith.constant 1.000000e+00 : f32
      %107 = vector.broadcast %cst_50 : f32 to vector<2x32xf32>
      %108 = arith.addf %107, %106 : vector<2x32xf32>
      %109 = arith.divf %107, %108 : vector<2x32xf32>
      %110 = vector.extract_strided_slice %103 {offsets = [0, 32], sizes = [2, 32], strides = [1, 1]} : vector<2x128xf32> to vector<2x32xf32>
      %111 = arith.negf %110 : vector<2x32xf32>
      %112 = math.exp %111 : vector<2x32xf32>
      %cst_51 = arith.constant 1.000000e+00 : f32
      %113 = vector.broadcast %cst_51 : f32 to vector<2x32xf32>
      %114 = arith.addf %113, %112 : vector<2x32xf32>
      %115 = arith.divf %113, %114 : vector<2x32xf32>
      %116 = vector.extract_strided_slice %103 {offsets = [0, 64], sizes = [2, 32], strides = [1, 1]} : vector<2x128xf32> to vector<2x32xf32>
      %117 = math.tanh %116 : vector<2x32xf32>
      %118 = vector.extract_strided_slice %103 {offsets = [0, 96], sizes = [2, 32], strides = [1, 1]} : vector<2x128xf32> to vector<2x32xf32>
      %119 = arith.negf %118 : vector<2x32xf32>
      %120 = math.exp %119 : vector<2x32xf32>
      %cst_52 = arith.constant 1.000000e+00 : f32
      %121 = vector.broadcast %cst_52 : f32 to vector<2x32xf32>
      %122 = arith.addf %121, %120 : vector<2x32xf32>
      %123 = arith.divf %121, %122 : vector<2x32xf32>
      %124 = arith.mulf %115, %91 : vector<2x32xf32>
      %125 = arith.mulf %109, %117 : vector<2x32xf32>
      %126 = arith.addf %124, %125 : vector<2x32xf32>
      %127 = math.tanh %126 : vector<2x32xf32>
      %128 = arith.mulf %123, %127 : vector<2x32xf32>
      %129 = arith.index_cast %98 : i32 to index
      %c0_53 = arith.constant 0 : index
      %130 = vector.load %arg9[%129, %c0_53] : memref<128x32xf32, #tpu.memory_space<vmem>>, vector<2x32xf32>
      tpu.vector_store %arg9[%129, %c0_53], %128 {strides = array<i32>} : memref<128x32xf32, #tpu.memory_space<vmem>>, vector<2x32xf32>,
      %c4_i32_54 = arith.constant 4 : i32
      %131 = arith.muli %arg10, %c4_i32_54 : i32
      %c3_i32 = arith.constant 3 : i32
      %132 = arith.addi %131, %c3_i32 : i32
      %c2_i32_55 = arith.constant 2 : i32
      %133 = arith.muli %132, %c2_i32_55 : i32
      %134 = arith.index_cast %133 : i32 to index
      %c0_56 = arith.constant 0 : index
      %135 = vector.load %arg8[%134, %c0_56] : memref<128x128xf32, #tpu.memory_space<vmem>>, vector<2x128xf32>
      %136 = arith.truncf %128 : vector<2x32xf32> to vector<2x32xbf16>
      %cst_57 = arith.constant dense<0.000000e+00> : vector<2x128xf32>
      %137 = tpu.matmul %136, %8, %cst_57 {dimension_numbers = #tpu.dot_dimension_numbers<[1], [0], [0], [1], [0, 0, 1, 1], [], []>} : vector<2x32xbf16>, vector<32x128xbf16>, vector<2x128xf32> -> vector<2x128xf32>
      %138 = arith.addf %135, %137 : vector<2x128xf32>
      %139 = vector.extract_strided_slice %138 {offsets = [0, 0], sizes = [2, 32], strides = [1, 1]} : vector<2x128xf32> to vector<2x32xf32>
      %140 = arith.negf %139 : vector<2x32xf32>
      %141 = math.exp %140 : vector<2x32xf32>
      %cst_58 = arith.constant 1.000000e+00 : f32
      %142 = vector.broadcast %cst_58 : f32 to vector<2x32xf32>
      %143 = arith.addf %142, %141 : vector<2x32xf32>
      %144 = arith.divf %142, %143 : vector<2x32xf32>
      %145 = vector.extract_strided_slice %138 {offsets = [0, 32], sizes = [2, 32], strides = [1, 1]} : vector<2x128xf32> to vector<2x32xf32>
      %146 = arith.negf %145 : vector<2x32xf32>
      %147 = math.exp %146 : vector<2x32xf32>
      %cst_59 = arith.constant 1.000000e+00 : f32
      %148 = vector.broadcast %cst_59 : f32 to vector<2x32xf32>
      %149 = arith.addf %148, %147 : vector<2x32xf32>
      %150 = arith.divf %148, %149 : vector<2x32xf32>
      %151 = vector.extract_strided_slice %138 {offsets = [0, 64], sizes = [2, 32], strides = [1, 1]} : vector<2x128xf32> to vector<2x32xf32>
      %152 = math.tanh %151 : vector<2x32xf32>
      %153 = vector.extract_strided_slice %138 {offsets = [0, 96], sizes = [2, 32], strides = [1, 1]} : vector<2x128xf32> to vector<2x32xf32>
      %154 = arith.negf %153 : vector<2x32xf32>
      %155 = math.exp %154 : vector<2x32xf32>
      %cst_60 = arith.constant 1.000000e+00 : f32
      %156 = vector.broadcast %cst_60 : f32 to vector<2x32xf32>
      %157 = arith.addf %156, %155 : vector<2x32xf32>
      %158 = arith.divf %156, %157 : vector<2x32xf32>
      %159 = arith.mulf %150, %126 : vector<2x32xf32>
      %160 = arith.mulf %144, %152 : vector<2x32xf32>
      %161 = arith.addf %159, %160 : vector<2x32xf32>
      %162 = math.tanh %161 : vector<2x32xf32>
      %163 = arith.mulf %158, %162 : vector<2x32xf32>
      %164 = arith.index_cast %133 : i32 to index
      %c0_61 = arith.constant 0 : index
      %165 = vector.load %arg9[%164, %c0_61] : memref<128x32xf32, #tpu.memory_space<vmem>>, vector<2x32xf32>
      tpu.vector_store %arg9[%164, %c0_61], %163 {strides = array<i32>} : memref<128x32xf32, #tpu.memory_space<vmem>>, vector<2x32xf32>,
      scf.yield %163, %161 : vector<2x32xf32>, vector<2x32xf32>
    }
    %c16_i32_11 = arith.constant 16 : i32
    %c0_12 = arith.constant 0 : index
    %c0_13 = arith.constant 0 : index
    %13 = vector.load %arg9[%c0_12, %c0_13] : memref<128x32xf32, #tpu.memory_space<vmem>>, vector<128x32xf32>
    %14 = arith.truncf %13 : vector<128x32xf32> to vector<128x32xbf16>
    %c0_14 = arith.constant 0 : index
    %c0_15 = arith.constant 0 : index
    %15 = vector.load %arg4[%c0_14, %c0_15] : memref<32x128xbf16, #tpu.memory_space<vmem>>, vector<32x128xbf16>
    %cst_16 = arith.constant dense<0.000000e+00> : vector<128x128xf32>
    %16 = tpu.matmul %14, %15, %cst_16 {dimension_numbers = #tpu.dot_dimension_numbers<[1], [0], [0], [1], [0, 0, 1, 1], [], []>} : vector<128x32xbf16>, vector<32x128xbf16>, vector<128x128xf32> -> vector<128x128xf32>
    %c0_17 = arith.constant 0 : index
    %c0_18 = arith.constant 0 : index
    %17 = vector.load %arg6[%c0_17, %c0_18] : memref<1x128xf32, #tpu.memory_space<vmem>>, vector<1x128xf32>
    %18 = vector.broadcast %17 : vector<1x128xf32> to vector<128x128xf32>
    %19 = arith.addf %16, %18 : vector<128x128xf32>
    %c0_19 = arith.constant 0 : index
    %c0_20 = arith.constant 0 : index
    %20 = vector.load %arg8[%c0_19, %c0_20] : memref<128x128xf32, #tpu.memory_space<vmem>>, vector<128x128xf32>
    tpu.vector_store %arg8[%c0_19, %c0_20], %19 {strides = array<i32>} : memref<128x128xf32, #tpu.memory_space<vmem>>, vector<128x128xf32>,
    %c0_21 = arith.constant 0 : index
    %c0_22 = arith.constant 0 : index
    %21 = vector.load %arg5[%c0_21, %c0_22] : memref<32x128xbf16, #tpu.memory_space<vmem>>, vector<32x128xbf16>
    %cst_23 = arith.constant 0.000000e+00 : f32
    %22 = vector.broadcast %cst_23 : f32 to vector<2x32xf32>
    %cst_24 = arith.constant 0.000000e+00 : f32
    %23 = vector.broadcast %cst_24 : f32 to vector<2x32xf32>
    %c0_i32_25 = arith.constant 0 : i32
    %c16_i32_26 = arith.constant 16 : i32
    %24 = arith.addi %c0_i32_25, %c16_i32_26 : i32
    %c1_i32_27 = arith.constant 1 : i32
    %25:2 = scf.for %arg10 = %c0_i32_25 to %24 step %c1_i32_27 iter_args(%arg11 = %22, %arg12 = %23) -> (vector<2x32xf32>, vector<2x32xf32>)  : i32 {
      %c4_i32 = arith.constant 4 : i32
      %26 = arith.muli %arg10, %c4_i32 : i32
      %c0_i32_29 = arith.constant 0 : i32
      %27 = arith.addi %26, %c0_i32_29 : i32
      %c2_i32 = arith.constant 2 : i32
      %28 = arith.muli %27, %c2_i32 : i32
      %29 = arith.index_cast %28 : i32 to index
      %c0_30 = arith.constant 0 : index
      %30 = vector.load %arg8[%29, %c0_30] : memref<128x128xf32, #tpu.memory_space<vmem>>, vector<2x128xf32>
      %31 = arith.truncf %arg11 : vector<2x32xf32> to vector<2x32xbf16>
      %cst_31 = arith.constant dense<0.000000e+00> : vector<2x128xf32>
      %32 = tpu.matmul %31, %21, %cst_31 {dimension_numbers = #tpu.dot_dimension_numbers<[1], [0], [0], [1], [0, 0, 1, 1], [], []>} : vector<2x32xbf16>, vector<32x128xbf16>, vector<2x128xf32> -> vector<2x128xf32>
      %33 = arith.addf %30, %32 : vector<2x128xf32>
      %34 = vector.extract_strided_slice %33 {offsets = [0, 0], sizes = [2, 32], strides = [1, 1]} : vector<2x128xf32> to vector<2x32xf32>
      %35 = arith.negf %34 : vector<2x32xf32>
      %36 = math.exp %35 : vector<2x32xf32>
      %cst_32 = arith.constant 1.000000e+00 : f32
      %37 = vector.broadcast %cst_32 : f32 to vector<2x32xf32>
      %38 = arith.addf %37, %36 : vector<2x32xf32>
      %39 = arith.divf %37, %38 : vector<2x32xf32>
      %40 = vector.extract_strided_slice %33 {offsets = [0, 32], sizes = [2, 32], strides = [1, 1]} : vector<2x128xf32> to vector<2x32xf32>
      %41 = arith.negf %40 : vector<2x32xf32>
      %42 = math.exp %41 : vector<2x32xf32>
      %cst_33 = arith.constant 1.000000e+00 : f32
      %43 = vector.broadcast %cst_33 : f32 to vector<2x32xf32>
      %44 = arith.addf %43, %42 : vector<2x32xf32>
      %45 = arith.divf %43, %44 : vector<2x32xf32>
      %46 = vector.extract_strided_slice %33 {offsets = [0, 64], sizes = [2, 32], strides = [1, 1]} : vector<2x128xf32> to vector<2x32xf32>
      %47 = math.tanh %46 : vector<2x32xf32>
      %48 = vector.extract_strided_slice %33 {offsets = [0, 96], sizes = [2, 32], strides = [1, 1]} : vector<2x128xf32> to vector<2x32xf32>
      %49 = arith.negf %48 : vector<2x32xf32>
      %50 = math.exp %49 : vector<2x32xf32>
      %cst_34 = arith.constant 1.000000e+00 : f32
      %51 = vector.broadcast %cst_34 : f32 to vector<2x32xf32>
      %52 = arith.addf %51, %50 : vector<2x32xf32>
      %53 = arith.divf %51, %52 : vector<2x32xf32>
      %54 = arith.mulf %45, %arg12 : vector<2x32xf32>
      %55 = arith.mulf %39, %47 : vector<2x32xf32>
      %56 = arith.addf %54, %55 : vector<2x32xf32>
      %57 = math.tanh %56 : vector<2x32xf32>
      %58 = arith.mulf %53, %57 : vector<2x32xf32>
      %59 = arith.index_cast %28 : i32 to index
      %c0_35 = arith.constant 0 : index
      %60 = vector.load %arg7[%59, %c0_35] : memref<128x32xf32, #tpu.memory_space<vmem>>, vector<2x32xf32>
      tpu.vector_store %arg7[%59, %c0_35], %58 {strides = array<i32>} : memref<128x32xf32, #tpu.memory_space<vmem>>, vector<2x32xf32>,
      %c4_i32_36 = arith.constant 4 : i32
      %61 = arith.muli %arg10, %c4_i32_36 : i32
      %c1_i32_37 = arith.constant 1 : i32
      %62 = arith.addi %61, %c1_i32_37 : i32
      %c2_i32_38 = arith.constant 2 : i32
      %63 = arith.muli %62, %c2_i32_38 : i32
      %64 = arith.index_cast %63 : i32 to index
      %c0_39 = arith.constant 0 : index
      %65 = vector.load %arg8[%64, %c0_39] : memref<128x128xf32, #tpu.memory_space<vmem>>, vector<2x128xf32>
      %66 = arith.truncf %58 : vector<2x32xf32> to vector<2x32xbf16>
      %cst_40 = arith.constant dense<0.000000e+00> : vector<2x128xf32>
      %67 = tpu.matmul %66, %21, %cst_40 {dimension_numbers = #tpu.dot_dimension_numbers<[1], [0], [0], [1], [0, 0, 1, 1], [], []>} : vector<2x32xbf16>, vector<32x128xbf16>, vector<2x128xf32> -> vector<2x128xf32>
      %68 = arith.addf %65, %67 : vector<2x128xf32>
      %69 = vector.extract_strided_slice %68 {offsets = [0, 0], sizes = [2, 32], strides = [1, 1]} : vector<2x128xf32> to vector<2x32xf32>
      %70 = arith.negf %69 : vector<2x32xf32>
      %71 = math.exp %70 : vector<2x32xf32>
      %cst_41 = arith.constant 1.000000e+00 : f32
      %72 = vector.broadcast %cst_41 : f32 to vector<2x32xf32>
      %73 = arith.addf %72, %71 : vector<2x32xf32>
      %74 = arith.divf %72, %73 : vector<2x32xf32>
      %75 = vector.extract_strided_slice %68 {offsets = [0, 32], sizes = [2, 32], strides = [1, 1]} : vector<2x128xf32> to vector<2x32xf32>
      %76 = arith.negf %75 : vector<2x32xf32>
      %77 = math.exp %76 : vector<2x32xf32>
      %cst_42 = arith.constant 1.000000e+00 : f32
      %78 = vector.broadcast %cst_42 : f32 to vector<2x32xf32>
      %79 = arith.addf %78, %77 : vector<2x32xf32>
      %80 = arith.divf %78, %79 : vector<2x32xf32>
      %81 = vector.extract_strided_slice %68 {offsets = [0, 64], sizes = [2, 32], strides = [1, 1]} : vector<2x128xf32> to vector<2x32xf32>
      %82 = math.tanh %81 : vector<2x32xf32>
      %83 = vector.extract_strided_slice %68 {offsets = [0, 96], sizes = [2, 32], strides = [1, 1]} : vector<2x128xf32> to vector<2x32xf32>
      %84 = arith.negf %83 : vector<2x32xf32>
      %85 = math.exp %84 : vector<2x32xf32>
      %cst_43 = arith.constant 1.000000e+00 : f32
      %86 = vector.broadcast %cst_43 : f32 to vector<2x32xf32>
      %87 = arith.addf %86, %85 : vector<2x32xf32>
      %88 = arith.divf %86, %87 : vector<2x32xf32>
      %89 = arith.mulf %80, %56 : vector<2x32xf32>
      %90 = arith.mulf %74, %82 : vector<2x32xf32>
      %91 = arith.addf %89, %90 : vector<2x32xf32>
      %92 = math.tanh %91 : vector<2x32xf32>
      %93 = arith.mulf %88, %92 : vector<2x32xf32>
      %94 = arith.index_cast %63 : i32 to index
      %c0_44 = arith.constant 0 : index
      %95 = vector.load %arg7[%94, %c0_44] : memref<128x32xf32, #tpu.memory_space<vmem>>, vector<2x32xf32>
      tpu.vector_store %arg7[%94, %c0_44], %93 {strides = array<i32>} : memref<128x32xf32, #tpu.memory_space<vmem>>, vector<2x32xf32>,
      %c4_i32_45 = arith.constant 4 : i32
      %96 = arith.muli %arg10, %c4_i32_45 : i32
      %c2_i32_46 = arith.constant 2 : i32
      %97 = arith.addi %96, %c2_i32_46 : i32
      %c2_i32_47 = arith.constant 2 : i32
      %98 = arith.muli %97, %c2_i32_47 : i32
      %99 = arith.index_cast %98 : i32 to index
      %c0_48 = arith.constant 0 : index
      %100 = vector.load %arg8[%99, %c0_48] : memref<128x128xf32, #tpu.memory_space<vmem>>, vector<2x128xf32>
      %101 = arith.truncf %93 : vector<2x32xf32> to vector<2x32xbf16>
      %cst_49 = arith.constant dense<0.000000e+00> : vector<2x128xf32>
      %102 = tpu.matmul %101, %21, %cst_49 {dimension_numbers = #tpu.dot_dimension_numbers<[1], [0], [0], [1], [0, 0, 1, 1], [], []>} : vector<2x32xbf16>, vector<32x128xbf16>, vector<2x128xf32> -> vector<2x128xf32>
      %103 = arith.addf %100, %102 : vector<2x128xf32>
      %104 = vector.extract_strided_slice %103 {offsets = [0, 0], sizes = [2, 32], strides = [1, 1]} : vector<2x128xf32> to vector<2x32xf32>
      %105 = arith.negf %104 : vector<2x32xf32>
      %106 = math.exp %105 : vector<2x32xf32>
      %cst_50 = arith.constant 1.000000e+00 : f32
      %107 = vector.broadcast %cst_50 : f32 to vector<2x32xf32>
      %108 = arith.addf %107, %106 : vector<2x32xf32>
      %109 = arith.divf %107, %108 : vector<2x32xf32>
      %110 = vector.extract_strided_slice %103 {offsets = [0, 32], sizes = [2, 32], strides = [1, 1]} : vector<2x128xf32> to vector<2x32xf32>
      %111 = arith.negf %110 : vector<2x32xf32>
      %112 = math.exp %111 : vector<2x32xf32>
      %cst_51 = arith.constant 1.000000e+00 : f32
      %113 = vector.broadcast %cst_51 : f32 to vector<2x32xf32>
      %114 = arith.addf %113, %112 : vector<2x32xf32>
      %115 = arith.divf %113, %114 : vector<2x32xf32>
      %116 = vector.extract_strided_slice %103 {offsets = [0, 64], sizes = [2, 32], strides = [1, 1]} : vector<2x128xf32> to vector<2x32xf32>
      %117 = math.tanh %116 : vector<2x32xf32>
      %118 = vector.extract_strided_slice %103 {offsets = [0, 96], sizes = [2, 32], strides = [1, 1]} : vector<2x128xf32> to vector<2x32xf32>
      %119 = arith.negf %118 : vector<2x32xf32>
      %120 = math.exp %119 : vector<2x32xf32>
      %cst_52 = arith.constant 1.000000e+00 : f32
      %121 = vector.broadcast %cst_52 : f32 to vector<2x32xf32>
      %122 = arith.addf %121, %120 : vector<2x32xf32>
      %123 = arith.divf %121, %122 : vector<2x32xf32>
      %124 = arith.mulf %115, %91 : vector<2x32xf32>
      %125 = arith.mulf %109, %117 : vector<2x32xf32>
      %126 = arith.addf %124, %125 : vector<2x32xf32>
      %127 = math.tanh %126 : vector<2x32xf32>
      %128 = arith.mulf %123, %127 : vector<2x32xf32>
      %129 = arith.index_cast %98 : i32 to index
      %c0_53 = arith.constant 0 : index
      %130 = vector.load %arg7[%129, %c0_53] : memref<128x32xf32, #tpu.memory_space<vmem>>, vector<2x32xf32>
      tpu.vector_store %arg7[%129, %c0_53], %128 {strides = array<i32>} : memref<128x32xf32, #tpu.memory_space<vmem>>, vector<2x32xf32>,
      %c4_i32_54 = arith.constant 4 : i32
      %131 = arith.muli %arg10, %c4_i32_54 : i32
      %c3_i32 = arith.constant 3 : i32
      %132 = arith.addi %131, %c3_i32 : i32
      %c2_i32_55 = arith.constant 2 : i32
      %133 = arith.muli %132, %c2_i32_55 : i32
      %134 = arith.index_cast %133 : i32 to index
      %c0_56 = arith.constant 0 : index
      %135 = vector.load %arg8[%134, %c0_56] : memref<128x128xf32, #tpu.memory_space<vmem>>, vector<2x128xf32>
      %136 = arith.truncf %128 : vector<2x32xf32> to vector<2x32xbf16>
      %cst_57 = arith.constant dense<0.000000e+00> : vector<2x128xf32>
      %137 = tpu.matmul %136, %21, %cst_57 {dimension_numbers = #tpu.dot_dimension_numbers<[1], [0], [0], [1], [0, 0, 1, 1], [], []>} : vector<2x32xbf16>, vector<32x128xbf16>, vector<2x128xf32> -> vector<2x128xf32>
      %138 = arith.addf %135, %137 : vector<2x128xf32>
      %139 = vector.extract_strided_slice %138 {offsets = [0, 0], sizes = [2, 32], strides = [1, 1]} : vector<2x128xf32> to vector<2x32xf32>
      %140 = arith.negf %139 : vector<2x32xf32>
      %141 = math.exp %140 : vector<2x32xf32>
      %cst_58 = arith.constant 1.000000e+00 : f32
      %142 = vector.broadcast %cst_58 : f32 to vector<2x32xf32>
      %143 = arith.addf %142, %141 : vector<2x32xf32>
      %144 = arith.divf %142, %143 : vector<2x32xf32>
      %145 = vector.extract_strided_slice %138 {offsets = [0, 32], sizes = [2, 32], strides = [1, 1]} : vector<2x128xf32> to vector<2x32xf32>
      %146 = arith.negf %145 : vector<2x32xf32>
      %147 = math.exp %146 : vector<2x32xf32>
      %cst_59 = arith.constant 1.000000e+00 : f32
      %148 = vector.broadcast %cst_59 : f32 to vector<2x32xf32>
      %149 = arith.addf %148, %147 : vector<2x32xf32>
      %150 = arith.divf %148, %149 : vector<2x32xf32>
      %151 = vector.extract_strided_slice %138 {offsets = [0, 64], sizes = [2, 32], strides = [1, 1]} : vector<2x128xf32> to vector<2x32xf32>
      %152 = math.tanh %151 : vector<2x32xf32>
      %153 = vector.extract_strided_slice %138 {offsets = [0, 96], sizes = [2, 32], strides = [1, 1]} : vector<2x128xf32> to vector<2x32xf32>
      %154 = arith.negf %153 : vector<2x32xf32>
      %155 = math.exp %154 : vector<2x32xf32>
      %cst_60 = arith.constant 1.000000e+00 : f32
      %156 = vector.broadcast %cst_60 : f32 to vector<2x32xf32>
      %157 = arith.addf %156, %155 : vector<2x32xf32>
      %158 = arith.divf %156, %157 : vector<2x32xf32>
      %159 = arith.mulf %150, %126 : vector<2x32xf32>
      %160 = arith.mulf %144, %152 : vector<2x32xf32>
      %161 = arith.addf %159, %160 : vector<2x32xf32>
      %162 = math.tanh %161 : vector<2x32xf32>
      %163 = arith.mulf %158, %162 : vector<2x32xf32>
      %164 = arith.index_cast %133 : i32 to index
      %c0_61 = arith.constant 0 : index
      %165 = vector.load %arg7[%164, %c0_61] : memref<128x32xf32, #tpu.memory_space<vmem>>, vector<2x32xf32>
      tpu.vector_store %arg7[%164, %c0_61], %163 {strides = array<i32>} : memref<128x32xf32, #tpu.memory_space<vmem>>, vector<2x32xf32>,
      scf.yield %163, %161 : vector<2x32xf32>, vector<2x32xf32>
    }
    %c16_i32_28 = arith.constant 16 : i32
    return
  }
}

module attributes {stable_mosaic.version = 11 : i64} {
  func.func @_decoder_kernel(%arg0: memref<32x128xf32, #tpu.memory_space<vmem>>, %arg1: memref<32x128xf32, #tpu.memory_space<vmem>>, %arg2: memref<32x128xf32, #tpu.memory_space<vmem>>, %arg3: memref<32x128xf32, #tpu.memory_space<vmem>>, %arg4: memref<32x128xf32, #tpu.memory_space<vmem>>, %arg5: memref<128x256xbf16, #tpu.memory_space<vmem>>, %arg6: memref<1x256xf32, #tpu.memory_space<vmem>>, %arg7: memref<128x128xbf16, #tpu.memory_space<vmem>>, %arg8: memref<1x128xf32, #tpu.memory_space<vmem>>, %arg9: memref<128x256xbf16, #tpu.memory_space<vmem>>, %arg10: memref<1x256xf32, #tpu.memory_space<vmem>>, %arg11: memref<128x128xbf16, #tpu.memory_space<vmem>>, %arg12: memref<1x128xf32, #tpu.memory_space<vmem>>, %arg13: memref<128x256xbf16, #tpu.memory_space<vmem>>, %arg14: memref<1x256xf32, #tpu.memory_space<vmem>>, %arg15: memref<128x32xbf16, #tpu.memory_space<vmem>>, %arg16: memref<1x32xf32, #tpu.memory_space<vmem>>, %arg17: memref<64x128xbf16, #tpu.memory_space<vmem>>, %arg18: memref<32x128xf32, #tpu.memory_space<vmem>>) attributes {dimension_semantics = [], scalar_prefetch = 0 : i64, scratch_operands = 0 : i64, tpu.core_type = #tpu.core_type<tc>} {
    %c0 = arith.constant 0 : index
    %c0_0 = arith.constant 0 : index
    %0 = vector.load %arg0[%c0, %c0_0] : memref<32x128xf32, #tpu.memory_space<vmem>>, vector<32x128xf32>
    %c0_1 = arith.constant 0 : index
    %c0_2 = arith.constant 0 : index
    %1 = vector.load %arg2[%c0_1, %c0_2] : memref<32x128xf32, #tpu.memory_space<vmem>>, vector<32x128xf32>
    %2 = arith.addf %0, %1 : vector<32x128xf32>
    %3 = arith.truncf %2 : vector<32x128xf32> to vector<32x128xbf16>
    %c0_3 = arith.constant 0 : index
    %c0_4 = arith.constant 0 : index
    %4 = vector.load %arg5[%c0_3, %c0_4] : memref<128x256xbf16, #tpu.memory_space<vmem>>, vector<128x256xbf16>
    %cst = arith.constant dense<0.000000e+00> : vector<32x256xf32>
    %5 = tpu.matmul %3, %4, %cst {dimension_numbers = #tpu.dot_dimension_numbers<[1], [0], [0], [1], [0, 0, 1, 1], [], []>} : vector<32x128xbf16>, vector<128x256xbf16>, vector<32x256xf32> -> vector<32x256xf32>
    %c0_5 = arith.constant 0 : index
    %c0_6 = arith.constant 0 : index
    %6 = vector.load %arg6[%c0_5, %c0_6] : memref<1x256xf32, #tpu.memory_space<vmem>>, vector<1x256xf32>
    %7 = vector.broadcast %6 : vector<1x256xf32> to vector<32x256xf32>
    %8 = arith.addf %5, %7 : vector<32x256xf32>
    %9 = vector.extract_strided_slice %8 {offsets = [0, 0], sizes = [32, 128], strides = [1, 1]} : vector<32x256xf32> to vector<32x128xf32>
    %10 = vector.extract_strided_slice %8 {offsets = [0, 128], sizes = [32, 128], strides = [1, 1]} : vector<32x256xf32> to vector<32x128xf32>
    %11 = arith.negf %10 : vector<32x128xf32>
    %12 = math.exp %11 : vector<32x128xf32>
    %cst_7 = arith.constant 1.000000e+00 : f32
    %13 = vector.broadcast %cst_7 : f32 to vector<32x128xf32>
    %14 = arith.addf %13, %12 : vector<32x128xf32>
    %15 = arith.divf %13, %14 : vector<32x128xf32>
    %16 = arith.mulf %9, %15 : vector<32x128xf32>
    %17 = arith.truncf %16 : vector<32x128xf32> to vector<32x128xbf16>
    %c0_8 = arith.constant 0 : index
    %c0_9 = arith.constant 0 : index
    %18 = vector.load %arg7[%c0_8, %c0_9] : memref<128x128xbf16, #tpu.memory_space<vmem>>, vector<128x128xbf16>
    %cst_10 = arith.constant dense<0.000000e+00> : vector<32x128xf32>
    %19 = tpu.matmul %17, %18, %cst_10 {dimension_numbers = #tpu.dot_dimension_numbers<[1], [0], [0], [1], [0, 0, 1, 1], [], []>} : vector<32x128xbf16>, vector<128x128xbf16>, vector<32x128xf32> -> vector<32x128xf32>
    %c0_11 = arith.constant 0 : index
    %c0_12 = arith.constant 0 : index
    %20 = vector.load %arg8[%c0_11, %c0_12] : memref<1x128xf32, #tpu.memory_space<vmem>>, vector<1x128xf32>
    %21 = vector.broadcast %20 : vector<1x128xf32> to vector<32x128xf32>
    %22 = arith.addf %19, %21 : vector<32x128xf32>
    %cst_13 = arith.constant 0.000000e+00 : f32
    %23 = vector.broadcast %cst_13 : f32 to vector<32x128xf32>
    %24 = arith.maximumf %22, %23 : vector<32x128xf32>
    %c0_14 = arith.constant 0 : index
    %c0_15 = arith.constant 0 : index
    %25 = vector.load %arg3[%c0_14, %c0_15] : memref<32x128xf32, #tpu.memory_space<vmem>>, vector<32x128xf32>
    %26 = arith.addf %24, %25 : vector<32x128xf32>
    %27 = arith.truncf %26 : vector<32x128xf32> to vector<32x128xbf16>
    %c0_16 = arith.constant 0 : index
    %c0_17 = arith.constant 0 : index
    %28 = vector.load %arg9[%c0_16, %c0_17] : memref<128x256xbf16, #tpu.memory_space<vmem>>, vector<128x256xbf16>
    %cst_18 = arith.constant dense<0.000000e+00> : vector<32x256xf32>
    %29 = tpu.matmul %27, %28, %cst_18 {dimension_numbers = #tpu.dot_dimension_numbers<[1], [0], [0], [1], [0, 0, 1, 1], [], []>} : vector<32x128xbf16>, vector<128x256xbf16>, vector<32x256xf32> -> vector<32x256xf32>
    %c0_19 = arith.constant 0 : index
    %c0_20 = arith.constant 0 : index
    %30 = vector.load %arg10[%c0_19, %c0_20] : memref<1x256xf32, #tpu.memory_space<vmem>>, vector<1x256xf32>
    %31 = vector.broadcast %30 : vector<1x256xf32> to vector<32x256xf32>
    %32 = arith.addf %29, %31 : vector<32x256xf32>
    %33 = vector.extract_strided_slice %32 {offsets = [0, 0], sizes = [32, 128], strides = [1, 1]} : vector<32x256xf32> to vector<32x128xf32>
    %34 = vector.extract_strided_slice %32 {offsets = [0, 128], sizes = [32, 128], strides = [1, 1]} : vector<32x256xf32> to vector<32x128xf32>
    %35 = arith.negf %34 : vector<32x128xf32>
    %36 = math.exp %35 : vector<32x128xf32>
    %cst_21 = arith.constant 1.000000e+00 : f32
    %37 = vector.broadcast %cst_21 : f32 to vector<32x128xf32>
    %38 = arith.addf %37, %36 : vector<32x128xf32>
    %39 = arith.divf %37, %38 : vector<32x128xf32>
    %40 = arith.mulf %33, %39 : vector<32x128xf32>
    %41 = arith.truncf %40 : vector<32x128xf32> to vector<32x128xbf16>
    %c0_22 = arith.constant 0 : index
    %c0_23 = arith.constant 0 : index
    %42 = vector.load %arg11[%c0_22, %c0_23] : memref<128x128xbf16, #tpu.memory_space<vmem>>, vector<128x128xbf16>
    %cst_24 = arith.constant dense<0.000000e+00> : vector<32x128xf32>
    %43 = tpu.matmul %41, %42, %cst_24 {dimension_numbers = #tpu.dot_dimension_numbers<[1], [0], [0], [1], [0, 0, 1, 1], [], []>} : vector<32x128xbf16>, vector<128x128xbf16>, vector<32x128xf32> -> vector<32x128xf32>
    %c0_25 = arith.constant 0 : index
    %c0_26 = arith.constant 0 : index
    %44 = vector.load %arg12[%c0_25, %c0_26] : memref<1x128xf32, #tpu.memory_space<vmem>>, vector<1x128xf32>
    %45 = vector.broadcast %44 : vector<1x128xf32> to vector<32x128xf32>
    %46 = arith.addf %43, %45 : vector<32x128xf32>
    %cst_27 = arith.constant 0.000000e+00 : f32
    %47 = vector.broadcast %cst_27 : f32 to vector<32x128xf32>
    %48 = arith.maximumf %46, %47 : vector<32x128xf32>
    %c0_28 = arith.constant 0 : index
    %c0_29 = arith.constant 0 : index
    %49 = vector.load %arg4[%c0_28, %c0_29] : memref<32x128xf32, #tpu.memory_space<vmem>>, vector<32x128xf32>
    %50 = arith.addf %48, %49 : vector<32x128xf32>
    %51 = arith.truncf %50 : vector<32x128xf32> to vector<32x128xbf16>
    %c0_30 = arith.constant 0 : index
    %c0_31 = arith.constant 0 : index
    %52 = vector.load %arg13[%c0_30, %c0_31] : memref<128x256xbf16, #tpu.memory_space<vmem>>, vector<128x256xbf16>
    %cst_32 = arith.constant dense<0.000000e+00> : vector<32x256xf32>
    %53 = tpu.matmul %51, %52, %cst_32 {dimension_numbers = #tpu.dot_dimension_numbers<[1], [0], [0], [1], [0, 0, 1, 1], [], []>} : vector<32x128xbf16>, vector<128x256xbf16>, vector<32x256xf32> -> vector<32x256xf32>
    %c0_33 = arith.constant 0 : index
    %c0_34 = arith.constant 0 : index
    %54 = vector.load %arg14[%c0_33, %c0_34] : memref<1x256xf32, #tpu.memory_space<vmem>>, vector<1x256xf32>
    %55 = vector.broadcast %54 : vector<1x256xf32> to vector<32x256xf32>
    %56 = arith.addf %53, %55 : vector<32x256xf32>
    %57 = vector.extract_strided_slice %56 {offsets = [0, 0], sizes = [32, 128], strides = [1, 1]} : vector<32x256xf32> to vector<32x128xf32>
    %58 = vector.extract_strided_slice %56 {offsets = [0, 128], sizes = [32, 128], strides = [1, 1]} : vector<32x256xf32> to vector<32x128xf32>
    %59 = arith.negf %58 : vector<32x128xf32>
    %60 = math.exp %59 : vector<32x128xf32>
    %cst_35 = arith.constant 1.000000e+00 : f32
    %61 = vector.broadcast %cst_35 : f32 to vector<32x128xf32>
    %62 = arith.addf %61, %60 : vector<32x128xf32>
    %63 = arith.divf %61, %62 : vector<32x128xf32>
    %64 = arith.mulf %57, %63 : vector<32x128xf32>
    %65 = arith.truncf %64 : vector<32x128xf32> to vector<32x128xbf16>
    %c0_36 = arith.constant 0 : index
    %c0_37 = arith.constant 0 : index
    %66 = vector.load %arg15[%c0_36, %c0_37] : memref<128x32xbf16, #tpu.memory_space<vmem>>, vector<128x32xbf16>
    %cst_38 = arith.constant dense<0.000000e+00> : vector<32x32xf32>
    %67 = tpu.matmul %65, %66, %cst_38 {dimension_numbers = #tpu.dot_dimension_numbers<[1], [0], [0], [1], [0, 0, 1, 1], [], []>} : vector<32x128xbf16>, vector<128x32xbf16>, vector<32x32xf32> -> vector<32x32xf32>
    %c0_39 = arith.constant 0 : index
    %c0_40 = arith.constant 0 : index
    %68 = vector.load %arg16[%c0_39, %c0_40] : memref<1x32xf32, #tpu.memory_space<vmem>>, vector<1x32xf32>
    %69 = vector.broadcast %68 : vector<1x32xf32> to vector<32x32xf32>
    %70 = arith.addf %67, %69 : vector<32x32xf32>
    %c0_41 = arith.constant 0 : index
    %c0_42 = arith.constant 0 : index
    %71 = vector.load %arg1[%c0_41, %c0_42] : memref<32x128xf32, #tpu.memory_space<vmem>>, vector<32x32xf32>
    %c0_43 = arith.constant 0 : index
    %c32 = arith.constant 32 : index
    %72 = vector.load %arg1[%c0_43, %c32] : memref<32x128xf32, #tpu.memory_space<vmem>>, vector<32x32xf32>
    %c0_44 = arith.constant 0 : index
    %c64 = arith.constant 64 : index
    %73 = vector.load %arg1[%c0_44, %c64] : memref<32x128xf32, #tpu.memory_space<vmem>>, vector<32x1xf32>
    %c0_45 = arith.constant 0 : index
    %c65 = arith.constant 65 : index
    %74 = vector.load %arg1[%c0_45, %c65] : memref<32x128xf32, #tpu.memory_space<vmem>>, vector<32x1xf32>
    %75 = vector.broadcast %74 : vector<32x1xf32> to vector<32x32xf32>
    %76 = arith.mulf %70, %75 : vector<32x32xf32>
    %77 = vector.broadcast %73 : vector<32x1xf32> to vector<32x32xf32>
    %78 = arith.addf %76, %77 : vector<32x32xf32>
    %79 = math.tanh %78 : vector<32x32xf32>
    %80 = arith.mulf %79, %71 : vector<32x32xf32>
    %81 = arith.mulf %79, %72 : vector<32x32xf32>
    %82 = tpu.concatenate %80, %81 in 1 : vector<32x32xf32>, vector<32x32xf32> -> vector<32x64xf32>
    %83 = arith.truncf %82 : vector<32x64xf32> to vector<32x64xbf16>
    %c0_46 = arith.constant 0 : index
    %c0_47 = arith.constant 0 : index
    %84 = vector.load %arg17[%c0_46, %c0_47] : memref<64x128xbf16, #tpu.memory_space<vmem>>, vector<64x128xbf16>
    %cst_48 = arith.constant dense<0.000000e+00> : vector<32x128xf32>
    %85 = tpu.matmul %83, %84, %cst_48 {dimension_numbers = #tpu.dot_dimension_numbers<[1], [0], [0], [1], [0, 0, 1, 1], [], []>} : vector<32x64xbf16>, vector<64x128xbf16>, vector<32x128xf32> -> vector<32x128xf32>
    %c0_49 = arith.constant 0 : index
    %c0_50 = arith.constant 0 : index
    %86 = vector.load %arg18[%c0_49, %c0_50] : memref<32x128xf32, #tpu.memory_space<vmem>>, vector<32x128xf32>
    tpu.vector_store %arg18[%c0_49, %c0_50], %85 {strides = array<i32>} : memref<32x128xf32, #tpu.memory_space<vmem>>, vector<32x128xf32>,
    return
  }
}

</mosaic_0001>

<bundles_post_ra>
// kernel: _lambda_.4
= control target key start
LH: loop header
LB: loop body
LE: loop exit
PB: predicated region body
PF: predicated region fallthrough
CT: control target
= control target key end

     0   :  { %v191_v0 = vmov 0.0   ;;  %vm192_vm0 = vmmov 0   ;;  %vm62_vm1 = vcmask 523264   ;;  %s247_s1 = inlined_call_operand.vmem [shape: bf16[64,128], index: 1, kind: input, shape index: {}]   ;;  %s248_s0 = inlined_call_operand.vmem [shape: bf16[40,64], index: 0, kind: input, shape index: {}]   ;;  %s249_s2 = inlined_call_operand.vmem [shape: f32[40,128], index: 2, kind: output, shape index: {}]  }
   0x1   :  { %174 = vmatprep.subr.bf16.mxu1 %v191_v0  ;;  %v184_v1 = vld [vmem:[%s247_s1 + $0x18] sm:$0xff]   ;;  %154 = vmatprep.subr.bf16.mxu0 %v191_v0  ;;  %v185_v2 = vld [vmem:[%s247_s1 + $0x10] sm:$0xff]   ;;  %v186_v3 = vld [vmem:[%s247_s1 + $0x8] sm:$0xff]  }
   0x2   :  { %166 = vmatprep.mubr.msk.bf16.mxu1 %vm192_vm0, %v191_v0  ;;  %162 = vmatprep.mubr.msk.bf16.mxu0 %vm192_vm0, %v191_v0  ;;  %v187_v4 = vld [vmem:[%s247_s1] sm:$0xff]   ;;  %v188_v5 = vld [vmem:[%s248_s0 + $0x8] sm:$0xff]   ;;  %v190_v7 = vld [vmem:[%s248_s0 + $0x10] ss:$0 sps:$4 sm:$0xff]  }
   0x3   :  { %178 = vmatpush3.bf16.msra.mxu1 %v184_v1  ;;  %155 = vmatpush3.bf16.msra.mxu0 %v184_v1  ;;  %v189_v6 = vld [vmem:[%s248_s0] sm:$0xff]  }
   0x4   :  { %175 = vmatprep.subr.bf16.mxu1 %v191_v0  ;;  %156 = vmatprep.subr.bf16.mxu0 %v191_v0 }
   0x7   :  { %179 = vmatpush3.bf16.msra.mxu1 %v185_v2  ;;  %157 = vmatpush3.bf16.msra.mxu0 %v185_v2 }
   0x8   :  { %176 = vmatprep.subr.bf16.mxu1 %v191_v0  ;;  %158 = vmatprep.subr.bf16.mxu0 %v191_v0 }
   0xb   :  { %180 = vmatpush3.bf16.msra.mxu1 %v186_v3  ;;  %159 = vmatpush3.bf16.msra.mxu0 %v186_v3 }
   0xc   :  { %177 = vmatprep.subr.bf16.mxu1 %v191_v0  ;;  %160 = vmatprep.subr.bf16.mxu0 %v191_v0 }
   0xf   :  { %181 = vmatpush3.bf16.msra.mxu1 %v187_v4  ;;  %161 = vmatpush3.bf16.msra.mxu0 %v187_v4 }
  0x12   :  { %167 = vmatmul.mubr.msk.bf16.vlgmr.msra.gmra.mxu1 %vm62_vm1, %v188_v5  ;;  %163 = vmatmul.mubr.msk.bf16.vlgmr.msra.gmra.mxu0 %vm62_vm1, %v189_v6 }
  0x13   :  { %170 = vmatprep.mubr.msk.bf16.mxu1 %vm192_vm0, %v191_v0 }
  0x1a   :  { %171 = vmatmul.mubr.msk.bf16.gmra.mxu1 %vm62_vm1, %v190_v7 }
  0xd2   :  { %v114_v8 = vpop.f32.mrf.mxu1  ;;  %v106_v9 = vpop.f32.mrf.mxu0 }
  0xd3   :  { %130 = vst [vmem:[%s249_s2 + $0x10] sm:$0xff] %v114_v8  ;;  %128 = vst [vmem:[%s249_s2] sm:$0xff] %v106_v9 }
  0xd4   :  { %v168_v10 = vpop.f32.mrf.mxu1  ;;  %v164_v11 = vpop.f32.mrf.mxu0 }
  0xd6   :  { %v117_v12 = vpop.f32.mrf.mxu1  ;;  %v109_v13 = vpop.f32.mrf.mxu0 }
  0xd7   :  { %131 = vst [vmem:[%s249_s2 + $0x18] sm:$0xff] %v117_v12  ;;  %129 = vst [vmem:[%s249_s2 + $0x8] sm:$0xff] %v109_v13 }
  0xd8   :  { %v169_v14 = vpop.f32.mrf.mxu1  ;;  %v165_v15 = vpop.f32.mrf.mxu0 }
  0xda   :  { %v122_v16 = vpop.f32.mrf.mxu1 }
  0xdb   :  { %132 = vst [vmem:[%s249_s2 + $0x20] sm:$0xff] %v122_v16 }
  0xdc   :  { %v172_v17 = vpop.f32.mrf.mxu1 }
  0xde   :  { %v125_v18 = vpop.f32.mrf.mxu1 }
  0xe0   :  { %v173_v19 = vpop.f32.mrf.mxu1 }

// kernel: _lambda_.5
= control target key start
LH: loop header
LB: loop body
LE: loop exit
PB: predicated region body
PF: predicated region fallthrough
CT: control target
= control target key end

     0   :  { %vm170_vm0 = vcmask 261120   ;;  %s2442_s0 = inlined_call_operand.vmem [shape: f32[32,32], index: 0, kind: input, shape index: {}]   ;;  %s2443_s1 = inlined_call_operand.vmem [shape: f32[32,32], index: 1, kind: input, shape index: {}]   ;;  %s2444_s2 = inlined_call_operand.vmem [shape: f32[32,32], index: 2, kind: input, shape index: {}]   ;;  %s2445_s3 = inlined_call_operand.vmem [shape: f32[32,32], index: 3, kind: input, shape index: {}]   ;;  %s2446_s19 = inlined_call_operand.vmem [shape: f32[32,128], index: 19, kind: output, shape index: {3}]   ;;  %s2447_s4 = inlined_call_operand.vmem [shape: bf16[32,128], index: 4, kind: input, shape index: {}]   ;;  %s2448_s6 = inlined_call_operand.vmem [shape: bf16[128,256], index: 6, kind: input, shape index: {}]   ;;  %s2449_s5 = inlined_call_operand.vmem [shape: f32[1,128], index: 5, kind: input, shape index: {}]   ;;  %s2450_s8 = inlined_call_operand.vmem [shape: bf16[128,128], index: 8, kind: input, shape index: {}]   ;;  %s2451_s10 = inlined_call_operand.vmem [shape: bf16[128,256], index: 10, kind: input, shape index: {}]   ;;  %s2452_s7 = inlined_call_operand.vmem [shape: f32[1,256], index: 7, kind: input, shape index: {}]   ;;  %s2453_s16 = inlined_call_operand.vmem [shape: f32[32,128], index: 16, kind: output, shape index: {0}]   ;;  %s2454_s9 = inlined_call_operand.vmem [shape: f32[1,128], index: 9, kind: input, shape index: {}]   ;;  %s2455_s12 = inlined_call_operand.vmem [shape: bf16[128,128], index: 12, kind: input, shape index: {}]   ;;  %s2456_s14 = inlined_call_operand.vmem [shape: bf16[128,256], index: 14, kind: input, shape index: {}]   ;;  %s2457_s11 = inlined_call_operand.vmem [shape: f32[1,256], index: 11, kind: input, shape index: {}]   ;;  %s2458_s17 = inlined_call_operand.vmem [shape: f32[32,128], index: 17, kind: output, shape index: {1}]   ;;  %s2459_s13 = inlined_call_operand.vmem [shape: f32[1,128], index: 13, kind: input, shape index: {}]   ;;  %s2460_s15 = inlined_call_operand.vmem [shape: f32[1,256], index: 15, kind: input, shape index: {}]   ;;  %s2461_s18 = inlined_call_operand.vmem [shape: f32[32,128], index: 18, kind: output, shape index: {2}]  }
   0x1   :  { %2466 = sst [smem:[#allocation2_spill]] %s2442_s0 }
   0x2   :  { %2467 = sst [smem:[#allocation3_spill]] %s2443_s1 }
   0x3   :  { %2468 = sst [smem:[#allocation4_spill]] %s2444_s2 }
   0x4   :  { %2469 = sst [smem:[#allocation5_spill]] %s2445_s3 }
   0x5   :  { %s2470_s20 = sld [smem:[#allocation2_spill]] }
   0x6   :  { %s2471_s22 = sld [smem:[#allocation3_spill]] }
   0x7   :  { %s2472_s23 = sld [smem:[#allocation4_spill]] }
   0x8   :  { %s2473_s29 = sld [smem:[#allocation5_spill]] }
   0xb   :  { %v1911_v0 = vld [vmem:[%s2470_s20 + $0x18] sm:$0xff]  ;;  %v1921_v2 = vld [vmem:[%s2470_s20 + $0x10] sm:$0xff]  ;;  %v1937_v7 = vld [vmem:[%s2470_s20 + $0x8] sm:$0xff] }
   0xc   :  { %v1916_v1 = vld [vmem:[%s2471_s22 + $0x18] sm:$0xff]  ;;  %v69_v3 = vmul.f32 %v1911_v0, %v1911_v0  ;;  %v1930_v5 = vld [vmem:[%s2471_s22 + $0x10] sm:$0xff]  ;;  %v68_v6 = vmul.f32 %v1921_v2, %v1921_v2  ;;  %v1942_v8 = vld [vmem:[%s2471_s22 + $0x8] sm:$0xff]  ;;  %v67_v10 = vmul.f32 %v1937_v7, %v1937_v7 }
   0xd   :  { %v73_v4 = vmul.f32 %v1916_v1, %v1916_v1  ;;  %v72_v9 = vmul.f32 %v1930_v5, %v1930_v5  ;;  %v71_v11 = vmul.f32 %v1942_v8, %v1942_v8  ;;  %v1953_v12 = vld [vmem:[%s2470_s20] sm:$0xff]  ;;  %v167_v45 = vld [vmem:[%s2472_s23 + $0x8] sm:$0xff]  ;;  %v168_v46 = vld [vmem:[%s2472_s23 + $0x10] sm:$0xff] }
   0xe   :  { %v1958_v13 = vld [vmem:[%s2471_s22] sm:$0xff]  ;;  %v66_v16 = vmul.f32 %v1953_v12, %v1953_v12  ;;  %v169_v47 = vld [vmem:[%s2472_s23 + $0x18] sm:$0xff]  ;;  %s1806_s22 = smov 32  }
   0xf   :  { %v166_v14 = vld [vmem:[%s2472_s23] sm:$0xff]  ;;  %v1963_v15 = vadd.f32 %v73_v4, %v69_v3  ;;  %v70_v17 = vmul.f32 %v1958_v13, %v1958_v13  ;;  %v1970_v18 = vadd.f32 %v72_v9, %v68_v6  ;;  %v1972_v19 = vadd.f32 %v71_v11, %v67_v10  ;;  %v285_v11 = vld [vmem:[%s2473_s29 + $0x8] sm:$0xff] }
  0x10   :  { %1556 = vmatprep.mubr.msk.f32.mxu0 %vm170_vm0, %v166_v14  ;;  %v284_v56 = vld [vmem:[%s2473_s29] sm:$0xff]  ;;  %v286_v14 = vld [vmem:[%s2473_s29 + $0x10] sm:$0xff] }
  0x11   :  { %v81_v20 = vadd.f32 1e-08, %v1963_v15  ;;  %v80_v21 = vadd.f32 1e-08, %v1970_v18  ;;  %v79_v22 = vadd.f32 1e-08, %v1972_v19  ;;  %v1977_v23 = vadd.f32 %v70_v17, %v66_v16 }
  0x12   :  { %v287_v16 = vld [vmem:[%s2473_s29 + $0x18] sm:$0xff]  ;;  %vm119_vm9 = vcmp.eq.f32.partialorder %v1972_v19, inf  ;;  %vm126_vm11 = vcmp.eq.f32.partialorder %v1970_v18, inf  ;;  %vm121_vm12 = vcmp.eq.f32.partialorder %v1972_v19, 0.0  ;;  %vm133_vm13 = vcmp.eq.f32.partialorder %v1963_v15, inf }
  0x13   :  { %1717 = vrsqrt.f32 %v81_v20  ;;  %v78_v24 = vadd.f32 1e-08, %v1977_v23  ;;  %vm105_vm1 = vcmp.eq.f32.partialorder %v81_v20, inf  ;;  %v108_v26 = vand.u32 2147483648, %v81_v20 }
  0x14   :  { %1719 = vrsqrt.f32 %v80_v21  ;;  %vm107_vm2 = vcmp.eq.f32.partialorder %v81_v20, 0.0  ;;  %vm98_vm3 = vcmp.eq.f32.partialorder %v80_v21, inf  ;;  %v101_v29 = vand.u32 2147483648, %v80_v21 }
  0x15   :  { %1721 = vrsqrt.f32 %v79_v22  ;;  %vm100_vm4 = vcmp.eq.f32.partialorder %v80_v21, 0.0  ;;  %vm91_vm5 = vcmp.eq.f32.partialorder %v79_v22, inf  ;;  %v94_v32 = vand.u32 2147483648, %v79_v22 }
  0x16   :  { %1723 = vrsqrt.f32 %v78_v24  ;;  %vm93_vm6 = vcmp.eq.f32.partialorder %v79_v22, 0.0  ;;  %vm84_vm7 = vcmp.eq.f32.partialorder %v78_v24, inf  ;;  %v87_v40 = vand.u32 2147483648, %v78_v24 }
  0x17   :  { %vm86_vm8 = vcmp.eq.f32.partialorder %v78_v24, 0.0  ;;  %1725 = vrsqrt.f32 %v1972_v19  ;;  %vm112_vm10 = vcmp.eq.f32.partialorder %v1977_v23, inf  ;;  %vm114_vm14 = vcmp.eq.f32.partialorder %v1977_v23, 0.0 }
  0x18   :  { %1727 = vrsqrt.f32 %v1977_v23  ;;  %vm128_vm15 = vcmp.eq.f32.partialorder %v1970_v18, 0.0 }
  0x19   :  { %1729 = vrsqrt.f32 %v1970_v18 }
  0x1a   :  { %1731 = vrsqrt.f32 %v1963_v15 }
  0x20   :  { %v1718_v25 = vpop.eup %1717 }
  0x21   :  { %v1720_v27 = vpop.eup %1719  ;;  %v104_v28 = vmul.f32 %v1718_v25, %v81_v20 }
  0x22   :  { %v1722_v30 = vpop.eup %1721  ;;  %v97_v31 = vmul.f32 %v1720_v27, %v80_v21  ;;  %v122_v27 = vand.u32 2147483648, %v1972_v19 }
  0x23   :  { %v106_v33 = vsel %vm105_vm1, %v81_v20, %v104_v28  ;;  %v90_v34 = vmul.f32 %v1722_v30, %v79_v22  ;;  %v1724_v37 = vpop.eup %1723  ;;  %v115_v30 = vand.u32 2147483648, %v1977_v23  ;;  %vm135_vm1 = vcmp.eq.f32.partialorder %v1963_v15, 0.0 }
  0x24   :  { %v109_v35 = vsel %vm107_vm2, %v108_v26, %v106_v33  ;;  %v99_v36 = vsel %vm98_vm3, %v80_v21, %v97_v31  ;;  %v83_v42 = vmul.f32 %v1724_v37, %v78_v24  ;;  %v1726_v17 = vpop.eup %1725 }
  0x25   :  { %1548 = vmatprep.subr.mxu0 %v109_v35  ;;  %v102_v38 = vsel %vm100_vm4, %v101_v29, %v99_v36  ;;  %v92_v39 = vsel %vm91_vm5, %v79_v22, %v90_v34  ;;  %v1728_v20 = vpop.eup %1727  ;;  %v136_v34 = vand.u32 2147483648, %v1963_v15 }
  0x26   :  { %1549 = vmatpush3.msra.mxu0 %v109_v35  ;;  %v95_v41 = vsel %vm93_vm6, %v94_v32, %v92_v39  ;;  %v85_v43 = vsel %vm84_vm7, %v78_v24, %v83_v42  ;;  %v1730_v21 = vpop.eup %1729  ;;  %v118_v24 = vmul.f32 %v1726_v17, %v1972_v19  ;;  %v111_v25 = vmul.f32 %v1728_v20, %v1977_v23  ;;  %v1627_v17 = vld [vmem:[%s2447_s4 + $0x8] sm:$0xff]  }
  0x27   :  { %1550 = vmatprep.subr.mxu0 %v102_v38  ;;  %v88_v44 = vsel %vm86_vm8, %v87_v40, %v85_v43  ;;  %v1732_v22 = vpop.eup %1731  ;;  %v125_v26 = vmul.f32 %v1730_v21, %v1970_v18  ;;  %v129_v32 = vand.u32 2147483648, %v1970_v18  ;;  %v1632_v20 = vld [vmem:[%s2448_s6 + $0x64] ss:$8 sps:$4 sm:$0xff]   ;;  %v1634_v21 = vld [vmem:[%s2448_s6 + $0x60] ss:$8 sps:$4 sm:$0xff]   ;;  %vm465_vm6 = vcmask 523520  }
  0x28   :  { %1551 = vmatpush3.msra.mxu0 %v102_v38  ;;  %v132_v28 = vmul.f32 %v1732_v22, %v1963_v15  ;;  %v120_v29 = vsel %vm119_vm9, %v1972_v19, %v118_v24  ;;  %v113_v31 = vsel %vm112_vm10, %v1977_v23, %v111_v25  ;;  %v1635_v22 = vld [vmem:[%s2448_s6 + $0x54] ss:$8 sps:$4 sm:$0xff]   ;;  %v1637_v24 = vld [vmem:[%s2448_s6 + $0x50] ss:$8 sps:$4 sm:$0xff]   ;;  %v1638_v25 = vld [vmem:[%s2448_s6 + $0x44] ss:$8 sps:$4 sm:$0xff]  }
  0x29   :  { %1552 = vmatprep.subr.mxu0 %v95_v41  ;;  %v127_v33 = vsel %vm126_vm11, %v1970_v18, %v125_v26  ;;  %v116_v19 = vsel %vm114_vm14, %v115_v30, %v113_v31  ;;  %v1640_v26 = vld [vmem:[%s2448_s6 + $0x40] ss:$8 sps:$4 sm:$0xff]   ;;  %vm470_vm7 = vcmask 531968   ;;  %vm475_vm9 = vcmask 540168  }
  0x2a   :  { %1553 = vmatpush3.msra.mxu0 %v95_v41  ;;  %v134_v36 = vsel %vm133_vm13, %v1963_v15, %v132_v28  ;;  %v130_v37 = vsel %vm128_vm15, %v129_v32, %v127_v33  ;;  %vm138_vm3 = vcmp.gt.f32.partialorder %v116_v19, 0.0  ;;  %v1643_v28 = vld [vmem:[%s2448_s6 + $0x30] ss:$8 sps:$4 sm:$0xff]  }
  0x2b   :  { %1554 = vmatprep.subr.mxu0 %v88_v44  ;;  %vm140_vm4 = vcmp.gt.f32.partialorder %v130_v37, 0.0  ;;  %v142_v39 = vsel %vm138_vm3, %v116_v19, 1.0 }
  0x2c   :  { %1555 = vmatpush3.msra.mxu0 %v88_v44  ;;  %v144_v18 = vsel %vm140_vm4, %v130_v37, 1.0 }
  0x2d   :  { %1557 = vmatmul.mubr.msk.f32.vlgmr.msra.gmra.mxu0 %vm170_vm0, %v167_v45 }
  0x2e   :  { %1559 = vmatprep.mubr.msk.f32.mxu0 %vm170_vm0, %v168_v46 }
  0x31   :  { %1560 = vmatmul.mubr.msk.f32.gmra.mxu0 %vm170_vm0, %v169_v47 }
  0x32   :  { %1570 = vmatprep.mubr.msk.f32.mxu0 %vm170_vm0, %v284_v56 }
  0xed   :  { %v1558_v48 = vpop.f32.mrf.mxu0 }
  0xee   :  { %v271_v49 = vsel %vm170_vm0, %v1558_v48, 0.0 }
  0xef   :  { %272 = vadd.xlane.f32.xlu1 %v271_v49  ;;  %v249_v50 = vpop.f32.mrf.mxu0 }
  0xf0   :  { %v268_v52 = vsel %vm170_vm0, %v249_v50, 0.0 }
  0xf1   :  { %v1561_v51 = vpop.f32.mrf.mxu0 }
  0xf2   :  { %v277_v53 = vsel %vm170_vm0, %v1561_v51, 0.0 }
  0xf3   :  { %269 = vadd.xlane.f32.xlu1 %v268_v52  ;;  %278 = vadd.xlane.f32.xlu0 %v277_v53  ;;  %v259_v54 = vpop.f32.mrf.mxu0 }
  0xf4   :  { %v274_v55 = vsel %vm170_vm0, %v259_v54, 0.0 }
  0xf7   :  { %275 = vadd.xlane.f32.xlu0 %v274_v55 }
 0x178   :  { %v2000_v57 = vpop.xlane.xlu1 %272 }
 0x179   :  { %v2014_v63 = vsub.f32 %v95_v41, %v2000_v57 }
 0x17b   :  { %v289_v9 = vmul.f32 %v2014_v63, %v2014_v63 }
 0x17c   :  { %v2002_v58 = vpop.xlane.xlu0 %278  ;;  %v2009_v61 = vpop.xlane.xlu1 %269 }
 0x17d   :  { %v2005_v59 = vsub.f32 %v109_v35, %v2002_v58  ;;  %v2020_v4 = vsub.f32 %v88_v44, %v2009_v61  ;;  %v123_v35 = vsel %vm121_vm12, %v122_v27, %v120_v29  ;;  %v1641_v27 = vld [vmem:[%s2448_s6 + $0x34] ss:$8 sps:$4 sm:$0xff]  }
 0x17e   :  { %vm139_vm2 = vcmp.gt.f32.partialorder %v123_v35, 0.0 }
 0x17f   :  { %v291_v60 = vmul.f32 %v2005_v59, %v2005_v59  ;;  %v288_v10 = vmul.f32 %v2020_v4, %v2020_v4  ;;  %v143_v23 = vsel %vm139_vm2, %v123_v35, 1.0 }
 0x180   :  { %v2011_v62 = vpop.xlane.xlu0 %275  ;;  %1733 = vrcp.f32 %v143_v23 }
 0x181   :  { %v2017_v3 = vsub.f32 %v102_v38, %v2011_v62  ;;  %1562 = vmatprep.subr.mxu0 %v291_v60  ;;  %v137_v38 = vsel %vm135_vm1, %v136_v34, %v134_v36  ;;  %1735 = vrcp.f32 %v142_v39 }
 0x182   :  { %1563 = vmatpush3.msra.mxu0 %v291_v60  ;;  %vm141_vm5 = vcmp.gt.f32.partialorder %v137_v38, 0.0  ;;  %1737 = vrcp.f32 %v144_v18 }
 0x183   :  { %v290_v6 = vmul.f32 %v2017_v3, %v2017_v3  ;;  %v145_v40 = vsel %vm141_vm5, %v137_v38, 1.0 }
 0x184   :  { %1739 = vrcp.f32 %v145_v40 }
 0x185   :  { %1564 = vmatprep.subr.mxu0 %v290_v6 }
 0x186   :  { %1565 = vmatpush3.msra.mxu0 %v290_v6 }
 0x187   :  { %1566 = vmatprep.subr.mxu0 %v289_v9 }
 0x188   :  { %1567 = vmatpush3.msra.mxu0 %v289_v9 }
 0x189   :  { %1568 = vmatprep.subr.mxu0 %v288_v10 }
 0x18a   :  { %1569 = vmatpush3.msra.mxu0 %v288_v10 }
 0x18b   :  { %1571 = vmatmul.mubr.msk.f32.vlgmr.msra.gmra.mxu0 %vm170_vm0, %v285_v11  ;;  %v1805_v11 = vmov 0.0   ;;  %1576 = vmatprep.subr.bf16.mxu0 %v1627_v17 }
 0x18c   :  { %1573 = vmatprep.mubr.msk.f32.mxu0 %vm170_vm0, %v286_v14  ;;  %442 = vst [vmem:[%s2446_s19 + $0x8] sm:$0xff] %v1805_v11  ;;  %441 = vst [vmem:[%s2446_s19] sm:$0xff] %v1805_v11  ;;  %1577 = vmatpush3.bf16.msra.mxu0 %v1627_v17 }
 0x18d   :  { %v1734_v48 = vpop.eup %1733  ;;  %443 = vst [vmem:[%s2446_s19 + $0x10] sm:$0xff] %v1805_v11  ;;  %444 = vst [vmem:[%s2446_s19 + $0x18] sm:$0xff] %v1805_v11 }
 0x18e   :  { %v1736_v49 = vpop.eup %1735  ;;  %v149_v52 = vmul.f32 %v1734_v48, %v1937_v7  ;;  %v159_v56 = vmul.f32 %v1734_v48, %v1942_v8 }
 0x18f   :  { %1574 = vmatmul.mubr.msk.f32.gmra.mxu0 %vm170_vm0, %v287_v16  ;;  %v1738_v50 = vpop.eup %1737  ;;  %v147_v53 = vmul.f32 %v1736_v49, %v1953_v12  ;;  %v158_v7 = vmul.f32 %v1736_v49, %v1958_v13  ;;  %v1631_v13 = vld [vmem:[%s2448_s6 + $0x70] ss:$8 sps:$4 sm:$0xff]  }
 0x190   :  { %v151_v54 = vmul.f32 %v1738_v50, %v1921_v2  ;;  %v155_v60 = vsel %vm139_vm2, %v149_v52, 1.0  ;;  %v160_v2 = vmul.f32 %v1738_v50, %v1930_v5  ;;  %v1628_v5 = vld [vmem:[%s2447_s4] sm:$0xff]  }
 0x191   :  { %v1740_v51 = vpop.eup %1739  ;;  %v154_v6 = vsel %vm138_vm3, %v147_v53, 1.0  ;;  %446 = vst.msk [vmem:[%s2446_s19 + $0x8] sm:$0xff] %vm170_vm0, %v155_v60  ;;  %v162_v14 = vsel %vm138_vm3, %v158_v7, 0.0  ;;  %1578 = vmatprep.subr.bf16.mxu0 %v1628_v5  ;;  %v1652_v7 = vld [vmem:[%s2448_s6] ss:$8 sps:$4 sm:$0xff]  }
 0x192   :  { %v153_v55 = vmul.f32 %v1740_v51, %v1911_v0  ;;  %v156_v9 = vsel %vm140_vm4, %v151_v54, 1.0  ;;  %445 = vst.msk [vmem:[%s2446_s19] sm:$0xff] %vm170_vm0, %v154_v6  ;;  %v163_v0 = vsel %vm139_vm2, %v159_v56, 0.0  ;;  %v164_v8 = vsel %vm140_vm4, %v160_v2, 0.0  ;;  %1579 = vmatpush3.bf16.msra.mxu0 %v1628_v5  ;;  %v1644_v2 = vld [vmem:[%s2448_s6 + $0x24] ss:$8 sps:$4 sm:$0xff]  }
 0x193   :  { %447 = vst.msk [vmem:[%s2446_s19 + $0x10] sm:$0xff] %vm170_vm0, %v156_v9  ;;  %v161_v12 = vmul.f32 %v1740_v51, %v1916_v1  ;;  %v1629_v1 = vld [vmem:[%s2448_s6 + $0x74] ss:$8 sps:$4 sm:$0xff]  }
 0x194   :  { %v157_v10 = vsel %vm141_vm5, %v153_v55, 1.0  ;;  %674 = vmatprep.subr.bf16.mxu1 %v1629_v1 }
 0x195   :  { %448 = vst.msk [vmem:[%s2446_s19 + $0x18] sm:$0xff] %vm170_vm0, %v157_v10  ;;  %v165_v16 = vsel %vm141_vm5, %v161_v12, 0.0  ;;  %675 = vmatpush1.bf16.msra.mxu1 %v1631_v13 }
 0x196   :  { %676 = vmatprep.subr.bf16.mxu1 %v1632_v20 }
 0x199   :  { %677 = vmatpush1.bf16.msra.mxu1 %v1634_v21 }
 0x19a   :  { %678 = vmatprep.subr.bf16.mxu1 %v1635_v22 }
 0x19d   :  { %679 = vmatpush1.bf16.msra.mxu1 %v1637_v24 }
 0x19e   :  { %680 = vmatprep.subr.bf16.mxu1 %v1638_v25 }
 0x1a1   :  { %681 = vmatpush1.bf16.msra.mxu1 %v1640_v26 }
 0x1a2   :  { %682 = vmatprep.subr.bf16.mxu1 %v1641_v27 }
 0x1a5   :  { %683 = vmatpush1.bf16.msra.mxu1 %v1643_v28 }
 0x1a6   :  { %684 = vmatprep.subr.bf16.mxu1 %v1644_v2 }
 0x24b   :  { %v1572_v15 = vpop.f32.mrf.mxu0 }
 0x24c   :  { %v392_v41 = vsel %vm170_vm0, %v1572_v15, 0.0 }
 0x24d   :  { %393 = vadd.xlane.f32.xlu1 %v392_v41  ;;  %v370_v42 = vpop.f32.mrf.mxu0 }
 0x24e   :  { %v389_v43 = vsel %vm170_vm0, %v370_v42, 0.0 }
 0x24f   :  { %390 = vadd.xlane.f32.xlu0 %v389_v43  ;;  %v1575_v44 = vpop.f32.mrf.mxu0 }
 0x250   :  { %v398_v45 = vsel %vm170_vm0, %v1575_v44, 0.0 }
 0x251   :  { %399 = vadd.xlane.f32.xlu1 %v398_v45  ;;  %v380_v46 = vpop.f32.mrf.mxu0 }
 0x252   :  { %v395_v47 = vsel %vm170_vm0, %v380_v46, 0.0 }
 0x253   :  { %396 = vadd.xlane.f32.xlu0 %v395_v47 }
 0x262   :  { %455 = vrot.lane.b32.xlu1 %v163_v0, %s1806_s22 }
 0x266   :  { %457 = vrot.lane.b32.xlu1 %v164_v8, %s1806_s22  ;;  %v1807_v8 = vmov 0  }
 0x267   :  { %706 = vmatprep.mubr.bf16.mxu1 %v1807_v8 }
 0x269   :  { %453 = vrot.lane.b32.xlu0 %v162_v14, %s1806_s22 }
 0x26a   :  { %459 = vrot.lane.b32.xlu1 %v165_v16, %s1806_s22  ;;  %v1425_v16 = vld [vmem:[%s2449_s5] ss:$0 sm:$0xff] }
 0x2d6   :  { %v394_v29 = vpop.xlane.xlu1 %393 }
 0x2d7   :  { %1741 = vrsqrt.f32 %v394_v29  ;;  %vm410_vm8 = vcmp.eq.f32.partialorder %v394_v29, inf  ;;  %v413_v37 = vand.u32 2147483648, %v394_v29  ;;  %vm412_vm10 = vcmp.eq.f32.partialorder %v394_v29, 0.0 }
 0x2d8   :  { %v391_v30 = vpop.xlane.xlu0 %390 }
 0x2d9   :  { %1743 = vrsqrt.f32 %v391_v30  ;;  %vm403_vm11 = vcmp.eq.f32.partialorder %v391_v30, inf  ;;  %v406_v40 = vand.u32 2147483648, %v391_v30  ;;  %vm405_vm12 = vcmp.eq.f32.partialorder %v391_v30, 0.0 }
 0x2da   :  { %v400_v31 = vpop.xlane.xlu1 %399 }
 0x2db   :  { %1745 = vrsqrt.f32 %v400_v31  ;;  %vm424_vm13 = vcmp.eq.f32.partialorder %v400_v31, inf  ;;  %vm426_vm14 = vcmp.eq.f32.partialorder %v400_v31, 0.0  ;;  %v427_v44 = vand.u32 2147483648, %v400_v31 }
 0x2dc   :  { %v397_v32 = vpop.xlane.xlu0 %396 }
 0x2dd   :  { %1747 = vrsqrt.f32 %v397_v32  ;;  %vm417_vm15 = vcmp.eq.f32.partialorder %v397_v32, inf  ;;  %v420_v48 = vand.u32 2147483648, %v397_v32  ;;  %vm419_vm1 = vcmp.eq.f32.partialorder %v397_v32, 0.0 }
 0x2de   :  { %v456_v33 = vpop.permute.xlu1 %455 }
 0x2df   :  { %467 = vst.msk [vmem:[%s2446_s19 + $0x8] sm:$0xff] %vm465_vm6, %v456_v33  ;;  %v1657_v33 = vld [vmem:[%s2450_s8 + $0x18] sm:$0xff]  }
 0x2e0   :  { %472 = vst.msk [vmem:[%s2446_s19 + $0x8] sm:$0xff] %vm470_vm7, %v2000_v57  ;;  %v454_v34 = vpop.permute.xlu0 %453 }
 0x2e1   :  { %466 = vst.msk [vmem:[%s2446_s19] sm:$0xff] %vm465_vm6, %v454_v34  ;;  %v1658_v34 = vld [vmem:[%s2450_s8 + $0x10] sm:$0xff]  }
 0x2e2   :  { %471 = vst.msk [vmem:[%s2446_s19] sm:$0xff] %vm470_vm7, %v2009_v61  ;;  %v458_v35 = vpop.permute.xlu1 %457 }
 0x2e3   :  { %468 = vst.msk [vmem:[%s2446_s19 + $0x10] sm:$0xff] %vm465_vm6, %v458_v35  ;;  %v1659_v35 = vld [vmem:[%s2450_s8 + $0x8] sm:$0xff]  }
 0x2e4   :  { %v1742_v36 = vpop.eup %1741  ;;  %473 = vst.msk [vmem:[%s2446_s19 + $0x10] sm:$0xff] %vm470_vm7, %v2011_v62 }
 0x2e5   :  { %v409_v57 = vmul.f32 %v1742_v36, %v394_v29  ;;  %v1660_v36 = vld [vmem:[%s2450_s8] sm:$0xff]  }
 0x2e6   :  { %v1744_v19 = vpop.eup %1743  ;;  %v460_v38 = vpop.permute.xlu1 %459 }
 0x2e7   :  { %v411_v61 = vsel %vm410_vm8, %v394_v29, %v409_v57  ;;  %v402_v23 = vmul.f32 %v1744_v19, %v391_v30  ;;  %469 = vst.msk [vmem:[%s2446_s19 + $0x18] sm:$0xff] %vm465_vm6, %v460_v38  ;;  %v1653_v29 = vld [vmem:[%s2450_s8 + $0x38] sm:$0xff]   ;;  %v1664_v38 = vld [vmem:[%s2451_s10 + $0x60] ss:$8 sps:$4 sm:$0xff]  }
 0x2e8   :  { %v1746_v39 = vpop.eup %1745  ;;  %v414_v18 = vsel %vm412_vm10, %v413_v37, %v411_v61  ;;  %474 = vst.msk [vmem:[%s2446_s19 + $0x18] sm:$0xff] %vm470_vm7, %v2002_v58  ;;  %1584 = vmatprep.subr.bf16.mxu0 %v1653_v29  ;;  %v1661_v57 = vld [vmem:[%s2451_s10 + $0x70] ss:$8 sps:$4 sm:$0xff]   ;;  %v1663_v19 = vld [vmem:[%s2451_s10 + $0x74] ss:$8 sps:$4 sm:$0xff]  }
 0x2e9   :  { %v430_v62 = vadd.f32 1e-05, %v414_v18  ;;  %v404_v15 = vsel %vm403_vm11, %v391_v30, %v402_v23  ;;  %v423_v41 = vmul.f32 %v1746_v39, %v400_v31  ;;  %477 = vst.msk [vmem:[%s2446_s19 + $0x8] sm:$0xff] %vm475_vm9, %v414_v18  ;;  %v1654_v30 = vld [vmem:[%s2450_s8 + $0x30] sm:$0xff]   ;;  %v1666_v37 = vld [vmem:[%s2451_s10 + $0x64] ss:$8 sps:$4 sm:$0xff]  }
 0x2ea   :  { %v1748_v42 = vpop.eup %1747  ;;  %v407_v43 = vsel %vm405_vm12, %v406_v40, %v404_v15  ;;  %v1669_v61 = vld [vmem:[%s2451_s10 + $0x54] ss:$8 sps:$4 sm:$0xff]   ;;  %v1667_v23 = vld [vmem:[%s2451_s10 + $0x50] ss:$8 sps:$4 sm:$0xff]   ;;  %v1672_v39 = vld [vmem:[%s2451_s10 + $0x44] ss:$8 sps:$4 sm:$0xff]   ;;  %v584_v15 = vlaneseq }
 0x2eb   :  { %1749 = vrcp.f32 %v430_v62  ;;  %v429_v45 = vadd.f32 1e-05, %v407_v43  ;;  %v425_v46 = vsel %vm424_vm13, %v400_v31, %v423_v41  ;;  %v416_v47 = vmul.f32 %v1748_v42, %v397_v32  ;;  %476 = vst.msk [vmem:[%s2446_s19] sm:$0xff] %vm475_vm9, %v407_v43  ;;  %v1655_v31 = vld [vmem:[%s2450_s8 + $0x28] sm:$0xff]   ;;  %v1675_v40 = vld [vmem:[%s2451_s10 + $0x34] ss:$8 sps:$4 sm:$0xff]  }
 0x2ec   :  { %v428_v58 = vsel %vm426_vm14, %v427_v44, %v425_v46  ;;  %v1670_v18 = vld [vmem:[%s2451_s10 + $0x40] ss:$8 sps:$4 sm:$0xff]   ;;  %v1673_v62 = vld [vmem:[%s2451_s10 + $0x30] ss:$8 sps:$4 sm:$0xff]   ;;  %v585_v41 = vshrl.u32 %v584_v15, 7 }
 0x2ed   :  { %1751 = vrcp.f32 %v429_v45  ;;  %v432_v49 = vadd.f32 1e-05, %v428_v58  ;;  %v418_v50 = vsel %vm417_vm15, %v397_v32, %v416_v47  ;;  %479 = vst.msk [vmem:[%s2446_s19 + $0x18] sm:$0xff] %vm475_vm9, %v428_v58  ;;  %v1656_v32 = vld [vmem:[%s2450_s8 + $0x20] sm:$0xff]  }
 0x2ee   :  { %v421_v51 = vsel %vm419_vm1, %v420_v48, %v418_v50  ;;  %v2288_v42 = vsub.s32 1, %v585_v41  ;;  %v582_v43 = vld [vmem:[%s2452_s7] sm:$0x3] }
 0x2ef   :  { %1753 = vrcp.f32 %v432_v49  ;;  %v431_v52 = vadd.f32 1e-05, %v421_v51  ;;  %478 = vst.msk [vmem:[%s2446_s19 + $0x10] sm:$0xff] %vm475_vm9, %v421_v51 }
 0x2f0   :  { %v591_v44 = vrot.slane %v582_v43, %v2288_v42 }
 0x2f1   :  { %1755 = vrcp.f32 %v431_v52 }
 0x2f8   :  { %v1750_v53 = vpop.eup %1749 }
 0x2f9   :  { %v436_v56 = vmul.f32 %v1750_v53, %v2014_v63  ;;  %v1646_v63 = vld [vmem:[%s2448_s6 + $0x20] ss:$8 sps:$4 sm:$0xff]  }
 0x2fa   :  { %v1752_v54 = vpop.eup %1751  ;;  %685 = vmatpush1.bf16.msra.mxu1 %v1646_v63  ;;  %v2294_v63 = vsub.s32 0, %v585_v41 }
 0x2fb   :  { %v434_v55 = vmul.f32 %v1752_v54, %v2020_v4  ;;  %v1647_v4 = vld [vmem:[%s2448_s6 + $0x14] ss:$8 sps:$4 sm:$0xff]  }
 0x2fc   :  { %v1754_v60 = vpop.eup %1753  ;;  %686 = vmatprep.subr.bf16.mxu1 %v1647_v4 }
 0x2fd   :  { %v480_v6 = vpack.c.bf16 %v436_v56, %v434_v55  ;;  %v440_v11 = vmul.f32 %v1754_v60, %v2005_v59  ;;  %v1649_v59 = vld [vmem:[%s2448_s6 + $0x10] ss:$8 sps:$4 sm:$0xff]  }
 0x2fe   :  { %v1756_v9 = vpop.eup %1755  ;;  %687 = vmatpush1.bf16.msra.mxu1 %v1649_v59 }
 0x2ff   :  { %1580 = vmatprep.mubr.msk.bf16.mxu0 %vm170_vm0, %v480_v6  ;;  %v438_v10 = vmul.f32 %v1756_v9, %v2017_v3  ;;  %v1650_v3 = vld [vmem:[%s2448_s6 + $0x4] ss:$8 sps:$4 sm:$0xff]  }
 0x300   :  { %688 = vmatprep.subr.bf16.mxu1 %v1650_v3  ;;  %v587_v3 = vrot.slane %v582_v43, %v2294_v63 }
 0x301   :  { %v481_v0 = vpack.c.bf16 %v440_v11, %v438_v10 }
 0x302   :  { %689 = vmatpush1.bf16.msra.mxu1 %v1652_v7 }
 0x303   :  { %1581 = vmatmul.mubr.msk.bf16.vlgmr.msra.gmra.mxu0 %vm170_vm0, %v481_v0  ;;  %995 = vmatprep.subr.bf16.mxu1 %v1663_v19 }
 0x304   :  { %1585 = vmatpush3.bf16.msra.mxu0 %v1653_v29  ;;  %v1678_v29 = vld [vmem:[%s2451_s10 + $0x24] ss:$8 sps:$4 sm:$0xff]  }
 0x305   :  { %1586 = vmatprep.subr.bf16.mxu0 %v1654_v30 }
 0x308   :  { %1587 = vmatpush3.bf16.msra.mxu0 %v1654_v30  ;;  %v1676_v30 = vld [vmem:[%s2451_s10 + $0x20] ss:$8 sps:$4 sm:$0xff]  }
 0x309   :  { %1588 = vmatprep.subr.bf16.mxu0 %v1655_v31 }
 0x30c   :  { %1589 = vmatpush3.bf16.msra.mxu0 %v1655_v31  ;;  %v1681_v31 = vld [vmem:[%s2451_s10 + $0x14] ss:$8 sps:$4 sm:$0xff]  }
 0x30d   :  { %1590 = vmatprep.subr.bf16.mxu0 %v1656_v32 }
 0x310   :  { %1591 = vmatpush3.bf16.msra.mxu0 %v1656_v32  ;;  %v1679_v32 = vld [vmem:[%s2451_s10 + $0x10] ss:$8 sps:$4 sm:$0xff]  }
 0x311   :  { %1592 = vmatprep.subr.bf16.mxu0 %v1657_v33 }
 0x314   :  { %1593 = vmatpush3.bf16.msra.mxu0 %v1657_v33  ;;  %v1684_v33 = vld [vmem:[%s2451_s10 + $0x4] ss:$8 sps:$4 sm:$0xff]  }
 0x315   :  { %1594 = vmatprep.subr.bf16.mxu0 %v1658_v34 }
 0x318   :  { %1595 = vmatpush3.bf16.msra.mxu0 %v1658_v34  ;;  %v1682_v34 = vld [vmem:[%s2451_s10] ss:$8 sps:$4 sm:$0xff]  }
 0x319   :  { %1596 = vmatprep.subr.bf16.mxu0 %v1659_v35 }
 0x31c   :  { %1597 = vmatpush3.bf16.msra.mxu0 %v1659_v35 }
 0x31d   :  { %1598 = vmatprep.subr.bf16.mxu0 %v1660_v36 }
 0x320   :  { %1599 = vmatpush3.bf16.msra.mxu0 %v1660_v36 }
 0x3c3   :  { %v1582_v12 = vpop.f32.mrf.mxu0 }
 0x3c4   :  { %v554_v25 = vadd.f32 %v1582_v12, %v1425_v16 }
 0x3c5   :  { %v545_v14 = vpop.f32.mrf.mxu0 }
 0x3c6   :  { %v546_v5 = vadd.f32 %v1425_v16, %v545_v14  ;;  %v562_v27 = vmax.f32 %v554_v25, 0.0 }
 0x3c7   :  { %v1583_v17 = vpop.f32.mrf.mxu0 }
 0x3c8   :  { %v560_v20 = vmax.f32 %v546_v5, 0.0  ;;  %v557_v22 = vadd.f32 %v1583_v17, %v1425_v16 }
 0x3c9   :  { %v548_v1 = vpop.f32.mrf.mxu0 }
 0x3ca   :  { %v549_v13 = vadd.f32 %v1425_v16, %v548_v1  ;;  %v563_v26 = vmax.f32 %v557_v22, 0.0 }
 0x3cc   :  { %v561_v21 = vmax.f32 %v549_v13, 0.0  ;;  %v565_v28 = vpack.c.bf16 %v563_v26, %v562_v27 }
 0x3ce   :  { %v564_v24 = vpack.c.bf16 %v561_v21, %v560_v20 }
 0x3d0   :  { %707 = vmatmul.mubr.bf16.vlgmr.msra.gmra.mxu1 %v564_v24 }
 0x3d1   :  { %716 = vmatprep.mubr.bf16.mxu1 %v1807_v8  ;;  %996 = vmatpush1.bf16.msra.mxu1 %v1661_v57  ;;  %v1450_v57 = vld [vmem:[%s2454_s9] ss:$0 sm:$0xff] }
 0x3d2   :  { %997 = vmatprep.subr.bf16.mxu1 %v1666_v37 }
 0x3d5   :  { %998 = vmatpush1.bf16.msra.mxu1 %v1664_v38 }
 0x3d6   :  { %999 = vmatprep.subr.bf16.mxu1 %v1669_v61 }
 0x3d8   :  { %717 = vmatmul.mubr.bf16.gmra.mxu1 %v565_v28 }
 0x3d9   :  { %1027 = vmatprep.mubr.bf16.mxu1 %v1807_v8  ;;  %1000 = vmatpush1.bf16.msra.mxu1 %v1667_v23 }
 0x3da   :  { %1001 = vmatprep.subr.bf16.mxu1 %v1672_v39 }
 0x3dd   :  { %1002 = vmatpush1.bf16.msra.mxu1 %v1670_v18 }
 0x3de   :  { %1003 = vmatprep.subr.bf16.mxu1 %v1675_v40 }
 0x3e1   :  { %1004 = vmatpush1.bf16.msra.mxu1 %v1673_v62 }
 0x3e2   :  { %1005 = vmatprep.subr.bf16.mxu1 %v1678_v29 }
 0x3e5   :  { %1006 = vmatpush1.bf16.msra.mxu1 %v1676_v30 }
 0x3e6   :  { %1007 = vmatprep.subr.bf16.mxu1 %v1681_v31 }
 0x3e9   :  { %1008 = vmatpush1.bf16.msra.mxu1 %v1679_v32 }
 0x3ea   :  { %1009 = vmatprep.subr.bf16.mxu1 %v1684_v33 }
 0x3ed   :  { %1010 = vmatpush1.bf16.msra.mxu1 %v1682_v34 }
 0x490   :  { %v708_v45 = vpop.f32.mrf.mxu1 }
 0x491   :  { %v709_v14 = vadd.f32 %v708_v45, %v587_v3  ;;  %v1686_v45 = vld [vmem:[%s2455_s12 + $0x30] sm:$0xff]  }
 0x492   :  { %v710_v46 = vpop.f32.mrf.mxu1 }
 0x493   :  { %v711_v47 = vadd.f32 %v710_v46, %v591_v44  ;;  %v1687_v46 = vld [vmem:[%s2455_s12 + $0x28] sm:$0xff]  }
 0x494   :  { %v712_v58 = vpop.f32.mrf.mxu1 }
 0x495   :  { %v1446_v48 = vmul.f32 -1.442695, %v711_v47  ;;  %v713_v5 = vadd.f32 %v712_v58, %v587_v3  ;;  %v1688_v47 = vld [vmem:[%s2455_s12 + $0x20] sm:$0xff]   ;;  %v1689_v58 = vld [vmem:[%s2455_s12 + $0x18] sm:$0xff]  }
 0x496   :  { %v714_v49 = vpop.f32.mrf.mxu1 }
 0x497   :  { %1757 = vpow2.f32 %v1446_v48  ;;  %v715_v50 = vadd.f32 %v714_v49, %v591_v44  ;;  %v1690_v48 = vld [vmem:[%s2455_s12 + $0x10] sm:$0xff]   ;;  %v1691_v49 = vld [vmem:[%s2455_s12 + $0x8] sm:$0xff]  }
 0x498   :  { %v718_v51 = vpop.f32.mrf.mxu1 }
 0x499   :  { %v1447_v52 = vmul.f32 -1.442695, %v715_v50  ;;  %v719_v20 = vadd.f32 %v718_v51, %v587_v3  ;;  %v1692_v50 = vld [vmem:[%s2455_s12] sm:$0xff]   ;;  %v1693_v51 = vld [vmem:[%s2456_s14 + $0x70] ss:$8 sps:$4 sm:$0xff]  }
 0x49a   :  { %v720_v53 = vpop.f32.mrf.mxu1 }
 0x49b   :  { %1759 = vpow2.f32 %v1447_v52  ;;  %v721_v54 = vadd.f32 %v720_v53, %v591_v44  ;;  %v1695_v52 = vld [vmem:[%s2456_s14 + $0x74] ss:$8 sps:$4 sm:$0xff]   ;;  %v1698_v53 = vld [vmem:[%s2456_s14 + $0x64] ss:$8 sps:$4 sm:$0xff]  }
 0x49c   :  { %v722_v55 = vpop.f32.mrf.mxu1  ;;  %1316 = vmatprep.subr.bf16.mxu1 %v1695_v52 }
 0x49d   :  { %v1448_v56 = vmul.f32 -1.442695, %v721_v54  ;;  %v723_v25 = vadd.f32 %v722_v55, %v587_v3  ;;  %v1696_v54 = vld [vmem:[%s2456_s14 + $0x60] ss:$8 sps:$4 sm:$0xff]   ;;  %v1701_v55 = vld [vmem:[%s2456_s14 + $0x54] ss:$8 sps:$4 sm:$0xff]  }
 0x49e   :  { %v724_v60 = vpop.f32.mrf.mxu1 }
 0x49f   :  { %1761 = vpow2.f32 %v1448_v56  ;;  %v725_v6 = vadd.f32 %v724_v60, %v591_v44  ;;  %v1685_v44 = vld [vmem:[%s2455_s12 + $0x38] sm:$0xff]   ;;  %v1704_v60 = vld [vmem:[%s2456_s14 + $0x44] ss:$8 sps:$4 sm:$0xff]  }
 0x4a0   :  { %1604 = vmatprep.subr.bf16.mxu0 %v1685_v44  ;;  %v1699_v56 = vld [vmem:[%s2456_s14 + $0x50] ss:$8 sps:$4 sm:$0xff]  }
 0x4a1   :  { %v1449_v9 = vmul.f32 -1.442695, %v725_v6  ;;  %v1702_v6 = vld [vmem:[%s2456_s14 + $0x40] ss:$8 sps:$4 sm:$0xff]  }
 0x4a3   :  { %1763 = vpow2.f32 %v1449_v9  ;;  %v1707_v9 = vld [vmem:[%s2456_s14 + $0x34] ss:$8 sps:$4 sm:$0xff]  }
 0x4a4   :  { %v1758_v10 = vpop.eup %1757 }
 0x4a5   :  { %v739_v11 = vadd.f32 1.0, %v1758_v10  ;;  %v1705_v10 = vld [vmem:[%s2456_s14 + $0x30] ss:$8 sps:$4 sm:$0xff]  }
 0x4a7   :  { %1765 = vrcp.f32 %v739_v11  ;;  %v903_v11 = vld [vmem:[%s2457_s11] sm:$0x3] }
 0x4a8   :  { %v1760_v0 = vpop.eup %1759  ;;  %v908_v31 = vrot.slane %v903_v11, %v2294_v63 }
 0x4a9   :  { %v740_v2 = vadd.f32 1.0, %v1760_v0  ;;  %v912_v0 = vrot.slane %v903_v11, %v2288_v42 }
 0x4ab   :  { %1767 = vrcp.f32 %v740_v2 }
 0x4ac   :  { %v1762_v4 = vpop.eup %1761 }
 0x4ad   :  { %v741_v59 = vadd.f32 1.0, %v1762_v4 }
 0x4af   :  { %1769 = vrcp.f32 %v741_v59 }
 0x4b0   :  { %v1764_v7 = vpop.eup %1763 }
 0x4b1   :  { %v742_v12 = vadd.f32 1.0, %v1764_v7 }
 0x4b3   :  { %1771 = vrcp.f32 %v742_v12 }
 0x4b4   :  { %v1766_v16 = vpop.eup %1765 }
 0x4b5   :  { %v751_v17 = vmul.f32 %v1766_v16, %v709_v14 }
 0x4b7   :  { %755 = vst [vmem:[%s2453_s16] sm:$0xff] %v751_v17 }
 0x4b8   :  { %v1768_v1 = vpop.eup %1767 }
 0x4b9   :  { %v752_v13 = vmul.f32 %v1768_v1, %v713_v5 }
 0x4bb   :  { %756 = vst [vmem:[%s2453_s16 + $0x8] sm:$0xff] %v752_v13  ;;  %v759_v21 = vpack.c.bf16 %v752_v13, %v751_v17 }
 0x4bc   :  { %v1770_v22 = vpop.eup %1769 }
 0x4bd   :  { %1600 = vmatprep.mubr.bf16.mxu0 %v759_v21  ;;  %v753_v24 = vmul.f32 %v1770_v22, %v719_v20 }
 0x4bf   :  { %757 = vst [vmem:[%s2453_s16 + $0x10] sm:$0xff] %v753_v24 }
 0x4c0   :  { %v1772_v26 = vpop.eup %1771 }
 0x4c1   :  { %v754_v27 = vmul.f32 %v1772_v26, %v723_v25 }
 0x4c3   :  { %758 = vst [vmem:[%s2453_s16 + $0x18] sm:$0xff] %v754_v27  ;;  %v760_v28 = vpack.c.bf16 %v754_v27, %v753_v24 }
 0x4c5   :  { %1601 = vmatmul.mubr.bf16.vlgmr.msra.gmra.mxu0 %v760_v28 }
 0x4c6   :  { %1605 = vmatpush3.bf16.msra.mxu0 %v1685_v44  ;;  %v1713_v44 = vld [vmem:[%s2456_s14 + $0x14] ss:$8 sps:$4 sm:$0xff]  }
 0x4c7   :  { %1606 = vmatprep.subr.bf16.mxu0 %v1686_v45 }
 0x4ca   :  { %1607 = vmatpush3.bf16.msra.mxu0 %v1686_v45  ;;  %v1711_v45 = vld [vmem:[%s2456_s14 + $0x10] ss:$8 sps:$4 sm:$0xff]  }
 0x4cb   :  { %1608 = vmatprep.subr.bf16.mxu0 %v1687_v46 }
 0x4ce   :  { %1609 = vmatpush3.bf16.msra.mxu0 %v1687_v46  ;;  %v1716_v46 = vld [vmem:[%s2456_s14 + $0x4] ss:$8 sps:$4 sm:$0xff]  }
 0x4cf   :  { %1610 = vmatprep.subr.bf16.mxu0 %v1688_v47 }
 0x4d2   :  { %1611 = vmatpush3.bf16.msra.mxu0 %v1688_v47  ;;  %v1714_v47 = vld [vmem:[%s2456_s14] ss:$8 sps:$4 sm:$0xff]  }
 0x4d3   :  { %1612 = vmatprep.subr.bf16.mxu0 %v1689_v58 }
 0x4d6   :  { %1613 = vmatpush3.bf16.msra.mxu0 %v1689_v58 }
 0x4d7   :  { %1614 = vmatprep.subr.bf16.mxu0 %v1690_v48 }
 0x4da   :  { %1615 = vmatpush3.bf16.msra.mxu0 %v1690_v48 }
 0x4db   :  { %1616 = vmatprep.subr.bf16.mxu0 %v1691_v49 }
 0x4de   :  { %1617 = vmatpush3.bf16.msra.mxu0 %v1691_v49  ;;  %v1479_v49 = vld [vmem:[%s2459_s13] ss:$0 sm:$0xff] }
 0x4df   :  { %1618 = vmatprep.subr.bf16.mxu0 %v1692_v50 }
 0x4e2   :  { %1619 = vmatpush3.bf16.msra.mxu0 %v1692_v50 }
 0x585   :  { %v1602_v35 = vpop.f32.mrf.mxu0 }
 0x586   :  { %v875_v62 = vadd.f32 %v1602_v35, %v1450_v57 }
 0x587   :  { %v866_v36 = vpop.f32.mrf.mxu0 }
 0x588   :  { %v867_v37 = vadd.f32 %v1450_v57, %v866_v36  ;;  %v883_v41 = vmax.f32 %v875_v62, 0.0 }
 0x589   :  { %v1603_v19 = vpop.f32.mrf.mxu0 }
 0x58a   :  { %v881_v23 = vmax.f32 %v867_v37, 0.0  ;;  %v878_v18 = vadd.f32 %v1603_v19, %v1450_v57 }
 0x58b   :  { %v869_v38 = vpop.f32.mrf.mxu0 }
 0x58c   :  { %v870_v61 = vadd.f32 %v1450_v57, %v869_v38  ;;  %v884_v15 = vmax.f32 %v878_v18, 0.0 }
 0x58e   :  { %v882_v39 = vmax.f32 %v870_v61, 0.0  ;;  %v886_v43 = vpack.c.bf16 %v884_v15, %v883_v41  ;;  %v1710_v41 = vld [vmem:[%s2456_s14 + $0x24] ss:$8 sps:$4 sm:$0xff]  }
 0x590   :  { %v885_v40 = vpack.c.bf16 %v882_v39, %v881_v23 }
 0x592   :  { %1028 = vmatmul.mubr.bf16.vlgmr.msra.gmra.mxu1 %v885_v40 }
 0x593   :  { %1037 = vmatprep.mubr.bf16.mxu1 %v1807_v8  ;;  %1317 = vmatpush1.bf16.msra.mxu1 %v1693_v51 }
 0x594   :  { %1318 = vmatprep.subr.bf16.mxu1 %v1698_v53 }
 0x597   :  { %1319 = vmatpush1.bf16.msra.mxu1 %v1696_v54 }
 0x598   :  { %1320 = vmatprep.subr.bf16.mxu1 %v1701_v55 }
 0x59a   :  { %1038 = vmatmul.mubr.bf16.gmra.mxu1 %v886_v43  ;;  %v1708_v43 = vld [vmem:[%s2456_s14 + $0x20] ss:$8 sps:$4 sm:$0xff]  }
 0x59b   :  { %1348 = vmatprep.mubr.bf16.mxu1 %v1807_v8  ;;  %1321 = vmatpush1.bf16.msra.mxu1 %v1699_v56 }
 0x59c   :  { %1322 = vmatprep.subr.bf16.mxu1 %v1704_v60 }
 0x59f   :  { %1323 = vmatpush1.bf16.msra.mxu1 %v1702_v6 }
 0x5a0   :  { %1324 = vmatprep.subr.bf16.mxu1 %v1707_v9 }
 0x5a3   :  { %1325 = vmatpush1.bf16.msra.mxu1 %v1705_v10 }
 0x5a4   :  { %1326 = vmatprep.subr.bf16.mxu1 %v1710_v41 }
 0x5a7   :  { %1327 = vmatpush1.bf16.msra.mxu1 %v1708_v43 }
 0x5a8   :  { %1328 = vmatprep.subr.bf16.mxu1 %v1713_v44 }
 0x5ab   :  { %1329 = vmatpush1.bf16.msra.mxu1 %v1711_v45 }
 0x5ac   :  { %1330 = vmatprep.subr.bf16.mxu1 %v1716_v46 }
 0x5af   :  { %1331 = vmatpush1.bf16.msra.mxu1 %v1714_v47 }
 0x652   :  { %v1029_v2 = vpop.f32.mrf.mxu1 }
 0x653   :  { %v1030_v34 = vadd.f32 %v1029_v2, %v908_v31 }
 0x654   :  { %v1031_v4 = vpop.f32.mrf.mxu1 }
 0x655   :  { %v1032_v59 = vadd.f32 %v1031_v4, %v912_v0 }
 0x656   :  { %v1033_v3 = vpop.f32.mrf.mxu1 }
 0x657   :  { %v1475_v7 = vmul.f32 -1.442695, %v1032_v59  ;;  %v1034_v57 = vadd.f32 %v1033_v3, %v908_v31 }
 0x658   :  { %v1035_v12 = vpop.f32.mrf.mxu1 }
 0x659   :  { %1773 = vpow2.f32 %v1475_v7  ;;  %v1036_v14 = vadd.f32 %v1035_v12, %v912_v0 }
 0x65a   :  { %v1039_v16 = vpop.f32.mrf.mxu1 }
 0x65b   :  { %v1476_v17 = vmul.f32 -1.442695, %v1036_v14  ;;  %v1040_v38 = vadd.f32 %v1039_v16, %v908_v31 }
 0x65c   :  { %v1041_v5 = vpop.f32.mrf.mxu1 }
 0x65d   :  { %1775 = vpow2.f32 %v1476_v17  ;;  %v1042_v1 = vadd.f32 %v1041_v5, %v912_v0 }
 0x65e   :  { %v1043_v13 = vpop.f32.mrf.mxu1 }
 0x65f   :  { %v1477_v20 = vmul.f32 -1.442695, %v1042_v1  ;;  %v1044_v18 = vadd.f32 %v1043_v13, %v908_v31 }
 0x660   :  { %v1045_v21 = vpop.f32.mrf.mxu1 }
 0x661   :  { %1777 = vpow2.f32 %v1477_v20  ;;  %v1046_v22 = vadd.f32 %v1045_v21, %v912_v0  ;;  %v1224_v0 = vld [vmem:[%s2460_s15] sm:$0x3] }
 0x662   :  { %v1233_v2 = vrot.slane %v1224_v0, %v2288_v42 }
 0x663   :  { %v1478_v24 = vmul.f32 -1.442695, %v1046_v22 }
 0x665   :  { %1779 = vpow2.f32 %v1478_v24 }
 0x666   :  { %v1774_v25 = vpop.eup %1773 }
 0x667   :  { %v1060_v26 = vadd.f32 1.0, %v1774_v25 }
 0x669   :  { %1781 = vrcp.f32 %v1060_v26 }
 0x66a   :  { %v1776_v27 = vpop.eup %1775 }
 0x66b   :  { %v1061_v28 = vadd.f32 1.0, %v1776_v27 }
 0x66d   :  { %1783 = vrcp.f32 %v1061_v28 }
 0x66e   :  { %v1778_v29 = vpop.eup %1777 }
 0x66f   :  { %v1062_v30 = vadd.f32 1.0, %v1778_v29 }
 0x671   :  { %1785 = vrcp.f32 %v1062_v30  ;;  %v1229_v30 = vrot.slane %v1224_v0, %v2294_v63 }
 0x672   :  { %v1780_v32 = vpop.eup %1779 }
 0x673   :  { %v1063_v33 = vadd.f32 1.0, %v1780_v32 }
 0x675   :  { %1787 = vrcp.f32 %v1063_v33 }
 0x676   :  { %v1782_v35 = vpop.eup %1781 }
 0x677   :  { %v1072_v36 = vmul.f32 %v1782_v35, %v1030_v34 }
 0x679   :  { %1076 = vst [vmem:[%s2458_s17] sm:$0xff] %v1072_v36 }
 0x67a   :  { %v1784_v19 = vpop.eup %1783 }
 0x67b   :  { %v1073_v37 = vmul.f32 %v1784_v19, %v1034_v57 }
 0x67d   :  { %1077 = vst [vmem:[%s2458_s17 + $0x8] sm:$0xff] %v1073_v37  ;;  %v1080_v61 = vpack.c.bf16 %v1073_v37, %v1072_v36 }
 0x67e   :  { %v1786_v23 = vpop.eup %1785 }
 0x67f   :  { %1620 = vmatprep.mubr.bf16.mxu0 %v1080_v61  ;;  %v1074_v39 = vmul.f32 %v1786_v23, %v1040_v38 }
 0x681   :  { %1078 = vst [vmem:[%s2458_s17 + $0x10] sm:$0xff] %v1074_v39 }
 0x682   :  { %v1788_v40 = vpop.eup %1787 }
 0x683   :  { %v1075_v62 = vmul.f32 %v1788_v40, %v1044_v18 }
 0x685   :  { %1079 = vst [vmem:[%s2458_s17 + $0x18] sm:$0xff] %v1075_v62  ;;  %v1081_v15 = vpack.c.bf16 %v1075_v62, %v1074_v39 }
 0x687   :  { %1621 = vmatmul.mubr.bf16.vlgmr.msra.gmra.mxu0 %v1081_v15 }
 0x747   :  { %v1622_v58 = vpop.f32.mrf.mxu0 }
 0x748   :  { %v1196_v6 = vadd.f32 %v1622_v58, %v1479_v49 }
 0x749   :  { %v1187_v48 = vpop.f32.mrf.mxu0 }
 0x74a   :  { %v1188_v51 = vadd.f32 %v1479_v49, %v1187_v48  ;;  %v1204_v10 = vmax.f32 %v1196_v6, 0.0 }
 0x74b   :  { %v1623_v50 = vpop.f32.mrf.mxu0 }
 0x74c   :  { %v1202_v54 = vmax.f32 %v1188_v51, 0.0  ;;  %v1199_v56 = vadd.f32 %v1623_v50, %v1479_v49 }
 0x74d   :  { %v1190_v52 = vpop.f32.mrf.mxu0 }
 0x74e   :  { %v1191_v53 = vadd.f32 %v1479_v49, %v1190_v52  ;;  %v1205_v9 = vmax.f32 %v1199_v56, 0.0 }
 0x750   :  { %v1203_v55 = vmax.f32 %v1191_v53, 0.0  ;;  %v1207_v11 = vpack.c.bf16 %v1205_v9, %v1204_v10 }
 0x752   :  { %v1206_v60 = vpack.c.bf16 %v1203_v55, %v1202_v54 }
 0x754   :  { %1349 = vmatmul.mubr.bf16.vlgmr.msra.gmra.mxu1 %v1206_v60 }
 0x755   :  { %1358 = vmatprep.mubr.bf16.mxu1 %v1807_v8 }
 0x75c   :  { %1359 = vmatmul.mubr.bf16.gmra.mxu1 %v1207_v11 }
 0x814   :  { %v1350_v4 = vpop.f32.mrf.mxu1 }
 0x815   :  { %v1351_v33 = vadd.f32 %v1350_v4, %v1229_v30 }
 0x816   :  { %v1352_v59 = vpop.f32.mrf.mxu1 }
 0x817   :  { %v1353_v3 = vadd.f32 %v1352_v59, %v1233_v2 }
 0x818   :  { %v1354_v7 = vpop.f32.mrf.mxu1 }
 0x819   :  { %v1504_v12 = vmul.f32 -1.442695, %v1353_v3  ;;  %v1355_v36 = vadd.f32 %v1354_v7, %v1229_v30 }
 0x81a   :  { %v1356_v14 = vpop.f32.mrf.mxu1 }
 0x81b   :  { %1789 = vpow2.f32 %v1504_v12  ;;  %v1357_v16 = vadd.f32 %v1356_v14, %v1233_v2 }
 0x81c   :  { %v1360_v17 = vpop.f32.mrf.mxu1 }
 0x81d   :  { %v1505_v8 = vmul.f32 -1.442695, %v1357_v16  ;;  %v1361_v37 = vadd.f32 %v1360_v17, %v1229_v30 }
 0x81e   :  { %v1362_v5 = vpop.f32.mrf.mxu1 }
 0x81f   :  { %1791 = vpow2.f32 %v1505_v8  ;;  %v1363_v1 = vadd.f32 %v1362_v5, %v1233_v2 }
 0x820   :  { %v1364_v13 = vpop.f32.mrf.mxu1 }
 0x821   :  { %v1506_v20 = vmul.f32 -1.442695, %v1363_v1  ;;  %v1365_v61 = vadd.f32 %v1364_v13, %v1229_v30 }
 0x822   :  { %v1366_v21 = vpop.f32.mrf.mxu1 }
 0x823   :  { %1793 = vpow2.f32 %v1506_v20  ;;  %v1367_v22 = vadd.f32 %v1366_v21, %v1233_v2 }
 0x825   :  { %v1507_v24 = vmul.f32 -1.442695, %v1367_v22 }
 0x827   :  { %1795 = vpow2.f32 %v1507_v24 }
 0x828   :  { %v1790_v42 = vpop.eup %1789 }
 0x829   :  { %v1381_v25 = vadd.f32 1.0, %v1790_v42 }
 0x82b   :  { %1797 = vrcp.f32 %v1381_v25 }
 0x82c   :  { %v1792_v26 = vpop.eup %1791 }
 0x82d   :  { %v1382_v27 = vadd.f32 1.0, %v1792_v26 }
 0x82f   :  { %1799 = vrcp.f32 %v1382_v27 }
 0x830   :  { %v1794_v28 = vpop.eup %1793 }
 0x831   :  { %v1383_v29 = vadd.f32 1.0, %v1794_v28 }
 0x833   :  { %1801 = vrcp.f32 %v1383_v29 }
 0x834   :  { %v1796_v31 = vpop.eup %1795 }
 0x835   :  { %v1384_v32 = vadd.f32 1.0, %v1796_v31 }
 0x837   :  { %1803 = vrcp.f32 %v1384_v32 }
 0x838   :  { %v1798_v34 = vpop.eup %1797 }
 0x839   :  { %v1393_v35 = vmul.f32 %v1798_v34, %v1351_v33 }
 0x83b   :  { %1397 = vst [vmem:[%s2461_s18] sm:$0xff] %v1393_v35 }
 0x83c   :  { %v1800_v57 = vpop.eup %1799 }
 0x83d   :  { %v1394_v19 = vmul.f32 %v1800_v57, %v1355_v36 }
 0x83f   :  { %1398 = vst [vmem:[%s2461_s18 + $0x8] sm:$0xff] %v1394_v19 }
 0x840   :  { %v1802_v63 = vpop.eup %1801 }
 0x841   :  { %v1395_v38 = vmul.f32 %v1802_v63, %v1361_v37 }
 0x843   :  { %1399 = vst [vmem:[%s2461_s18 + $0x10] sm:$0xff] %v1395_v38 }
 0x844   :  { %v1804_v23 = vpop.eup %1803 }
 0x845   :  { %v1396_v39 = vmul.f32 %v1804_v23, %v1365_v61 }
 0x847   :  { %1400 = vst [vmem:[%s2461_s18 + $0x18] sm:$0xff] %v1396_v39 }

// kernel: _lambda_.6
= control target key start
LH: loop header
LB: loop body
LE: loop exit
PB: predicated region body
PF: predicated region fallthrough
CT: control target
= control target key end

     0   :  { %vm74_vm0 = vcmask 261120   ;;  %v1737_v63 = vmov 0.0   ;;  %s1927_s1 = inlined_call_operand.vmem [shape: bf16[32,128], index: 1, kind: input, shape index: {}]   ;;  %s1928_s4 = inlined_call_operand.vmem [shape: bf16[32,128], index: 4, kind: input, shape index: {}]   ;;  %s1929_s5 = inlined_call_operand.vmem [shape: bf16[32,128], index: 5, kind: input, shape index: {}]   ;;  %s1930_s6 = inlined_call_operand.vmem [shape: f32[1,128], index: 6, kind: input, shape index: {}]   ;;  %s1931_s7 = inlined_call_operand.vmem [shape: f32[128,32], index: 7, kind: output, shape index: {}]   ;;  %s1932_s0 = inlined_call_operand.vmem [shape: f32[128,32], index: 0, kind: input, shape index: {}]   ;;  %s1933_s2 = inlined_call_operand.vmem [shape: bf16[32,128], index: 2, kind: input, shape index: {}]   ;;  %s1934_s3 = inlined_call_operand.vmem [shape: f32[1,128], index: 3, kind: input, shape index: {}]  }
   0x1   :  { %v1488_v0 = vld [vmem:[%s1927_s1 + $0x8] sm:$0xff]   ;;  %v1489_v1 = vld [vmem:[%s1927_s1] sm:$0xff]   ;;  %v29_v7 = vld [vmem:[%s1932_s0 + $0x10] sm:$0xff] }
   0x2   :  { %1320 = vmatprep.subr.bf16.mxu0 %v1488_v0  ;;  %1424 = vmatprep.subr.bf16.mxu1 %v1488_v0  ;;  %v27_v2 = vld [vmem:[%s1932_s0] sm:$0xff]  ;;  %v28_v3 = vld [vmem:[%s1932_s0 + $0x8] sm:$0xff]  ;;  %v30_v8 = vld [vmem:[%s1932_s0 + $0x18] sm:$0xff] }
   0x3   :  { %v35_v4 = vld [vmem:[%s1932_s0 + $0x40] sm:$0xff]  ;;  %1321 = vmatpush3.bf16.msra.mxu0 %v1488_v0  ;;  %1426 = vmatpush3.bf16.msra.mxu1 %v1488_v0  ;;  %v43_v5 = vpack.c.bf16 %v28_v3, %v27_v2  ;;  %v36_v6 = vld [vmem:[%s1932_s0 + $0x48] sm:$0xff]  ;;  %v37_v10 = vld [vmem:[%s1932_s0 + $0x50] sm:$0xff]  ;;  %v44_v16 = vpack.c.bf16 %v30_v8, %v29_v7  ;;  %v1739_v0 = vmov 0.0  }
   0x4   :  { %1322 = vmatprep.subr.bf16.mxu0 %v1489_v1  ;;  %1425 = vmatprep.subr.bf16.mxu1 %v1489_v1  ;;  %v47_v9 = vpack.c.bf16 %v36_v6, %v35_v4  ;;  %v38_v11 = vld [vmem:[%s1932_s0 + $0x58] sm:$0xff]  ;;  %v31_v12 = vld [vmem:[%s1932_s0 + $0x20] sm:$0xff]  ;;  %v32_v13 = vld [vmem:[%s1932_s0 + $0x28] sm:$0xff] }
   0x5   :  { %1324 = vmatprep.mubr.msk.bf16.mxu0 %vm74_vm0, %v43_v5  ;;  %v39_v14 = vld [vmem:[%s1932_s0 + $0x60] sm:$0xff]  ;;  %v40_v15 = vld [vmem:[%s1932_s0 + $0x68] sm:$0xff]  ;;  %v48_v17 = vpack.c.bf16 %v38_v11, %v37_v10  ;;  %v45_v18 = vpack.c.bf16 %v32_v13, %v31_v12  ;;  %v33_v20 = vld [vmem:[%s1932_s0 + $0x30] sm:$0xff] }
   0x6   :  { %1332 = vmatprep.mubr.msk.bf16.mxu1 %vm74_vm0, %v47_v9  ;;  %v49_v19 = vpack.c.bf16 %v40_v15, %v39_v14  ;;  %v34_v21 = vld [vmem:[%s1932_s0 + $0x38] sm:$0xff]  ;;  %v41_v22 = vld [vmem:[%s1932_s0 + $0x70] sm:$0xff]  ;;  %v1717_v26 = vld [vmem:[%s1933_s2] sm:$0xf] }
   0x7   :  { %1323 = vmatpush3.bf16.msra.mxu0 %v1489_v1  ;;  %1427 = vmatpush3.bf16.msra.mxu1 %v1489_v1  ;;  %v42_v23 = vld [vmem:[%s1932_s0 + $0x78] sm:$0xff]  ;;  %v46_v24 = vpack.c.bf16 %v34_v21, %v33_v20  ;;  %v1722_v27 = vld [vmem:[%s1933_s2 + $0x4] sm:$0xf]  ;;  %v1727_v28 = vld [vmem:[%s1933_s2 + $0x8] sm:$0xf] }
   0x8   :  { %v50_v25 = vpack.c.bf16 %v42_v23, %v41_v22  ;;  %v1732_v29 = vld [vmem:[%s1933_s2 + $0xc] sm:$0xf]  ;;  %v1184_v30 = vld [vmem:[%s1934_s3] ss:$0 sm:$0xff]  ;;  %s1741_s2 = smov 0  }
   0xa   :  { %1325 = vmatmul.mubr.msk.bf16.vlgmr.msra.gmra.mxu0 %vm74_vm0, %v44_v16  ;;  %1333 = vmatmul.mubr.msk.bf16.vlgmr.msra.gmra.mxu1 %vm74_vm0, %v48_v17 }
   0xb   :  { %1328 = vmatprep.mubr.msk.bf16.mxu0 %vm74_vm0, %v45_v18  ;;  %1336 = vmatprep.mubr.msk.bf16.mxu1 %vm74_vm0, %v49_v19 }
  0x12   :  { %1329 = vmatmul.mubr.msk.bf16.gmra.mxu0 %vm74_vm0, %v46_v24  ;;  %1337 = vmatmul.mubr.msk.bf16.gmra.mxu1 %vm74_vm0, %v50_v25 }
  0xca   :  { %v1326_v31 = vpop.f32.mrf.mxu0  ;;  %v1334_v32 = vpop.f32.mrf.mxu1 }
  0xcb   :  { %v142_v33 = vadd.f32 %v1326_v31, %v1184_v30  ;;  %v174_v34 = vadd.f32 %v1334_v32, %v1184_v30 }
  0xcc   :  { %v133_v35 = vpop.f32.mrf.mxu0  ;;  %v165_v36 = vpop.f32.mrf.mxu1 }
  0xcd   :  { %198 = vst [vmem:[#allocation2 + $0x10] sm:$0xff] %v142_v33  ;;  %206 = vst [vmem:[#allocation2 + $0x50] sm:$0xff] %v174_v34  ;;  %v134_v37 = vadd.f32 %v1184_v30, %v133_v35  ;;  %v166_v38 = vadd.f32 %v1184_v30, %v165_v36 }
  0xce   :  { %v1327_v39 = vpop.f32.mrf.mxu0  ;;  %v1335_v40 = vpop.f32.mrf.mxu1 }
  0xcf   :  { %196 = vst [vmem:[#allocation2] sm:$0xff] %v134_v37  ;;  %204 = vst [vmem:[#allocation2 + $0x40] sm:$0xff] %v166_v38  ;;  %v145_v41 = vadd.f32 %v1327_v39, %v1184_v30  ;;  %v177_v42 = vadd.f32 %v1335_v40, %v1184_v30 }
  0xd0   :  { %v136_v43 = vpop.f32.mrf.mxu0  ;;  %v168_v44 = vpop.f32.mrf.mxu1 }
  0xd1   :  { %199 = vst [vmem:[#allocation2 + $0x18] sm:$0xff] %v145_v41  ;;  %207 = vst [vmem:[#allocation2 + $0x58] sm:$0xff] %v177_v42  ;;  %v137_v45 = vadd.f32 %v1184_v30, %v136_v43  ;;  %v169_v46 = vadd.f32 %v1184_v30, %v168_v44 }
  0xd2   :  { %v1330_v47 = vpop.f32.mrf.mxu0  ;;  %v1338_v48 = vpop.f32.mrf.mxu1 }
  0xd3   :  { %197 = vst [vmem:[#allocation2 + $0x8] sm:$0xff] %v137_v45  ;;  %205 = vst [vmem:[#allocation2 + $0x48] sm:$0xff] %v169_v46  ;;  %v158_v49 = vadd.f32 %v1330_v47, %v1184_v30  ;;  %v190_v50 = vadd.f32 %v1338_v48, %v1184_v30 }
  0xd4   :  { %v149_v51 = vpop.f32.mrf.mxu0  ;;  %v181_v52 = vpop.f32.mrf.mxu1 }
  0xd5   :  { %202 = vst [vmem:[#allocation2 + $0x30] sm:$0xff] %v158_v49  ;;  %210 = vst [vmem:[#allocation2 + $0x70] sm:$0xff] %v190_v50  ;;  %v150_v53 = vadd.f32 %v1184_v30, %v149_v51  ;;  %v182_v54 = vadd.f32 %v1184_v30, %v181_v52 }
  0xd6   :  { %v1331_v55 = vpop.f32.mrf.mxu0  ;;  %v1339_v56 = vpop.f32.mrf.mxu1 }
  0xd7   :  { %200 = vst [vmem:[#allocation2 + $0x20] sm:$0xff] %v150_v53  ;;  %208 = vst [vmem:[#allocation2 + $0x60] sm:$0xff] %v182_v54  ;;  %v161_v57 = vadd.f32 %v1331_v55, %v1184_v30  ;;  %v193_v58 = vadd.f32 %v1339_v56, %v1184_v30 }
  0xd8   :  { %v152_v59 = vpop.f32.mrf.mxu0  ;;  %v184_v60 = vpop.f32.mrf.mxu1 }
  0xd9   :  { %203 = vst [vmem:[#allocation2 + $0x38] sm:$0xff] %v161_v57  ;;  %211 = vst [vmem:[#allocation2 + $0x78] sm:$0xff] %v193_v58  ;;  %v153_v61 = vadd.f32 %v1184_v30, %v152_v59  ;;  %v185_v62 = vadd.f32 %v1184_v30, %v184_v60 }
  0xdb   :  { %201 = vst [vmem:[#allocation2 + $0x28] sm:$0xff] %v153_v61  ;;  %209 = vst [vmem:[#allocation2 + $0x68] sm:$0xff] %v185_v62 }
  0xdc LB: > { %v1197_v1 = vcombine.low %v1727_v28, %v1732_v29  ;;  %v1604_v2 = vmov 0.0   ;;  %v227_v3 = vpack.c.bf16 %v1586_v0, %v1586_v0  ;;  %v1196_v4 = vcombine.low %v1717_v26, %v1722_v27  ;;  %s1606_s3 = smov 32   ;;  %s1195_s21 = sshll.u32 %s1590_s2, 3  ;;  %s1590_s2 = sphi %s1741_s2, %s221_s2   ;;  %v1586_v0 = vphi %v1739_v0, %v558_v0   ;;  %v1582_v63 = vphi %v1737_v63, %v552_v63  }
  0xdd   : > { %1340 = vmatprep.subr.bf16.mxu0 %v1604_v2  ;;  %1348 = vmatprep.subr.bf16.mxu1 %v1604_v2  ;;  %vm1605_vm1 = vmmov 0   ;;  %s1760_s22 = scalar_lea.vmem [#allocation2], %s1195_s21  ;;  %s1607_s23 = smov 64   ;;  %vm316_vm2 = vcmask 254976  }
  0xde   : > { %1341 = vmatpush3.bf16.msra.mxu0 %v1197_v1  ;;  %1344 = vmatprep.mubr.msk.bf16.mxu0 %vm1605_vm1, %v1604_v2  ;;  %s315_s24 = scalar_lea.vmem [#allocation3], %s1195_s21  ;;  %s221_s2 = sadd.s32 1, %s1590_s2  }
  0xdf   : > { %1342 = vmatprep.subr.bf16.mxu0 %v1604_v2  ;;  %1349 = vmatpush3.bf16.msra.mxu1 %v1197_v1  ;;  %p218_p0 = scmp.ge.s32.totalorder %s221_s2, 16  }
  0xe0   : > { %229 = vrot.lane.b32.xlu0 %v227_v3, %s1606_s3  ;;  %1350 = vmatprep.subr.bf16.mxu1 %v1604_v2 }
  0xe1   : > { %1352 = vmatprep.mubr.msk.bf16.mxu1 %vm1605_vm1, %v1604_v2 }
  0xe2   : > { %1343 = vmatpush3.bf16.msra.mxu0 %v1196_v4  ;;  %v226_v6 = vld [vmem:[%s1760_s22] sm:$0x3]  ;;  %v1202_v31 = vld [vmem:[%s1760_s22 + $0x2] sm:$0x3]  ;;  %v1210_v52 = vld [vmem:[%s1760_s22 + $0x4] sm:$0x3] }
  0xe3   : > { %1351 = vmatpush3.bf16.msra.mxu1 %v1196_v4  ;;  %1356 = vmatprep.subr.bf16.mxu0 %v1604_v2 }
  0xe4   : > { %1364 = vmatprep.subr.bf16.mxu1 %v1604_v2 }
 0x152   : > { %v230_v5 = vpop.permute.xlu0 %229 }
 0x153   : > { %1345 = vmatmul.mubr.msk.bf16.vlgmr.msra.gmra.mxu0 %vm74_vm0, %v230_v5 }
 0x154   : > { %1357 = vmatpush3.bf16.msra.mxu0 %v1197_v1  ;;  %1360 = vmatprep.mubr.msk.bf16.mxu0 %vm1605_vm1, %v1604_v2 }
 0x155   : > { %1358 = vmatprep.subr.bf16.mxu0 %v1604_v2 }
 0x158   : > { %1359 = vmatpush3.bf16.msra.mxu0 %v1196_v4 }
 0x213   : > { %v280_v7 = vpop.f32.mrf.mxu0 }
 0x214   : > { %v286_v8 = vadd.f32 %v280_v7, %v226_v6 }
 0x215   : > { %v1346_v9 = vpop.f32.mrf.mxu0 }
 0x216   : > { %1490 = vtanh.f32 %v286_v8  ;;  %v1199_v13 = vmul.f32 -1.442695, %v286_v8  ;;  %v1218_v9 = vld [vmem:[%s1760_s22 + $0x6] sm:$0x3] }
 0x217   : > { %v283_v10 = vpop.f32.mrf.mxu0 }
 0x218   : > { %1492 = vpow2.f32 %v1199_v13 }
 0x219   : > { %v1347_v11 = vpop.f32.mrf.mxu0 }
 0x223   : > { %v1491_v12 = vpop.eup %1490 }
 0x224   : > { %296 = vrot.lane.b32.xlu0 %v1491_v12, %s1607_s23 }
 0x225   : > { %v1493_v14 = vpop.eup %1492 }
 0x226   : > { %v290_v15 = vadd.f32 1.0, %v1493_v14 }
 0x228   : > { %1494 = vrcp.f32 %v290_v15 }
 0x235   : > { %v1495_v16 = vpop.eup %1494 }
 0x236   : > { %v294_v19 = vmul.f32 %v1582_v63, %v1495_v16 }
 0x296   : > { %v297_v17 = vpop.permute.xlu0 %296 }
 0x297   : > { %v299_v18 = vmul.f32 %v1495_v16, %v297_v17 }
 0x299   : > { %301 = vrot.lane.b32.xlu1 %v299_v18, %s1606_s3 }
 0x30b   : > { %v302_v20 = vpop.permute.xlu1 %301 }
 0x30c   : > { %v304_v21 = vadd.f32 %v302_v20, %v294_v19 }
 0x30e   : > { %1496 = vtanh.f32 %v304_v21 }
 0x31b   : > { %v1497_v22 = vpop.eup %1496 }
 0x31c   : > { %307 = vrot.lane.b32.xlu1 %v1497_v22, %s1607_s23 }
 0x38e   : > { %v308_v23 = vpop.permute.xlu1 %307 }
 0x38f   : > { %v1766_v24 = vmul.f32 %v1495_v16, %v308_v23 }
 0x391   : > { %v323_v25 = vpack.c.bf16 %v1766_v24, %v1766_v24 }
 0x393   : > { %325 = vrot.lane.b32.xlu0 %v323_v25, %s1606_s3 }
 0x405   : > { %v326_v30 = vpop.permute.xlu0 %325 }
 0x406   : > { %1353 = vmatmul.mubr.msk.bf16.vlgmr.msra.gmra.mxu1 %vm74_vm0, %v326_v30 }
 0x407   : > { %1365 = vmatpush3.bf16.msra.mxu1 %v1197_v1  ;;  %1368 = vmatprep.mubr.msk.bf16.mxu1 %vm1605_vm1, %v1604_v2 }
 0x408   : > { %1366 = vmatprep.subr.bf16.mxu1 %v1604_v2 }
 0x40b   : > { %1367 = vmatpush3.bf16.msra.mxu1 %v1196_v4 }
 0x4c6   : > { %v364_v32 = vpop.f32.mrf.mxu1 }
 0x4c7   : > { %v370_v33 = vadd.f32 %v1202_v31, %v364_v32 }
 0x4c8   : > { %v1354_v34 = vpop.f32.mrf.mxu1 }
 0x4c9   : > { %1498 = vtanh.f32 %v370_v33  ;;  %v1204_v38 = vmul.f32 -1.442695, %v370_v33  ;;  %v1522_v34 = vld [vmem:[%s1928_s4 + $0x8] sm:$0xff] (%p218_p0)  }
 0x4ca   : > { %v367_v35 = vpop.f32.mrf.mxu1  ;;  %1372 = vmatprep.subr.bf16.mxu0 (%p218_p0), %v1522_v34  ;;  %1428 = vmatprep.subr.bf16.mxu1 (%p218_p0), %v1522_v34 }
 0x4cb   : > { %1500 = vpow2.f32 %v1204_v38  ;;  %v1523_v35 = vld [vmem:[%s1928_s4] sm:$0xff] (%p218_p0)  }
 0x4cc   : > { %v1355_v36 = vpop.f32.mrf.mxu1 }
 0x4d6   : > { %v1499_v37 = vpop.eup %1498 }
 0x4d7   : > { %380 = vrot.lane.b32.xlu1 %v1499_v37, %s1607_s23 }
 0x4d8   : > { %v1501_v39 = vpop.eup %1500 }
 0x4d9   : > { %v374_v40 = vadd.f32 1.0, %v1501_v39 }
 0x4db   : > { %1502 = vrcp.f32 %v374_v40 }
 0x4e8   : > { %v1503_v41 = vpop.eup %1502 }
 0x4e9   : > { %v378_v44 = vmul.f32 %v1503_v41, %v304_v21 }
 0x549   : > { %v381_v42 = vpop.permute.xlu1 %380 }
 0x54a   : > { %v383_v43 = vmul.f32 %v1503_v41, %v381_v42 }
 0x54c   : > { %385 = vrot.lane.b32.xlu0 %v383_v43, %s1606_s3 }
 0x5be   : > { %v386_v45 = vpop.permute.xlu0 %385 }
 0x5bf   : > { %v388_v46 = vadd.f32 %v386_v45, %v378_v44 }
 0x5c1   : > { %1504 = vtanh.f32 %v388_v46 }
 0x5ce   : > { %v1505_v47 = vpop.eup %1504 }
 0x5cf   : > { %391 = vrot.lane.b32.xlu1 %v1505_v47, %s1607_s23 }
 0x641   : > { %v392_v48 = vpop.permute.xlu1 %391 }
 0x642   : > { %v1777_v49 = vmul.f32 %v1503_v41, %v392_v48 }
 0x644   : > { %v405_v50 = vpack.c.bf16 %v1777_v49, %v1777_v49 }
 0x646   : > { %407 = vrot.lane.b32.xlu0 %v405_v50, %s1606_s3 }
 0x6b8   : > { %v408_v51 = vpop.permute.xlu0 %407 }
 0x6b9   : > { %1361 = vmatmul.mubr.msk.bf16.vlgmr.msra.gmra.mxu0 %vm74_vm0, %v408_v51 }
 0x6ba   :  { %1373 = vmatpush3.bf16.msra.mxu0 (%p218_p0), %v1522_v34 }
 0x6bb   :  { %1374 = vmatprep.subr.bf16.mxu0 (%p218_p0), %v1523_v35 }
 0x6be   :  { %1375 = vmatpush3.bf16.msra.mxu0 (%p218_p0), %v1523_v35 }
 0x779   : > { %v446_v53 = vpop.f32.mrf.mxu0 }
 0x77a   : > { %v452_v54 = vadd.f32 %v1210_v52, %v446_v53 }
 0x77b   : > { %v1362_v55 = vpop.f32.mrf.mxu0 }
 0x77c   : > { %1506 = vtanh.f32 %v452_v54  ;;  %v1212_v59 = vmul.f32 -1.442695, %v452_v54 }
 0x77d   : > { %v449_v56 = vpop.f32.mrf.mxu0 }
 0x77e   : > { %1508 = vpow2.f32 %v1212_v59  ;;  %v1829_v56 = vld [vmem:[%s1929_s5] sm:$0xf] (%p218_p0)  ;;  %v1844_v59 = vld [vmem:[%s1929_s5 + $0xc] sm:$0xf] (%p218_p0) }
 0x77f   : > { %v1363_v57 = vpop.f32.mrf.mxu0 }
 0x780   :  { %v1834_v57 = vld [vmem:[%s1929_s5 + $0x4] sm:$0xf] (%p218_p0) }
 0x789   : > { %v1507_v58 = vpop.eup %1506 }
 0x78a   : > { %462 = vrot.lane.b32.xlu1 %v1507_v58, %s1607_s23  ;;  %v1839_v58 = vld [vmem:[%s1929_s5 + $0x8] sm:$0xf] (%p218_p0)  ;;  %s1853_s5 = smov (%p218_p0), 0  }
 0x78b   : > { %v1509_v60 = vpop.eup %1508 }
 0x78c   : > { %v456_v61 = vadd.f32 1.0, %v1509_v60  ;;  %v1224_v60 = vld [vmem:[%s1930_s6] ss:$0 sm:$0xff] (%p218_p0) }
 0x78e   : > { %1510 = vrcp.f32 %v456_v61 }
 0x79b   : > { %v1511_v62 = vpop.eup %1510 }
 0x79c   : > { %v460_v1 = vmul.f32 %v1511_v62, %v388_v46 }
 0x7fc   : > { %v463_v63 = vpop.permute.xlu1 %462 }
 0x7fd   : > { %v465_v0 = vmul.f32 %v1511_v62, %v463_v63 }
 0x7ff   : > { %467 = vrot.lane.b32.xlu0 %v465_v0, %s1606_s3 }
 0x871   : > { %v468_v2 = vpop.permute.xlu0 %467 }
 0x872   : > { %v470_v3 = vadd.f32 %v468_v2, %v460_v1 }
 0x874   : > { %1512 = vtanh.f32 %v470_v3 }
 0x881   : > { %v1513_v4 = vpop.eup %1512 }
 0x882   : > { %473 = vrot.lane.b32.xlu1 %v1513_v4, %s1607_s23 }
 0x8f4   : > { %v474_v5 = vpop.permute.xlu1 %473 }
 0x8f5   : > { %v476_v6 = vmul.f32 %v1511_v62, %v474_v5 }
 0x8f7   : > { %v487_v7 = vpack.c.bf16 %v476_v6, %v476_v6 }
 0x8f9   : > { %489 = vrot.lane.b32.xlu0 %v487_v7, %s1606_s3 }
 0x96b   : > { %v490_v8 = vpop.permute.xlu0 %489 }
 0x96c   : > { %1369 = vmatmul.mubr.msk.bf16.vlgmr.msra.gmra.mxu1 %vm74_vm0, %v490_v8 }
 0x96d   :  { %1430 = vmatpush3.bf16.msra.mxu1 (%p218_p0), %v1522_v34  ;;  %v1851_v34 = vmov (%p218_p0), 0.0  }
 0x96e   :  { %1429 = vmatprep.subr.bf16.mxu1 (%p218_p0), %v1523_v35 }
 0x971   :  { %1431 = vmatpush3.bf16.msra.mxu1 (%p218_p0), %v1523_v35 }
 0xa2c   : > { %v528_v10 = vpop.f32.mrf.mxu1 }
 0xa2d   : > { %v534_v11 = vadd.f32 %v1218_v9, %v528_v10 }
 0xa2e   : > { %v1370_v12 = vpop.f32.mrf.mxu1 }
 0xa2f   : > { %1514 = vtanh.f32 %v534_v11  ;;  %v1220_v16 = vmul.f32 -1.442695, %v534_v11 }
 0xa30   : > { %v531_v13 = vpop.f32.mrf.mxu1 }
 0xa31   : > { %1516 = vpow2.f32 %v1220_v16 }
 0xa32   : > { %v1371_v14 = vpop.f32.mrf.mxu1 }
 0xa3c   : > { %v1515_v15 = vpop.eup %1514 }
 0xa3d   : > { %544 = vrot.lane.b32.xlu1 %v1515_v15, %s1607_s23 }
 0xa3e   : > { %v1517_v17 = vpop.eup %1516 }
 0xa3f   : > { %v538_v18 = vadd.f32 1.0, %v1517_v17 }
 0xa41   : > { %1518 = vrcp.f32 %v538_v18 }
 0xa4e   : > { %v1519_v19 = vpop.eup %1518 }
 0xa4f   : > { %v542_v22 = vmul.f32 %v1519_v19, %v470_v3 }
 0xaaf   : > { %v545_v20 = vpop.permute.xlu1 %544 }
 0xab0   : > { %v547_v21 = vmul.f32 %v1519_v19, %v545_v20 }
 0xab2   : > { %549 = vrot.lane.b32.xlu0 %v547_v21, %s1606_s3 }
 0xab6   : > { %312 = vrot.lane.b32.xlu0 %v1766_v24, %s1606_s3 }
 0xaba   : > { %478 = vrot.lane.b32.xlu0 %v476_v6, %s1606_s3 }
 0xb24   : > { %v550_v23 = vpop.permute.xlu0 %549 }
 0xb25   : > { %v552_v63 = vadd.f32 %v550_v23, %v542_v22  }
 0xb27   : > { %1520 = vtanh.f32 %v552_v63 }
 0xb28   : > { %v313_v25 = vpop.permute.xlu0 %312 }
 0xb29   : > { %317 = vst.msk [vmem:[%s315_s24] sm:$0x3] %vm316_vm2, %v313_v25 }
 0xb2c   : > { %v479_v30 = vpop.permute.xlu0 %478 }
 0xb2d   : > { %1215 = vst.msk [vmem:[%s315_s24 + $0x4] sm:$0x3] %vm316_vm2, %v479_v30 }
 0xb34   : > { %v1521_v31 = vpop.eup %1520 }
 0xb35   : > { %555 = vrot.lane.b32.xlu1 %v1521_v31, %s1607_s23 }
 0xb39   : > { %396 = vrot.lane.b32.xlu1 %v1777_v49, %s1606_s3 }
 0xba7   : > { %v556_v24 = vpop.permute.xlu1 %555 }
 0xba8   : > { %v558_v0 = vmul.f32 %v1519_v19, %v556_v24  }
 0xbaa   : > { %560 = vrot.lane.b32.xlu1 %v558_v0, %s1606_s3 }
 0xbab   : > { %v397_v32 = vpop.permute.xlu1 %396 }
 0xbac   : > { %1207 = vst.msk [vmem:[%s315_s24 + $0x2] sm:$0x3] %vm316_vm2, %v397_v32 }
 0xc19   :  { %220 = sbr.rel (!%p218_p0) target bundleno = 220 (0xdc), region = 78 }
 0xc1c   : > { %v561_v33 = vpop.permute.xlu1 %560 }
 0xc1d   : > { %1223 = vst.msk [vmem:[%s315_s24 + $0x6] sm:$0x3] %vm316_vm2, %v561_v33  ;;  %v1849_v33 = vmov (%p218_p0), 0.0  }
 0xc24   :  { %v565_v36 = vld [vmem:[#allocation3] sm:$0xff]  ;;  %v566_v37 = vld [vmem:[#allocation3 + $0x8] sm:$0xff]  ;;  %v567_v41 = vld [vmem:[#allocation3 + $0x10] sm:$0xff] }
 0xc25   :  { %v573_v38 = vld [vmem:[#allocation3 + $0x40] sm:$0xff]  ;;  %v581_v39 = vpack.c.bf16 %v566_v37, %v565_v36  ;;  %v574_v40 = vld [vmem:[#allocation3 + $0x48] sm:$0xff]  ;;  %v568_v42 = vld [vmem:[#allocation3 + $0x18] sm:$0xff] }
 0xc26   :  { %v585_v26 = vpack.c.bf16 %v574_v40, %v573_v38  ;;  %v575_v27 = vld [vmem:[#allocation3 + $0x50] sm:$0xff]  ;;  %v576_v28 = vld [vmem:[#allocation3 + $0x58] sm:$0xff]  ;;  %v569_v29 = vld [vmem:[#allocation3 + $0x20] sm:$0xff]  ;;  %v582_v46 = vpack.c.bf16 %v568_v42, %v567_v41 }
 0xc27   :  { %1376 = vmatprep.mubr.msk.bf16.mxu0 %vm74_vm0, %v581_v39  ;;  %v570_v43 = vld [vmem:[#allocation3 + $0x28] sm:$0xff]  ;;  %v577_v44 = vld [vmem:[#allocation3 + $0x60] sm:$0xff]  ;;  %v586_v47 = vpack.c.bf16 %v576_v28, %v575_v27  ;;  %v571_v50 = vld [vmem:[#allocation3 + $0x30] sm:$0xff] }
 0xc28   :  { %v578_v45 = vld [vmem:[#allocation3 + $0x68] sm:$0xff]  ;;  %1384 = vmatprep.mubr.msk.bf16.mxu1 %vm74_vm0, %v585_v26  ;;  %v583_v48 = vpack.c.bf16 %v570_v43, %v569_v29  ;;  %1377 = vmatmul.mubr.msk.bf16.vlgmr.msra.gmra.mxu0 %vm74_vm0, %v582_v46  ;;  %v572_v51 = vld [vmem:[#allocation3 + $0x38] sm:$0xff]  ;;  %v579_v52 = vld [vmem:[#allocation3 + $0x70] sm:$0xff] }
 0xc29   :  { %v587_v49 = vpack.c.bf16 %v578_v45, %v577_v44  ;;  %1385 = vmatmul.mubr.msk.bf16.vlgmr.msra.gmra.mxu1 %vm74_vm0, %v586_v47  ;;  %v580_v53 = vld [vmem:[#allocation3 + $0x78] sm:$0xff]  ;;  %v584_v54 = vpack.c.bf16 %v572_v51, %v571_v50 }
 0xc2a   :  { %1380 = vmatprep.mubr.msk.bf16.mxu0 %vm74_vm0, %v583_v48  ;;  %v588_v55 = vpack.c.bf16 %v580_v53, %v579_v52 }
 0xc2b   :  { %1388 = vmatprep.mubr.msk.bf16.mxu1 %vm74_vm0, %v587_v49 }
 0xc30   :  { %1381 = vmatmul.mubr.msk.bf16.gmra.mxu0 %vm74_vm0, %v584_v54 }
 0xc31   :  { %1389 = vmatmul.mubr.msk.bf16.gmra.mxu1 %vm74_vm0, %v588_v55 }
 0xce8   :  { %v1378_v61 = vpop.f32.mrf.mxu0 }
 0xce9   :  { %v1386_v62 = vpop.f32.mrf.mxu1  ;;  %v679_v63 = vadd.f32 %v1378_v61, %v1224_v60 }
 0xcea   :  { %v711_v0 = vadd.f32 %v1386_v62, %v1224_v60  ;;  %v670_v1 = vpop.f32.mrf.mxu0 }
 0xceb   :  { %v702_v2 = vpop.f32.mrf.mxu1  ;;  %735 = vst [vmem:[#allocation2 + $0x10] sm:$0xff] %v679_v63  ;;  %v671_v3 = vadd.f32 %v1224_v60, %v670_v1 }
 0xcec   :  { %743 = vst [vmem:[#allocation2 + $0x50] sm:$0xff] %v711_v0  ;;  %v703_v4 = vadd.f32 %v1224_v60, %v702_v2  ;;  %v1379_v5 = vpop.f32.mrf.mxu0 }
 0xced   :  { %v1387_v6 = vpop.f32.mrf.mxu1  ;;  %733 = vst [vmem:[#allocation2] sm:$0xff] %v671_v3  ;;  %v682_v7 = vadd.f32 %v1379_v5, %v1224_v60 }
 0xcee   :  { %741 = vst [vmem:[#allocation2 + $0x40] sm:$0xff] %v703_v4  ;;  %v714_v8 = vadd.f32 %v1387_v6, %v1224_v60  ;;  %v673_v9 = vpop.f32.mrf.mxu0 }
 0xcef   :  { %v705_v10 = vpop.f32.mrf.mxu1  ;;  %736 = vst [vmem:[#allocation2 + $0x18] sm:$0xff] %v682_v7  ;;  %v674_v11 = vadd.f32 %v1224_v60, %v673_v9 }
 0xcf0   :  { %744 = vst [vmem:[#allocation2 + $0x58] sm:$0xff] %v714_v8  ;;  %v706_v12 = vadd.f32 %v1224_v60, %v705_v10  ;;  %v1382_v13 = vpop.f32.mrf.mxu0 }
 0xcf1   :  { %v1390_v14 = vpop.f32.mrf.mxu1  ;;  %734 = vst [vmem:[#allocation2 + $0x8] sm:$0xff] %v674_v11  ;;  %v695_v15 = vadd.f32 %v1382_v13, %v1224_v60 }
 0xcf2   :  { %742 = vst [vmem:[#allocation2 + $0x48] sm:$0xff] %v706_v12  ;;  %v727_v16 = vadd.f32 %v1390_v14, %v1224_v60  ;;  %v686_v17 = vpop.f32.mrf.mxu0 }
 0xcf3   :  { %v718_v18 = vpop.f32.mrf.mxu1  ;;  %739 = vst [vmem:[#allocation2 + $0x30] sm:$0xff] %v695_v15  ;;  %v687_v19 = vadd.f32 %v1224_v60, %v686_v17 }
 0xcf4   :  { %747 = vst [vmem:[#allocation2 + $0x70] sm:$0xff] %v727_v16  ;;  %v719_v20 = vadd.f32 %v1224_v60, %v718_v18  ;;  %v1383_v21 = vpop.f32.mrf.mxu0 }
 0xcf5   :  { %v1391_v22 = vpop.f32.mrf.mxu1  ;;  %737 = vst [vmem:[#allocation2 + $0x20] sm:$0xff] %v687_v19  ;;  %v698_v23 = vadd.f32 %v1383_v21, %v1224_v60 }
 0xcf6   :  { %745 = vst [vmem:[#allocation2 + $0x60] sm:$0xff] %v719_v20  ;;  %v730_v25 = vadd.f32 %v1391_v22, %v1224_v60  ;;  %v689_v30 = vpop.f32.mrf.mxu0 }
 0xcf7   :  { %v721_v31 = vpop.f32.mrf.mxu1  ;;  %740 = vst [vmem:[#allocation2 + $0x38] sm:$0xff] %v698_v23  ;;  %v690_v24 = vadd.f32 %v1224_v60, %v689_v30 }
 0xcf8   :  { %748 = vst [vmem:[#allocation2 + $0x78] sm:$0xff] %v730_v25  ;;  %v722_v32 = vadd.f32 %v1224_v60, %v721_v31 }
 0xcf9   :  { %738 = vst [vmem:[#allocation2 + $0x28] sm:$0xff] %v690_v24 }
 0xcfa   :  { %746 = vst [vmem:[#allocation2 + $0x68] sm:$0xff] %v722_v32 }
 0xcfb LB: > { %v1237_v35 = vcombine.low %v1839_v58, %v1844_v59  ;;  %v1608_v36 = vmov 0.0   ;;  %v764_v37 = vpack.c.bf16 %v1598_v34, %v1598_v34  ;;  %v1236_v38 = vcombine.low %v1829_v56, %v1834_v57  ;;  %s1610_s6 = smov 32   ;;  %s1235_s14 = sshll.u32 %s1602_s5, 3  ;;  %s1602_s5 = sphi %s1853_s5, %s758_s5   ;;  %v1598_v34 = vphi %v1851_v34, %v1095_v34   ;;  %v1594_v33 = vphi %v1849_v33, %v1089_v33  }
 0xcfc   : > { %1392 = vmatprep.subr.bf16.mxu0 %v1608_v36  ;;  %1400 = vmatprep.subr.bf16.mxu1 %v1608_v36  ;;  %vm1609_vm3 = vmmov 0   ;;  %s1872_s15 = scalar_lea.vmem [#allocation2], %s1235_s14  ;;  %s1611_s16 = smov 64  }
 0xcfd   : > { %1393 = vmatpush3.bf16.msra.mxu0 %v1237_v35  ;;  %1396 = vmatprep.mubr.msk.bf16.mxu0 %vm1609_vm3, %v1608_v36  ;;  %s852_s18 = scalar_lea.vmem %s1931_s7, %s1235_s14  ;;  %s758_s5 = sadd.s32 1, %s1602_s5  }
 0xcfe   : > { %1394 = vmatprep.subr.bf16.mxu0 %v1608_v36  ;;  %1401 = vmatpush3.bf16.msra.mxu1 %v1237_v35  ;;  %p755_p1 = scmp.ge.s32.totalorder %s758_s5, 16  }
 0xcff   : > { %766 = vrot.lane.b32.xlu0 %v764_v37, %s1610_s6  ;;  %1402 = vmatprep.subr.bf16.mxu1 %v1608_v36 }
 0xd00   : > { %1404 = vmatprep.mubr.msk.bf16.mxu1 %vm1609_vm3, %v1608_v36 }
 0xd01   : > { %1395 = vmatpush3.bf16.msra.mxu0 %v1236_v38  ;;  %v763_v40 = vld [vmem:[%s1872_s15] sm:$0x3]  ;;  %v1242_v61 = vld [vmem:[%s1872_s15 + $0x2] sm:$0x3]  ;;  %v1250_v18 = vld [vmem:[%s1872_s15 + $0x4] sm:$0x3] }
 0xd02   : > { %1403 = vmatpush3.bf16.msra.mxu1 %v1236_v38  ;;  %1408 = vmatprep.subr.bf16.mxu0 %v1608_v36 }
 0xd03   : > { %1416 = vmatprep.subr.bf16.mxu1 %v1608_v36 }
 0xd71   : > { %v767_v39 = vpop.permute.xlu0 %766 }
 0xd72   : > { %1397 = vmatmul.mubr.msk.bf16.vlgmr.msra.gmra.mxu0 %vm74_vm0, %v767_v39 }
 0xd73   : > { %1409 = vmatpush3.bf16.msra.mxu0 %v1237_v35  ;;  %1412 = vmatprep.mubr.msk.bf16.mxu0 %vm1609_vm3, %v1608_v36 }
 0xd74   : > { %1410 = vmatprep.subr.bf16.mxu0 %v1608_v36 }
 0xd77   : > { %1411 = vmatpush3.bf16.msra.mxu0 %v1236_v38 }
 0xe32   : > { %v817_v41 = vpop.f32.mrf.mxu0 }
 0xe33   : > { %v823_v42 = vadd.f32 %v817_v41, %v763_v40 }
 0xe34   : > { %v1398_v26 = vpop.f32.mrf.mxu0 }
 0xe35   : > { %1524 = vtanh.f32 %v823_v42  ;;  %v1239_v43 = vmul.f32 -1.442695, %v823_v42  ;;  %v1258_v26 = vld [vmem:[%s1872_s15 + $0x6] sm:$0x3] }
 0xe36   : > { %v820_v27 = vpop.f32.mrf.mxu0 }
 0xe37   : > { %1526 = vpow2.f32 %v1239_v43 }
 0xe38   : > { %v1399_v28 = vpop.f32.mrf.mxu0 }
 0xe42   : > { %v1525_v29 = vpop.eup %1524 }
 0xe43   : > { %833 = vrot.lane.b32.xlu0 %v1525_v29, %s1611_s16 }
 0xe44   : > { %v1527_v44 = vpop.eup %1526 }
 0xe45   : > { %v827_v45 = vadd.f32 1.0, %v1527_v44 }
 0xe47   : > { %1528 = vrcp.f32 %v827_v45 }
 0xe54   : > { %v1529_v46 = vpop.eup %1528 }
 0xe55   : > { %v831_v49 = vmul.f32 %v1594_v33, %v1529_v46 }
 0xeb5   : > { %v834_v47 = vpop.permute.xlu0 %833 }
 0xeb6   : > { %v836_v48 = vmul.f32 %v1529_v46, %v834_v47 }
 0xeb8   : > { %838 = vrot.lane.b32.xlu1 %v836_v48, %s1610_s6 }
 0xf2a   : > { %v839_v50 = vpop.permute.xlu1 %838 }
 0xf2b   : > { %v841_v51 = vadd.f32 %v839_v50, %v831_v49 }
 0xf2d   : > { %1530 = vtanh.f32 %v841_v51 }
 0xf3a   : > { %v1531_v52 = vpop.eup %1530 }
 0xf3b   : > { %844 = vrot.lane.b32.xlu1 %v1531_v52, %s1611_s16 }
 0xfad   : > { %v845_v53 = vpop.permute.xlu1 %844 }
 0xfae   : > { %v1878_v54 = vmul.f32 %v1529_v46, %v845_v53 }
 0xfb0   : > { %v860_v55 = vpack.c.bf16 %v1878_v54, %v1878_v54 }
 0xfb2   : > { %862 = vrot.lane.b32.xlu0 %v860_v55, %s1610_s6 }
0x1024   : > { %v863_v60 = vpop.permute.xlu0 %862 }
0x1025   : > { %1405 = vmatmul.mubr.msk.bf16.vlgmr.msra.gmra.mxu1 %vm74_vm0, %v863_v60 }
0x1026   : > { %1417 = vmatpush3.bf16.msra.mxu1 %v1237_v35  ;;  %1420 = vmatprep.mubr.msk.bf16.mxu1 %vm1609_vm3, %v1608_v36 }
0x1027   : > { %1418 = vmatprep.subr.bf16.mxu1 %v1608_v36 }
0x102a   : > { %1419 = vmatpush3.bf16.msra.mxu1 %v1236_v38 }
0x10e5   : > { %v901_v62 = vpop.f32.mrf.mxu1 }
0x10e6   : > { %v907_v63 = vadd.f32 %v1242_v61, %v901_v62 }
0x10e7   : > { %v1406_v0 = vpop.f32.mrf.mxu1 }
0x10e8   : > { %1532 = vtanh.f32 %v907_v63  ;;  %v1244_v4 = vmul.f32 -1.442695, %v907_v63 }
0x10e9   : > { %v904_v1 = vpop.f32.mrf.mxu1 }
0x10ea   : > { %1534 = vpow2.f32 %v1244_v4 }
0x10eb   : > { %v1407_v2 = vpop.f32.mrf.mxu1 }
0x10f5   : > { %v1533_v3 = vpop.eup %1532 }
0x10f6   : > { %917 = vrot.lane.b32.xlu1 %v1533_v3, %s1611_s16 }
0x10f7   : > { %v1535_v5 = vpop.eup %1534 }
0x10f8   : > { %v911_v6 = vadd.f32 1.0, %v1535_v5 }
0x10fa   : > { %1536 = vrcp.f32 %v911_v6 }
0x1107   : > { %v1537_v7 = vpop.eup %1536 }
0x1108   : > { %v915_v10 = vmul.f32 %v1537_v7, %v841_v51 }
0x1168   : > { %v918_v8 = vpop.permute.xlu1 %917 }
0x1169   : > { %v920_v9 = vmul.f32 %v1537_v7, %v918_v8 }
0x116b   : > { %922 = vrot.lane.b32.xlu0 %v920_v9, %s1610_s6 }
0x11dd   : > { %v923_v11 = vpop.permute.xlu0 %922 }
0x11de   : > { %v925_v12 = vadd.f32 %v923_v11, %v915_v10 }
0x11e0   : > { %1538 = vtanh.f32 %v925_v12 }
0x11ed   : > { %v1539_v13 = vpop.eup %1538 }
0x11ee   : > { %928 = vrot.lane.b32.xlu1 %v1539_v13, %s1611_s16 }
0x1260   : > { %v929_v14 = vpop.permute.xlu1 %928 }
0x1261   : > { %v1889_v15 = vmul.f32 %v1537_v7, %v929_v14 }
0x1263   : > { %v942_v16 = vpack.c.bf16 %v1889_v15, %v1889_v15 }
0x1265   : > { %944 = vrot.lane.b32.xlu0 %v942_v16, %s1610_s6 }
0x12d7   : > { %v945_v17 = vpop.permute.xlu0 %944 }
0x12d8   : > { %1413 = vmatmul.mubr.msk.bf16.vlgmr.msra.gmra.mxu0 %vm74_vm0, %v945_v17 }
0x1398   : > { %v983_v19 = vpop.f32.mrf.mxu0 }
0x1399   : > { %v989_v20 = vadd.f32 %v1250_v18, %v983_v19 }
0x139a   : > { %v1414_v21 = vpop.f32.mrf.mxu0 }
0x139b   : > { %1540 = vtanh.f32 %v989_v20  ;;  %v1252_v30 = vmul.f32 -1.442695, %v989_v20 }
0x139c   : > { %v986_v22 = vpop.f32.mrf.mxu0 }
0x139d   : > { %1542 = vpow2.f32 %v1252_v30 }
0x139e   : > { %v1415_v23 = vpop.f32.mrf.mxu0 }
0x13a8   : > { %v1541_v25 = vpop.eup %1540 }
0x13a9   : > { %999 = vrot.lane.b32.xlu1 %v1541_v25, %s1611_s16 }
0x13aa   : > { %v1543_v31 = vpop.eup %1542 }
0x13ab   : > { %v993_v24 = vadd.f32 1.0, %v1543_v31 }
0x13ad   : > { %1544 = vrcp.f32 %v993_v24 }
0x13ba   : > { %v1545_v32 = vpop.eup %1544 }
0x13bb   : > { %v997_v35 = vmul.f32 %v1545_v32, %v925_v12 }
0x141b   : > { %v1000_v33 = vpop.permute.xlu1 %999 }
0x141c   : > { %v1002_v34 = vmul.f32 %v1545_v32, %v1000_v33 }
0x141e   : > { %1004 = vrot.lane.b32.xlu0 %v1002_v34, %s1610_s6 }
0x1490   : > { %v1005_v36 = vpop.permute.xlu0 %1004 }
0x1491   : > { %v1007_v37 = vadd.f32 %v1005_v36, %v997_v35 }
0x1493   : > { %1546 = vtanh.f32 %v1007_v37 }
0x14a0   : > { %v1547_v38 = vpop.eup %1546 }
0x14a1   : > { %1010 = vrot.lane.b32.xlu1 %v1547_v38, %s1611_s16 }
0x1513   : > { %v1011_v39 = vpop.permute.xlu1 %1010 }
0x1514   : > { %v1013_v40 = vmul.f32 %v1545_v32, %v1011_v39 }
0x1516   : > { %v1024_v41 = vpack.c.bf16 %v1013_v40, %v1013_v40 }
0x1518   : > { %1026 = vrot.lane.b32.xlu0 %v1024_v41, %s1610_s6 }
0x158a   : > { %v1027_v42 = vpop.permute.xlu0 %1026 }
0x158b   : > { %1421 = vmatmul.mubr.msk.bf16.vlgmr.msra.gmra.mxu1 %vm74_vm0, %v1027_v42 }
0x164b   : > { %v1065_v27 = vpop.f32.mrf.mxu1 }
0x164c   : > { %v1071_v28 = vadd.f32 %v1258_v26, %v1065_v27 }
0x164d   : > { %v1422_v29 = vpop.f32.mrf.mxu1 }
0x164e   : > { %1548 = vtanh.f32 %v1071_v28  ;;  %v1260_v46 = vmul.f32 -1.442695, %v1071_v28 }
0x164f   : > { %v1068_v43 = vpop.f32.mrf.mxu1 }
0x1650   : > { %1550 = vpow2.f32 %v1260_v46 }
0x1651   : > { %v1423_v44 = vpop.f32.mrf.mxu1 }
0x165b   : > { %v1549_v45 = vpop.eup %1548 }
0x165c   : > { %1081 = vrot.lane.b32.xlu1 %v1549_v45, %s1611_s16 }
0x165d   : > { %v1551_v47 = vpop.eup %1550 }
0x165e   : > { %v1075_v48 = vadd.f32 1.0, %v1551_v47 }
0x1660   : > { %1552 = vrcp.f32 %v1075_v48 }
0x166d   : > { %v1553_v49 = vpop.eup %1552 }
0x166e   : > { %v1079_v52 = vmul.f32 %v1553_v49, %v1007_v37 }
0x16ce   : > { %v1082_v50 = vpop.permute.xlu1 %1081 }
0x16cf   : > { %v1084_v51 = vmul.f32 %v1553_v49, %v1082_v50 }
0x16d1   : > { %1086 = vrot.lane.b32.xlu0 %v1084_v51, %s1610_s6 }
0x16d5   : > { %849 = vrot.lane.b32.xlu0 %v1878_v54, %s1610_s6 }
0x16d9   : > { %1015 = vrot.lane.b32.xlu0 %v1013_v40, %s1610_s6 }
0x1743   : > { %v1087_v53 = vpop.permute.xlu0 %1086 }
0x1744   : > { %v1089_v33 = vadd.f32 %v1087_v53, %v1079_v52  }
0x1746   : > { %1554 = vtanh.f32 %v1089_v33 }
0x1747   : > { %v850_v55 = vpop.permute.xlu0 %849 }
0x1748   : > { %854 = vst.msk [vmem:[%s852_s18] sm:$0x3] %vm316_vm2, %v850_v55 }
0x174b   : > { %v1016_v60 = vpop.permute.xlu0 %1015 }
0x174c   : > { %1255 = vst.msk [vmem:[%s852_s18 + $0x4] sm:$0x3] %vm316_vm2, %v1016_v60 }
0x1753   : > { %v1555_v61 = vpop.eup %1554 }
0x1754   : > { %1092 = vrot.lane.b32.xlu1 %v1555_v61, %s1611_s16 }
0x1758   : > { %933 = vrot.lane.b32.xlu1 %v1889_v15, %s1610_s6 }
0x17c6   : > { %v1093_v54 = vpop.permute.xlu1 %1092 }
0x17c7   : > { %v1095_v34 = vmul.f32 %v1553_v49, %v1093_v54  }
0x17c9   : > { %1097 = vrot.lane.b32.xlu1 %v1095_v34, %s1610_s6 }
0x17ca   : > { %v934_v62 = vpop.permute.xlu1 %933 }
0x17cb   : > { %1247 = vst.msk [vmem:[%s852_s18 + $0x2] sm:$0x3] %vm316_vm2, %v934_v62 }
0x1838   :  { %757 = sbr.rel (!%p755_p1) target bundleno = 3323 (0xcfb), region = 89 }
0x183b   : > { %v1098_v63 = vpop.permute.xlu1 %1097 }
0x183c   : > { %1263 = vst.msk [vmem:[%s852_s18 + $0x6] sm:$0x3] %vm316_vm2, %v1098_v63 }

// kernel: _lambda_.7
= control target key start
LH: loop header
LB: loop body
LE: loop exit
PB: predicated region body
PF: predicated region fallthrough
CT: control target
= control target key end

     0   :  { %v1602_v1 = vmov 0   ;;  %v92_v49 = vlaneseq  ;;  %s1605_s25 = smov 96   ;;  %vm1123_vm0 = vcmask 261120   ;;  %vm1162_vm1 = vcmask 523264   ;;  %s2060_s5 = inlined_call_operand.vmem [shape: bf16[128,256], index: 5, kind: input, shape index: {}]   ;;  %s2061_s0 = inlined_call_operand.vmem [shape: f32[32,128], index: 0, kind: input, shape index: {}]   ;;  %s2062_s2 = inlined_call_operand.vmem [shape: f32[32,128], index: 2, kind: input, shape index: {}]   ;;  %s2063_s7 = inlined_call_operand.vmem [shape: bf16[128,128], index: 7, kind: input, shape index: {}]   ;;  %s2064_s9 = inlined_call_operand.vmem [shape: bf16[128,256], index: 9, kind: input, shape index: {}]   ;;  %s2065_s6 = inlined_call_operand.vmem [shape: f32[1,256], index: 6, kind: input, shape index: {}]   ;;  %s2066_s8 = inlined_call_operand.vmem [shape: f32[1,128], index: 8, kind: input, shape index: {}]   ;;  %s2067_s3 = inlined_call_operand.vmem [shape: f32[32,128], index: 3, kind: input, shape index: {}]   ;;  %s2068_s11 = inlined_call_operand.vmem [shape: bf16[128,128], index: 11, kind: input, shape index: {}]   ;;  %s2069_s13 = inlined_call_operand.vmem [shape: bf16[128,256], index: 13, kind: input, shape index: {}]   ;;  %s2070_s10 = inlined_call_operand.vmem [shape: f32[1,256], index: 10, kind: input, shape index: {}]   ;;  %s2071_s12 = inlined_call_operand.vmem [shape: f32[1,128], index: 12, kind: input, shape index: {}]   ;;  %s2072_s4 = inlined_call_operand.vmem [shape: f32[32,128], index: 4, kind: input, shape index: {}]   ;;  %s2073_s15 = inlined_call_operand.vmem [shape: bf16[128,32], index: 15, kind: input, shape index: {}]   ;;  %s2074_s1 = inlined_call_operand.vmem [shape: f32[32,128], index: 1, kind: input, shape index: {}]   ;;  %s2075_s14 = inlined_call_operand.vmem [shape: f32[1,256], index: 14, kind: input, shape index: {}]   ;;  %s2076_s17 = inlined_call_operand.vmem [shape: bf16[64,128], index: 17, kind: input, shape index: {}]   ;;  %s2077_s16 = inlined_call_operand.vmem [shape: f32[1,32], index: 16, kind: input, shape index: {}]   ;;  %s2078_s18 = inlined_call_operand.vmem [shape: f32[32,128], index: 18, kind: output, shape index: {}]  }
   0x1   :  { %2082 = sst [smem:[#allocation2_spill]] %s2060_s5  ;;  %214 = vmatprep.mubr.bf16.mxu0 %v1602_v1  ;;  %v1470_v31 = vld [vmem:[%s2063_s7 + $0x38] sm:$0xff]   ;;  %v1471_v32 = vld [vmem:[%s2063_s7 + $0x30] sm:$0xff]   ;;  %v1472_v33 = vld [vmem:[%s2063_s7 + $0x28] sm:$0xff]   ;;  %s1606_s5 = smov 32  }
   0x2   :  { %2083 = sst [smem:[#allocation3_spill]] %s2061_s0  ;;  %1355 = vmatprep.subr.bf16.mxu1 %v1470_v31  ;;  %v1473_v34 = vld [vmem:[%s2063_s7 + $0x20] sm:$0xff]   ;;  %v1474_v35 = vld [vmem:[%s2063_s7 + $0x18] sm:$0xff]   ;;  %v1475_v36 = vld [vmem:[%s2063_s7 + $0x10] sm:$0xff]   ;;  %v93_v50 = vshrl.u32 %v92_v49, 7 }
   0x3   :  { %2084 = sst [smem:[#allocation4_spill]] %s2062_s2  ;;  %1356 = vmatpush3.bf16.msra.mxu1 %v1470_v31  ;;  %v1476_v37 = vld [vmem:[%s2063_s7 + $0x8] sm:$0xff]   ;;  %v1477_v38 = vld [vmem:[%s2063_s7] sm:$0xff]   ;;  %v1478_v39 = vld [vmem:[%s2064_s9 + $0x70] ss:$8 sps:$4 sm:$0xff]  }
   0x4   :  { %s2085_s29 = sld [smem:[#allocation2_spill]]  ;;  %1357 = vmatprep.subr.bf16.mxu1 %v1471_v32  ;;  %v1480_v40 = vld [vmem:[%s2064_s9 + $0x74] ss:$8 sps:$4 sm:$0xff]   ;;  %v1483_v41 = vld [vmem:[%s2064_s9 + $0x64] ss:$8 sps:$4 sm:$0xff]   ;;  %v1831_v51 = vsub.s32 1, %v93_v50 }
   0x5   :  { %s2086_s30 = sld [smem:[#allocation3_spill]]  ;;  %v1481_v42 = vld [vmem:[%s2064_s9 + $0x60] ss:$8 sps:$4 sm:$0xff]   ;;  %v1486_v43 = vld [vmem:[%s2064_s9 + $0x54] ss:$8 sps:$4 sm:$0xff]  }
   0x6   :  { %s2087_s21 = sld [smem:[#allocation4_spill]]  ;;  %v1484_v44 = vld [vmem:[%s2064_s9 + $0x50] ss:$8 sps:$4 sm:$0xff]   ;;  %v1489_v45 = vld [vmem:[%s2064_s9 + $0x44] ss:$8 sps:$4 sm:$0xff]  }
   0x7   :  { %1358 = vmatpush3.bf16.msra.mxu1 %v1471_v32  ;;  %v1487_v46 = vld [vmem:[%s2064_s9 + $0x40] ss:$8 sps:$4 sm:$0xff]   ;;  %v1492_v47 = vld [vmem:[%s2064_s9 + $0x34] ss:$8 sps:$4 sm:$0xff]   ;;  %v1490_v48 = vld [vmem:[%s2064_s9 + $0x30] ss:$8 sps:$4 sm:$0xff]  }
   0x8   :  { %1359 = vmatprep.subr.bf16.mxu1 %v1472_v33  ;;  %v90_v52 = vld [vmem:[%s2065_s6] sm:$0x3]  ;;  %v1495_v31 = vld [vmem:[%s2064_s9 + $0x24] ss:$8 sps:$4 sm:$0xff]  }
   0x9   :  { %v99_v53 = vrot.slane %v90_v52, %v1831_v51  ;;  %v1493_v32 = vld [vmem:[%s2064_s9 + $0x20] ss:$8 sps:$4 sm:$0xff]  }
   0xa   :  { %v1446_v0 = vld [vmem:[%s2085_s29 + $0x74] ss:$8 sps:$4 sm:$0xff]   ;;  %v1448_v2 = vld [vmem:[%s2085_s29 + $0x70] ss:$8 sps:$4 sm:$0xff]   ;;  %v1449_v3 = vld [vmem:[%s2085_s29 + $0x64] ss:$8 sps:$4 sm:$0xff]  }
   0xb   :  { %182 = vmatprep.subr.bf16.mxu0 %v1446_v0  ;;  %v1451_v4 = vld [vmem:[%s2085_s29 + $0x60] ss:$8 sps:$4 sm:$0xff]   ;;  %v1452_v5 = vld [vmem:[%s2085_s29 + $0x54] ss:$8 sps:$4 sm:$0xff]   ;;  %v1454_v6 = vld [vmem:[%s2085_s29 + $0x50] ss:$8 sps:$4 sm:$0xff]   ;;  %1360 = vmatpush3.bf16.msra.mxu1 %v1472_v33 }
   0xc   :  { %183 = vmatpush1.bf16.msra.mxu0 %v1448_v2  ;;  %v1455_v7 = vld [vmem:[%s2085_s29 + $0x44] ss:$8 sps:$4 sm:$0xff]   ;;  %v1457_v8 = vld [vmem:[%s2085_s29 + $0x40] ss:$8 sps:$4 sm:$0xff]   ;;  %v1458_v9 = vld [vmem:[%s2085_s29 + $0x34] ss:$8 sps:$4 sm:$0xff]   ;;  %1361 = vmatprep.subr.bf16.mxu1 %v1473_v34 }
   0xd   :  { %184 = vmatprep.subr.bf16.mxu0 %v1449_v3  ;;  %v1460_v10 = vld [vmem:[%s2085_s29 + $0x30] ss:$8 sps:$4 sm:$0xff]   ;;  %v1461_v11 = vld [vmem:[%s2085_s29 + $0x24] ss:$8 sps:$4 sm:$0xff]   ;;  %v1463_v12 = vld [vmem:[%s2085_s29 + $0x20] ss:$8 sps:$4 sm:$0xff]  }
   0xe   :  { %v1464_v13 = vld [vmem:[%s2085_s29 + $0x14] ss:$8 sps:$4 sm:$0xff]   ;;  %v1466_v14 = vld [vmem:[%s2085_s29 + $0x10] ss:$8 sps:$4 sm:$0xff]   ;;  %v60_v15 = vld [vmem:[%s2086_s30] sm:$0xff] }
   0xf   :  { %v61_v16 = vld [vmem:[%s2086_s30 + $0x8] sm:$0xff]  ;;  %v64_v17 = vld [vmem:[%s2087_s21] sm:$0xff]  ;;  %v62_v24 = vld [vmem:[%s2086_s30 + $0x10] sm:$0xff]  ;;  %1362 = vmatpush3.bf16.msra.mxu1 %v1473_v34 }
  0x10   :  { %185 = vmatpush1.bf16.msra.mxu0 %v1451_v4  ;;  %v65_v18 = vld [vmem:[%s2087_s21 + $0x8] sm:$0xff]  ;;  %v68_v20 = vadd.f32 %v64_v17, %v60_v15  ;;  %v63_v25 = vld [vmem:[%s2086_s30 + $0x18] sm:$0xff]  ;;  %v66_v26 = vld [vmem:[%s2087_s21 + $0x10] sm:$0xff]  ;;  %1363 = vmatprep.subr.bf16.mxu1 %v1474_v35 }
  0x11   :  { %186 = vmatprep.subr.bf16.mxu0 %v1452_v5  ;;  %v1467_v19 = vld [vmem:[%s2085_s29 + $0x4] ss:$8 sps:$4 sm:$0xff]   ;;  %v69_v21 = vadd.f32 %v65_v18, %v61_v16  ;;  %v1469_v22 = vld [vmem:[%s2085_s29] ss:$8 sps:$4 sm:$0xff]   ;;  %v67_v27 = vld [vmem:[%s2087_s21 + $0x18] sm:$0xff]  ;;  %v70_v28 = vadd.f32 %v66_v26, %v62_v24 }
  0x12   :  { %v71_v29 = vadd.f32 %v67_v27, %v63_v25  ;;  %v1498_v33 = vld [vmem:[%s2064_s9 + $0x14] ss:$8 sps:$4 sm:$0xff]   ;;  %v1496_v34 = vld [vmem:[%s2064_s9 + $0x10] ss:$8 sps:$4 sm:$0xff]  }
  0x13   :  { %v72_v23 = vpack.c.bf16 %v69_v21, %v68_v20  ;;  %1364 = vmatpush3.bf16.msra.mxu1 %v1474_v35  ;;  %v1501_v35 = vld [vmem:[%s2064_s9 + $0x4] ss:$8 sps:$4 sm:$0xff]  }
  0x14   :  { %187 = vmatpush1.bf16.msra.mxu0 %v1454_v6  ;;  %v73_v30 = vpack.c.bf16 %v71_v29, %v70_v28  ;;  %1365 = vmatprep.subr.bf16.mxu1 %v1475_v36 }
  0x15   :  { %188 = vmatprep.subr.bf16.mxu0 %v1455_v7 }
  0x17   :  { %1366 = vmatpush3.bf16.msra.mxu1 %v1475_v36  ;;  %v1499_v36 = vld [vmem:[%s2064_s9] ss:$8 sps:$4 sm:$0xff]  }
  0x18   :  { %189 = vmatpush1.bf16.msra.mxu0 %v1457_v8  ;;  %1367 = vmatprep.subr.bf16.mxu1 %v1476_v37 }
  0x19   :  { %190 = vmatprep.subr.bf16.mxu0 %v1458_v9 }
  0x1b   :  { %1368 = vmatpush3.bf16.msra.mxu1 %v1476_v37 }
  0x1c   :  { %191 = vmatpush1.bf16.msra.mxu0 %v1460_v10  ;;  %1369 = vmatprep.subr.bf16.mxu1 %v1477_v38 }
  0x1d   :  { %192 = vmatprep.subr.bf16.mxu0 %v1461_v11 }
  0x1f   :  { %1370 = vmatpush3.bf16.msra.mxu1 %v1477_v38  ;;  %v1246_v38 = vld [vmem:[%s2066_s8] ss:$0 sm:$0xff] }
  0x20   :  { %193 = vmatpush1.bf16.msra.mxu0 %v1463_v12 }
  0x21   :  { %194 = vmatprep.subr.bf16.mxu0 %v1464_v13  ;;  %v1837_v13 = vsub.s32 0, %v93_v50 }
  0x23   :  { %v95_v16 = vrot.slane %v90_v52, %v1837_v13 }
  0x24   :  { %195 = vmatpush1.bf16.msra.mxu0 %v1466_v14 }
  0x25   :  { %196 = vmatprep.subr.bf16.mxu0 %v1467_v19 }
  0x28   :  { %197 = vmatpush1.bf16.msra.mxu0 %v1469_v22 }
  0x29   :  { %507 = vmatprep.subr.bf16.mxu0 %v1480_v40 }
  0x2b   :  { %215 = vmatmul.mubr.bf16.vlgmr.msra.gmra.mxu0 %v72_v23 }
  0x2c   :  { %224 = vmatprep.mubr.bf16.mxu0 %v1602_v1  ;;  %508 = vmatpush1.bf16.msra.mxu0 %v1478_v39 }
  0x2d   :  { %509 = vmatprep.subr.bf16.mxu0 %v1483_v41 }
  0x30   :  { %510 = vmatpush1.bf16.msra.mxu0 %v1481_v42 }
  0x31   :  { %511 = vmatprep.subr.bf16.mxu0 %v1486_v43 }
  0x33   :  { %225 = vmatmul.mubr.bf16.gmra.mxu0 %v73_v30 }
  0x34   :  { %539 = vmatprep.mubr.bf16.mxu0 %v1602_v1  ;;  %512 = vmatpush1.bf16.msra.mxu0 %v1484_v44 }
  0x35   :  { %513 = vmatprep.subr.bf16.mxu0 %v1489_v45  ;;  %v389_v45 = vld [vmem:[%s2067_s3] sm:$0xff] }
  0x38   :  { %514 = vmatpush1.bf16.msra.mxu0 %v1487_v46  ;;  %v390_v46 = vld [vmem:[%s2067_s3 + $0x8] sm:$0xff] }
  0x39   :  { %515 = vmatprep.subr.bf16.mxu0 %v1492_v47 }
  0x3c   :  { %516 = vmatpush1.bf16.msra.mxu0 %v1490_v48 }
  0x3d   :  { %517 = vmatprep.subr.bf16.mxu0 %v1495_v31 }
  0x40   :  { %518 = vmatpush1.bf16.msra.mxu0 %v1493_v32 }
  0x41   :  { %519 = vmatprep.subr.bf16.mxu0 %v1498_v33 }
  0x44   :  { %520 = vmatpush1.bf16.msra.mxu0 %v1496_v34 }
  0x45   :  { %521 = vmatprep.subr.bf16.mxu0 %v1501_v35 }
  0x48   :  { %522 = vmatpush1.bf16.msra.mxu0 %v1499_v36 }
  0xeb   :  { %v216_v54 = vpop.f32.mrf.mxu0 }
  0xec   :  { %v217_v18 = vadd.f32 %v216_v54, %v95_v16 }
  0xed   :  { %v218_v55 = vpop.f32.mrf.mxu0 }
  0xee   :  { %v219_v56 = vadd.f32 %v218_v55, %v99_v53  ;;  %v392_v55 = vld [vmem:[%s2067_s3 + $0x18] sm:$0xff] }
  0xef   :  { %v220_v57 = vpop.f32.mrf.mxu0 }
  0xf0   :  { %v1242_v58 = vmul.f32 -1.442695, %v219_v56  ;;  %v221_v19 = vadd.f32 %v220_v57, %v95_v16  ;;  %v391_v57 = vld [vmem:[%s2067_s3 + $0x10] sm:$0xff] }
  0xf1   :  { %v222_v59 = vpop.f32.mrf.mxu0 }
  0xf2   :  { %1546 = vpow2.f32 %v1242_v58  ;;  %v223_v60 = vadd.f32 %v222_v59, %v99_v53 }
  0xf3   :  { %v226_v61 = vpop.f32.mrf.mxu0 }
  0xf4   :  { %v1243_v62 = vmul.f32 -1.442695, %v223_v60  ;;  %v227_v25 = vadd.f32 %v226_v61, %v95_v16  ;;  %v1502_v61 = vld [vmem:[%s2068_s11 + $0x38] sm:$0xff]  }
  0xf5   :  { %v228_v63 = vpop.f32.mrf.mxu0  ;;  %1375 = vmatprep.subr.bf16.mxu1 %v1502_v61 }
  0xf6   :  { %1548 = vpow2.f32 %v1243_v62  ;;  %v229_v0 = vadd.f32 %v228_v63, %v99_v53  ;;  %v1503_v62 = vld [vmem:[%s2068_s11 + $0x30] sm:$0xff]   ;;  %v1504_v63 = vld [vmem:[%s2068_s11 + $0x28] sm:$0xff]  }
  0xf7   :  { %v230_v2 = vpop.f32.mrf.mxu0 }
  0xf8   :  { %v1244_v3 = vmul.f32 -1.442695, %v229_v0  ;;  %v231_v26 = vadd.f32 %v230_v2, %v95_v16  ;;  %v1505_v0 = vld [vmem:[%s2068_s11 + $0x20] sm:$0xff]   ;;  %v1506_v2 = vld [vmem:[%s2068_s11 + $0x18] sm:$0xff]  }
  0xf9   :  { %v232_v4 = vpop.f32.mrf.mxu0  ;;  %v1522_v16 = vld [vmem:[%s2069_s13 + $0x30] ss:$8 sps:$4 sm:$0xff]  }
  0xfa   :  { %1550 = vpow2.f32 %v1244_v3  ;;  %v233_v5 = vadd.f32 %v232_v4, %v99_v53  ;;  %v1507_v3 = vld [vmem:[%s2068_s11 + $0x10] sm:$0xff]   ;;  %v1508_v4 = vld [vmem:[%s2068_s11 + $0x8] sm:$0xff]  }
  0xfc   :  { %v1245_v6 = vmul.f32 -1.442695, %v233_v5  ;;  %v1509_v5 = vld [vmem:[%s2068_s11] sm:$0xff]  }
  0xfe   :  { %1552 = vpow2.f32 %v1245_v6  ;;  %v1510_v6 = vld [vmem:[%s2069_s13 + $0x70] ss:$8 sps:$4 sm:$0xff]  }
  0xff   :  { %v1547_v7 = vpop.eup %1546 }
 0x100   :  { %v247_v8 = vadd.f32 1.0, %v1547_v7  ;;  %v1512_v7 = vld [vmem:[%s2069_s13 + $0x74] ss:$8 sps:$4 sm:$0xff]  }
 0x101   :  { %832 = vmatprep.subr.bf16.mxu0 %v1512_v7 }
 0x102   :  { %1554 = vrcp.f32 %v247_v8  ;;  %v1515_v8 = vld [vmem:[%s2069_s13 + $0x64] ss:$8 sps:$4 sm:$0xff]  }
 0x103   :  { %v1549_v9 = vpop.eup %1548 }
 0x104   :  { %v248_v10 = vadd.f32 1.0, %v1549_v9  ;;  %v1513_v9 = vld [vmem:[%s2069_s13 + $0x60] ss:$8 sps:$4 sm:$0xff]  }
 0x106   :  { %1556 = vrcp.f32 %v248_v10  ;;  %v1518_v10 = vld [vmem:[%s2069_s13 + $0x54] ss:$8 sps:$4 sm:$0xff]  }
 0x107   :  { %v1551_v11 = vpop.eup %1550 }
 0x108   :  { %v249_v12 = vadd.f32 1.0, %v1551_v11  ;;  %v1516_v11 = vld [vmem:[%s2069_s13 + $0x50] ss:$8 sps:$4 sm:$0xff]  }
 0x10a   :  { %1558 = vrcp.f32 %v249_v12  ;;  %v1521_v12 = vld [vmem:[%s2069_s13 + $0x44] ss:$8 sps:$4 sm:$0xff]  }
 0x10b   :  { %v1553_v14 = vpop.eup %1552 }
 0x10c   :  { %v250_v15 = vadd.f32 1.0, %v1553_v14  ;;  %v1519_v14 = vld [vmem:[%s2069_s13 + $0x40] ss:$8 sps:$4 sm:$0xff]  }
 0x10e   :  { %1560 = vrcp.f32 %v250_v15  ;;  %v1524_v15 = vld [vmem:[%s2069_s13 + $0x34] ss:$8 sps:$4 sm:$0xff]  }
 0x10f   :  { %v1555_v17 = vpop.eup %1554 }
 0x110   :  { %v259_v21 = vmul.f32 %v1555_v17, %v217_v18  ;;  %v415_v17 = vld [vmem:[%s2070_s10] sm:$0x3] }
 0x111   :  { %v424_v18 = vrot.slane %v415_v17, %v1831_v51 }
 0x113   :  { %v1557_v20 = vpop.eup %1556 }
 0x114   :  { %v260_v22 = vmul.f32 %v1557_v20, %v221_v19 }
 0x116   :  { %v263_v23 = vpack.c.bf16 %v260_v22, %v259_v21 }
 0x117   :  { %v1559_v24 = vpop.eup %1558 }
 0x118   :  { %1371 = vmatprep.mubr.bf16.mxu1 %v263_v23  ;;  %v261_v28 = vmul.f32 %v1559_v24, %v227_v25 }
 0x11b   :  { %v1561_v27 = vpop.eup %1560 }
 0x11c   :  { %v262_v29 = vmul.f32 %v1561_v27, %v231_v26 }
 0x11e   :  { %v264_v30 = vpack.c.bf16 %v262_v29, %v261_v28 }
 0x120   :  { %1372 = vmatmul.mubr.bf16.vlgmr.msra.gmra.mxu1 %v264_v30 }
 0x121   :  { %1376 = vmatpush3.bf16.msra.mxu1 %v1502_v61  ;;  %v1530_v61 = vld [vmem:[%s2069_s13 + $0x14] ss:$8 sps:$4 sm:$0xff]  }
 0x122   :  { %1377 = vmatprep.subr.bf16.mxu1 %v1503_v62 }
 0x125   :  { %1378 = vmatpush3.bf16.msra.mxu1 %v1503_v62  ;;  %v1528_v62 = vld [vmem:[%s2069_s13 + $0x10] ss:$8 sps:$4 sm:$0xff]  }
 0x126   :  { %1379 = vmatprep.subr.bf16.mxu1 %v1504_v63 }
 0x129   :  { %1380 = vmatpush3.bf16.msra.mxu1 %v1504_v63  ;;  %v1533_v63 = vld [vmem:[%s2069_s13 + $0x4] ss:$8 sps:$4 sm:$0xff]  }
 0x12a   :  { %1381 = vmatprep.subr.bf16.mxu1 %v1505_v0 }
 0x12d   :  { %1382 = vmatpush3.bf16.msra.mxu1 %v1505_v0  ;;  %v1531_v0 = vld [vmem:[%s2069_s13] ss:$8 sps:$4 sm:$0xff]  }
 0x12e   :  { %1383 = vmatprep.subr.bf16.mxu1 %v1506_v2 }
 0x131   :  { %1384 = vmatpush3.bf16.msra.mxu1 %v1506_v2 }
 0x132   :  { %1385 = vmatprep.subr.bf16.mxu1 %v1507_v3 }
 0x135   :  { %1386 = vmatpush3.bf16.msra.mxu1 %v1507_v3  ;;  %v1275_v3 = vld [vmem:[%s2071_s12] ss:$0 sm:$0xff] }
 0x136   :  { %1387 = vmatprep.subr.bf16.mxu1 %v1508_v4 }
 0x139   :  { %1388 = vmatpush3.bf16.msra.mxu1 %v1508_v4 }
 0x13a   :  { %1389 = vmatprep.subr.bf16.mxu1 %v1509_v5 }
 0x13d   :  { %1390 = vmatpush3.bf16.msra.mxu1 %v1509_v5 }
 0x1e0   :  { %v1373_v37 = vpop.f32.mrf.mxu1 }
 0x1e1   :  { %v379_v49 = vadd.f32 %v1373_v37, %v1246_v38 }
 0x1e2   :  { %v370_v39 = vpop.f32.mrf.mxu1 }
 0x1e3   :  { %v371_v40 = vadd.f32 %v1246_v38, %v370_v39  ;;  %v387_v56 = vmax.f32 %v379_v49, 0.0 }
 0x1e4   :  { %v1374_v41 = vpop.f32.mrf.mxu1 }
 0x1e5   :  { %v385_v43 = vmax.f32 %v371_v40, 0.0  ;;  %v382_v47 = vadd.f32 %v1374_v41, %v1246_v38  ;;  %v395_v59 = vadd.f32 %v391_v57, %v387_v56 }
 0x1e6   :  { %v373_v42 = vpop.f32.mrf.mxu1 }
 0x1e7   :  { %v374_v44 = vadd.f32 %v1246_v38, %v373_v42  ;;  %v393_v50 = vadd.f32 %v389_v45, %v385_v43  ;;  %v388_v53 = vmax.f32 %v382_v47, 0.0  ;;  %v420_v43 = vrot.slane %v415_v17, %v1837_v13 }
 0x1e9   :  { %v386_v48 = vmax.f32 %v374_v44, 0.0  ;;  %v396_v58 = vadd.f32 %v392_v55, %v388_v53 }
 0x1eb   :  { %v394_v52 = vadd.f32 %v390_v46, %v386_v48  ;;  %v398_v60 = vpack.c.bf16 %v396_v58, %v395_v59  ;;  %v1527_v59 = vld [vmem:[%s2069_s13 + $0x24] ss:$8 sps:$4 sm:$0xff]  }
 0x1ed   :  { %v397_v54 = vpack.c.bf16 %v394_v52, %v393_v50 }
 0x1ef   :  { %540 = vmatmul.mubr.bf16.vlgmr.msra.gmra.mxu0 %v397_v54 }
 0x1f0   :  { %549 = vmatprep.mubr.bf16.mxu0 %v1602_v1  ;;  %833 = vmatpush1.bf16.msra.mxu0 %v1510_v6 }
 0x1f1   :  { %834 = vmatprep.subr.bf16.mxu0 %v1515_v8 }
 0x1f4   :  { %835 = vmatpush1.bf16.msra.mxu0 %v1513_v9 }
 0x1f5   :  { %836 = vmatprep.subr.bf16.mxu0 %v1518_v10  ;;  %v714_v10 = vld [vmem:[%s2072_s4] sm:$0xff] }
 0x1f7   :  { %550 = vmatmul.mubr.bf16.gmra.mxu0 %v398_v60  ;;  %v1525_v60 = vld [vmem:[%s2069_s13 + $0x20] ss:$8 sps:$4 sm:$0xff]  }
 0x1f8   :  { %864 = vmatprep.mubr.bf16.mxu0 %v1602_v1  ;;  %837 = vmatpush1.bf16.msra.mxu0 %v1516_v11  ;;  %v715_v11 = vld [vmem:[%s2072_s4 + $0x8] sm:$0xff] }
 0x1f9   :  { %838 = vmatprep.subr.bf16.mxu0 %v1521_v12 }
 0x1fc   :  { %839 = vmatpush1.bf16.msra.mxu0 %v1519_v14 }
 0x1fd   :  { %840 = vmatprep.subr.bf16.mxu0 %v1524_v15 }
 0x200   :  { %841 = vmatpush1.bf16.msra.mxu0 %v1522_v16 }
 0x201   :  { %842 = vmatprep.subr.bf16.mxu0 %v1527_v59 }
 0x204   :  { %843 = vmatpush1.bf16.msra.mxu0 %v1525_v60 }
 0x205   :  { %844 = vmatprep.subr.bf16.mxu0 %v1530_v61 }
 0x208   :  { %845 = vmatpush1.bf16.msra.mxu0 %v1528_v62 }
 0x209   :  { %846 = vmatprep.subr.bf16.mxu0 %v1533_v63 }
 0x20c   :  { %847 = vmatpush1.bf16.msra.mxu0 %v1531_v0 }
 0x2af   :  { %v541_v19 = vpop.f32.mrf.mxu0 }
 0x2b0   :  { %v542_v45 = vadd.f32 %v541_v19, %v420_v43 }
 0x2b1   :  { %v543_v20 = vpop.f32.mrf.mxu0 }
 0x2b2   :  { %v544_v21 = vadd.f32 %v543_v20, %v424_v18  ;;  %v717_v20 = vld [vmem:[%s2072_s4 + $0x18] sm:$0xff] }
 0x2b3   :  { %v545_v22 = vpop.f32.mrf.mxu0 }
 0x2b4   :  { %v1271_v23 = vmul.f32 -1.442695, %v544_v21  ;;  %v546_v46 = vadd.f32 %v545_v22, %v420_v43  ;;  %v716_v22 = vld [vmem:[%s2072_s4 + $0x10] sm:$0xff] }
 0x2b5   :  { %v547_v24 = vpop.f32.mrf.mxu0 }
 0x2b6   :  { %1562 = vpow2.f32 %v1271_v23  ;;  %v548_v25 = vadd.f32 %v547_v24, %v424_v18 }
 0x2b7   :  { %v551_v26 = vpop.f32.mrf.mxu0 }
 0x2b8   :  { %v1272_v27 = vmul.f32 -1.442695, %v548_v25  ;;  %v552_v53 = vadd.f32 %v551_v26, %v420_v43  ;;  %v1534_v26 = vld [vmem:[%s2073_s15 + $0x38] sm:$0xff]  }
 0x2b9   :  { %v553_v28 = vpop.f32.mrf.mxu0  ;;  %1395 = vmatprep.subr.bf16.mxu1 %v1534_v26 }
 0x2ba   :  { %1564 = vpow2.f32 %v1272_v27  ;;  %v554_v29 = vadd.f32 %v553_v28, %v424_v18  ;;  %v1535_v27 = vld [vmem:[%s2073_s15 + $0x30] sm:$0xff]   ;;  %v1537_v28 = vld [vmem:[%s2073_s15 + $0x20] sm:$0xff]  }
 0x2bb   :  { %v555_v30 = vpop.f32.mrf.mxu0 }
 0x2bc   :  { %v1273_v31 = vmul.f32 -1.442695, %v554_v29  ;;  %v556_v54 = vadd.f32 %v555_v30, %v420_v43  ;;  %v1538_v29 = vld [vmem:[%s2073_s15 + $0x18] sm:$0xff]   ;;  %v1539_v30 = vld [vmem:[%s2073_s15 + $0x10] sm:$0xff]  }
 0x2bd   :  { %v557_v32 = vpop.f32.mrf.mxu0 }
 0x2be   :  { %1566 = vpow2.f32 %v1273_v31  ;;  %v558_v33 = vadd.f32 %v557_v32, %v424_v18  ;;  %v1540_v31 = vld [vmem:[%s2073_s15 + $0x8] sm:$0xff]   ;;  %v1541_v32 = vld [vmem:[%s2073_s15] sm:$0xff]  }
 0x2c0   :  { %v1274_v34 = vmul.f32 -1.442695, %v558_v33  ;;  %v1603_v33 = vmov 65  }
 0x2c1   :  { %1433 = vset.pattern.permute.xlu1 %v1603_v33  ;;  %1432 = vset.pattern.permute.xlu0 %v1603_v33 }
 0x2c2   :  { %1568 = vpow2.f32 %v1274_v34  ;;  %v1995_v34 = vld [vmem:[%s2074_s1 + $0x10] sm:$0xff] }
 0x2c3   :  { %v1563_v35 = vpop.eup %1562  ;;  %1051 = vperm.xlu1 %1433, %v1995_v34  }
 0x2c4   :  { %v572_v36 = vadd.f32 1.0, %v1563_v35  ;;  %v2000_v35 = vld [vmem:[%s2074_s1] sm:$0xff] }
 0x2c5   :  { %1041 = vperm.xlu0 %1432, %v2000_v35  }
 0x2c6   :  { %1570 = vrcp.f32 %v572_v36  ;;  %v2007_v36 = vld [vmem:[%s2074_s1 + $0x18] sm:$0xff] }
 0x2c7   :  { %v1565_v37 = vpop.eup %1564  ;;  %1056 = vperm.xlu1 %1433, %v2007_v36  }
 0x2c8   :  { %v573_v38 = vadd.f32 1.0, %v1565_v37  ;;  %v2012_v37 = vld [vmem:[%s2074_s1 + $0x8] sm:$0xff] }
 0x2c9   :  { %1046 = vperm.xlu0 %1432, %v2012_v37  }
 0x2ca   :  { %1572 = vrcp.f32 %v573_v38  ;;  %v1604_v38 = vmov 64  }
 0x2cb   :  { %v1567_v39 = vpop.eup %1566  ;;  %1435 = vset.pattern.permute.xlu1 %v1604_v38 }
 0x2cc   :  { %v574_v40 = vadd.f32 1.0, %v1567_v39  ;;  %1068 = vperm.xlu1 %1435, %v2012_v37   ;;  %v740_v39 = vld [vmem:[%s2075_s14] sm:$0x3] }
 0x2cd   :  { %1434 = vset.pattern.permute.xlu0 %v1604_v38 }
 0x2ce   :  { %1574 = vrcp.f32 %v574_v40  ;;  %1064 = vperm.xlu0 %1434, %v2000_v35   ;;  %v749_v40 = vrot.slane %v740_v39, %v1831_v51 }
 0x2cf   :  { %v1569_v41 = vpop.eup %1568 }
 0x2d0   :  { %v575_v42 = vadd.f32 1.0, %v1569_v41  ;;  %1072 = vperm.xlu1 %1435, %v1995_v34  }
 0x2d2   :  { %1576 = vrcp.f32 %v575_v42  ;;  %1076 = vperm.xlu0 %1434, %v2007_v36  }
 0x2d3   :  { %v1571_v44 = vpop.eup %1570 }
 0x2d4   :  { %v584_v48 = vmul.f32 %v1571_v44, %v542_v45  ;;  %1091 = vrot.lane.b32.xlu1 %v2000_v35, %s1605_s25 }
 0x2d6   :  { %1093 = vrot.lane.b32.xlu0 %v2012_v37, %s1605_s25 }
 0x2d7   :  { %v1573_v47 = vpop.eup %1572 }
 0x2d8   :  { %v585_v49 = vmul.f32 %v1573_v47, %v546_v46  ;;  %1095 = vrot.lane.b32.xlu1 %v1995_v34, %s1605_s25 }
 0x2da   :  { %v588_v50 = vpack.c.bf16 %v585_v49, %v584_v48  ;;  %1097 = vrot.lane.b32.xlu0 %v2007_v36, %s1605_s25 }
 0x2db   :  { %v1575_v52 = vpop.eup %1574 }
 0x2dc   :  { %1391 = vmatprep.mubr.bf16.mxu1 %v588_v50  ;;  %v586_v56 = vmul.f32 %v1575_v52, %v552_v53 }
 0x2df   :  { %v1577_v55 = vpop.eup %1576 }
 0x2e0   :  { %v587_v57 = vmul.f32 %v1577_v55, %v556_v54 }
 0x2e2   :  { %v589_v58 = vpack.c.bf16 %v587_v57, %v586_v56 }
 0x2e4   :  { %1392 = vmatmul.mubr.bf16.vlgmr.msra.gmra.mxu1 %v589_v58 }
 0x2e5   :  { %1396 = vmatpush3.bf16.msra.mxu1 %v1534_v26 }
 0x2e6   :  { %1397 = vmatprep.subr.bf16.mxu1 %v1535_v27 }
 0x2e9   :  { %1398 = vmatpush3.bf16.msra.mxu1 %v1535_v27 }
 0x3a4   :  { %v1393_v2 = vpop.f32.mrf.mxu1 }
 0x3a5   :  { %v704_v15 = vadd.f32 %v1393_v2, %v1275_v3  ;;  %v745_v2 = vrot.slane %v740_v39, %v1837_v13  ;;  %v1542_v13 = vld [vmem:[%s2076_s17 + $0x18] sm:$0xff]  }
 0x3a6   :  { %v695_v4 = vpop.f32.mrf.mxu1  ;;  %1415 = vmatprep.subr.bf16.mxu0 %v1542_v13 }
 0x3a7   :  { %v696_v5 = vadd.f32 %v1275_v3, %v695_v4  ;;  %v712_v21 = vmax.f32 %v704_v15, 0.0 }
 0x3a8   :  { %v1394_v6 = vpop.f32.mrf.mxu1 }
 0x3a9   :  { %v710_v8 = vmax.f32 %v696_v5, 0.0  ;;  %v707_v12 = vadd.f32 %v1394_v6, %v1275_v3  ;;  %v720_v24 = vadd.f32 %v716_v22, %v712_v21  ;;  %v1042_v21 = vpop.permute.xlu0 %1041 }
 0x3aa   :  { %v698_v7 = vpop.f32.mrf.mxu1 }
 0x3ab   :  { %v699_v9 = vadd.f32 %v1275_v3, %v698_v7  ;;  %v718_v16 = vadd.f32 %v714_v10, %v710_v8  ;;  %v713_v18 = vmax.f32 %v707_v12, 0.0 }
 0x3ad   :  { %v711_v14 = vmax.f32 %v699_v9, 0.0  ;;  %v721_v23 = vadd.f32 %v717_v20, %v713_v18  ;;  %v1543_v18 = vld [vmem:[%s2076_s17 + $0x10] sm:$0xff]   ;;  %v1052_v20 = vpop.permute.xlu1 %1051 }
 0x3af   :  { %v719_v17 = vadd.f32 %v715_v11, %v711_v14  ;;  %v723_v25 = vpack.c.bf16 %v721_v23, %v720_v24  ;;  %v1047_v23 = vpop.permute.xlu0 %1046 }
 0x3b1   :  { %v722_v19 = vpack.c.bf16 %v719_v17, %v718_v16  ;;  %v1057_v22 = vpop.permute.xlu1 %1056 }
 0x3b3   :  { %865 = vmatmul.mubr.bf16.vlgmr.msra.gmra.mxu0 %v722_v19  ;;  %v1544_v19 = vld [vmem:[%s2076_s17 + $0x8] sm:$0xff]   ;;  %v1065_v27 = vpop.permute.xlu0 %1064 }
 0x3b4   :  { %874 = vmatprep.mubr.bf16.mxu0 %v1602_v1  ;;  %v1536_v1 = vld [vmem:[%s2073_s15 + $0x28] sm:$0xff]   ;;  %1416 = vmatpush3.bf16.msra.mxu0 %v1542_v13 }
 0x3b5   :  { %1399 = vmatprep.subr.bf16.mxu1 %v1536_v1  ;;  %1417 = vmatprep.subr.bf16.mxu0 %v1543_v18  ;;  %v1069_v24 = vpop.permute.xlu1 %1068 }
 0x3b6   :  { %1400 = vmatpush3.bf16.msra.mxu1 %v1536_v1 }
 0x3b7   :  { %1401 = vmatprep.subr.bf16.mxu1 %v1537_v28 }
 0x3b8   :  { %1418 = vmatpush3.bf16.msra.mxu0 %v1543_v18 }
 0x3b9   :  { %1419 = vmatprep.subr.bf16.mxu0 %v1544_v19 }
 0x3ba   :  { %1402 = vmatpush3.bf16.msra.mxu1 %v1537_v28 }
 0x3bb   :  { %875 = vmatmul.mubr.bf16.gmra.mxu0 %v723_v25  ;;  %1403 = vmatprep.subr.bf16.mxu1 %v1538_v29  ;;  %v1304_v25 = vld [vmem:[%s2077_s16] ss:$0 sm:$0xff] }
 0x3bc   :  { %1420 = vmatpush3.bf16.msra.mxu0 %v1544_v19 }
 0x3be   :  { %1404 = vmatpush3.bf16.msra.mxu1 %v1538_v29  ;;  %v1073_v29 = vpop.permute.xlu1 %1072 }
 0x3bf   :  { %1405 = vmatprep.subr.bf16.mxu1 %v1539_v30 }
 0x3c2   :  { %1406 = vmatpush3.bf16.msra.mxu1 %v1539_v30 }
 0x3c3   :  { %1407 = vmatprep.subr.bf16.mxu1 %v1540_v31 }
 0x3c6   :  { %1408 = vmatpush3.bf16.msra.mxu1 %v1540_v31 }
 0x3c7   :  { %1409 = vmatprep.subr.bf16.mxu1 %v1541_v32 }
 0x3ca   :  { %1410 = vmatpush3.bf16.msra.mxu1 %v1541_v32 }
 0x473   :  { %v866_v41 = vpop.f32.mrf.mxu0 }
 0x474   :  { %v867_v4 = vadd.f32 %v866_v41, %v745_v2  ;;  %v1077_v41 = vpop.permute.xlu0 %1076 }
 0x475   :  { %v868_v42 = vpop.f32.mrf.mxu0 }
 0x476   :  { %v869_v43 = vadd.f32 %v868_v42, %v749_v40 }
 0x477   :  { %v870_v44 = vpop.f32.mrf.mxu0 }
 0x478   :  { %v1300_v45 = vmul.f32 -1.442695, %v869_v43  ;;  %v871_v5 = vadd.f32 %v870_v44, %v745_v2 }
 0x479   :  { %v872_v46 = vpop.f32.mrf.mxu0 }
 0x47a   :  { %1578 = vpow2.f32 %v1300_v45  ;;  %v873_v47 = vadd.f32 %v872_v46, %v749_v40 }
 0x47b   :  { %v876_v48 = vpop.f32.mrf.mxu0 }
 0x47c   :  { %v1301_v49 = vmul.f32 -1.442695, %v873_v47  ;;  %v877_v11 = vadd.f32 %v876_v48, %v745_v2  ;;  %v1092_v48 = vpop.permute.xlu1 %1091 }
 0x47d   :  { %v878_v50 = vpop.f32.mrf.mxu0 }
 0x47e   :  { %1580 = vpow2.f32 %v1301_v49  ;;  %v879_v52 = vadd.f32 %v878_v50, %v749_v40  ;;  %v1094_v49 = vpop.permute.xlu0 %1093  ;;  %v1545_v50 = vld [vmem:[%s2076_s17] sm:$0xff]  }
 0x47f   :  { %v880_v53 = vpop.f32.mrf.mxu0  ;;  %1421 = vmatprep.subr.bf16.mxu0 %v1545_v50 }
 0x480   :  { %v1302_v54 = vmul.f32 -1.442695, %v879_v52  ;;  %v881_v12 = vadd.f32 %v880_v53, %v745_v2  ;;  %1422 = vmatpush3.bf16.msra.mxu0 %v1545_v50  ;;  %v1096_v53 = vpop.permute.xlu1 %1095 }
 0x481   :  { %v882_v55 = vpop.f32.mrf.mxu0 }
 0x482   :  { %1582 = vpow2.f32 %v1302_v54  ;;  %v883_v56 = vadd.f32 %v882_v55, %v749_v40  ;;  %v1098_v54 = vpop.permute.xlu0 %1097 }
 0x484   :  { %v1303_v57 = vmul.f32 -1.442695, %v883_v56 }
 0x486   :  { %1584 = vpow2.f32 %v1303_v57 }
 0x487   :  { %v1579_v51 = vpop.eup %1578 }
 0x488   :  { %v897_v58 = vadd.f32 1.0, %v1579_v51 }
 0x48a   :  { %1586 = vrcp.f32 %v897_v58 }
 0x48b   :  { %v1581_v59 = vpop.eup %1580 }
 0x48c   :  { %v898_v60 = vadd.f32 1.0, %v1581_v59 }
 0x48e   :  { %1588 = vrcp.f32 %v898_v60 }
 0x48f   :  { %v1583_v61 = vpop.eup %1582 }
 0x490   :  { %v899_v62 = vadd.f32 1.0, %v1583_v61 }
 0x492   :  { %1590 = vrcp.f32 %v899_v62 }
 0x493   :  { %v1585_v63 = vpop.eup %1584 }
 0x494   :  { %v900_v0 = vadd.f32 1.0, %v1585_v63 }
 0x496   :  { %1592 = vrcp.f32 %v900_v0 }
 0x497   :  { %v1587_v3 = vpop.eup %1586 }
 0x498   :  { %v909_v7 = vmul.f32 %v1587_v3, %v867_v4 }
 0x49b   :  { %v1589_v6 = vpop.eup %1588 }
 0x49c   :  { %v910_v8 = vmul.f32 %v1589_v6, %v871_v5 }
 0x49e   :  { %v913_v9 = vpack.c.bf16 %v910_v8, %v909_v7 }
 0x49f   :  { %v1591_v10 = vpop.eup %1590 }
 0x4a0   :  { %1411 = vmatprep.mubr.bf16.mxu1 %v913_v9  ;;  %v911_v15 = vmul.f32 %v1591_v10, %v877_v11 }
 0x4a3   :  { %v1593_v14 = vpop.eup %1592 }
 0x4a4   :  { %v912_v16 = vmul.f32 %v1593_v14, %v881_v12 }
 0x4a6   :  { %v914_v17 = vpack.c.bf16 %v912_v16, %v911_v15 }
 0x4a8   :  { %1412 = vmatmul.mubr.bf16.vlgmr.msra.gmra.mxu1 %v914_v17 }
 0x568   :  { %v1413_v26 = vpop.f32.mrf.mxu1 }
 0x569   :  { %v1029_v1 = vadd.f32 %v1413_v26, %v1304_v25 }
 0x56a   :  { %v1020_v28 = vpop.f32.mrf.mxu1 }
 0x56b   :  { %v1021_v30 = vadd.f32 %v1304_v25, %v1020_v28  ;;  %v1061_v31 = vmul.f32 %v1052_v20, %v1029_v1 }
 0x56c   :  { %v1414_v32 = vpop.f32.mrf.mxu1 }
 0x56d   :  { %v1059_v33 = vmul.f32 %v1042_v21, %v1021_v30  ;;  %v1081_v38 = vadd.f32 %v1073_v29, %v1061_v31  ;;  %v1032_v39 = vadd.f32 %v1414_v32, %v1304_v25 }
 0x56e   :  { %v1023_v40 = vpop.f32.mrf.mxu1 }
 0x56f   :  { %v1079_v42 = vadd.f32 %v1065_v27, %v1059_v33  ;;  %v1024_v43 = vadd.f32 %v1304_v25, %v1023_v40  ;;  %v1062_v44 = vmul.f32 %v1057_v22, %v1032_v39  ;;  %1594 = vtanh.f32 %v1081_v38 }
 0x571   :  { %v1060_v45 = vmul.f32 %v1047_v23, %v1024_v43  ;;  %v1082_v46 = vadd.f32 %v1077_v41, %v1062_v44  ;;  %1596 = vtanh.f32 %v1079_v42 }
 0x573   :  { %v1080_v47 = vadd.f32 %v1069_v24, %v1060_v45  ;;  %1598 = vtanh.f32 %v1082_v46 }
 0x575   :  { %1600 = vtanh.f32 %v1080_v47 }
 0x57c   :  { %v1595_v52 = vpop.eup %1594 }
 0x57d   :  { %v1105_v57 = vmul.f32 %v1595_v52, %v1096_v53  ;;  %v1089_v0 = vmul.f32 %v1595_v52, %v1995_v34 }
 0x57e   :  { %v1597_v55 = vpop.eup %1596 }
 0x57f   :  { %v1103_v59 = vmul.f32 %v1597_v55, %v1092_v48  ;;  %v1087_v7 = vmul.f32 %v1597_v55, %v2000_v35 }
 0x580   :  { %v1599_v56 = vpop.eup %1598 }
 0x581   :  { %v1106_v51 = vmul.f32 %v1599_v56, %v1098_v54  ;;  %v1090_v4 = vmul.f32 %v1599_v56, %v2007_v36 }
 0x582   :  { %v1601_v58 = vpop.eup %1600 }
 0x583   :  { %v1104_v60 = vmul.f32 %v1601_v58, %v1094_v49  ;;  %v1441_v61 = vpack.i.bf16 %v1106_v51, %v1105_v57  ;;  %v1088_v5 = vmul.f32 %v1601_v58, %v2012_v37 }
 0x585   :  { %v1436_v62 = vpack.i.bf16 %v1104_v60, %v1103_v59  ;;  %1442 = vrot.lane.b32.xlu0 %v1441_v61, %s1606_s5 }
 0x587   :  { %1437 = vrot.lane.b32.xlu1 %v1436_v62, %s1606_s5 }
 0x5f7   :  { %v1443_v63 = vpop.permute.xlu0 %1442 }
 0x5f8   :  { %v1445_v2 = vunpack.i.h.bf16 %v1443_v63  ;;  %v1444_v3 = vunpack.i.l.bf16 %v1443_v63 }
 0x5f9   :  { %v1438_v6 = vpop.permute.xlu1 %1437 }
 0x5fa   :  { %v1126_v8 = vsel %vm1123_vm0, %v1089_v0, %v1444_v3  ;;  %v1127_v9 = vsel %vm1123_vm0, %v1090_v4, %v1445_v2  ;;  %v1440_v10 = vunpack.i.h.bf16 %v1438_v6  ;;  %v1439_v11 = vunpack.i.l.bf16 %v1438_v6 }
 0x5fb   :  { %v1129_v12 = vpack.c.bf16 %v1127_v9, %v1126_v8 }
 0x5fc   :  { %v1125_v14 = vsel %vm1123_vm0, %v1088_v5, %v1440_v10  ;;  %v1124_v15 = vsel %vm1123_vm0, %v1087_v7, %v1439_v11 }
 0x5fd   :  { %v1128_v16 = vpack.c.bf16 %v1125_v14, %v1124_v15 }
 0x5ff   :  { %1423 = vmatprep.mubr.msk.bf16.mxu0 %vm1162_vm1, %v1128_v16 }
 0x600   :  { %1424 = vmatmul.mubr.msk.bf16.vlgmr.msra.gmra.mxu0 %vm1162_vm1, %v1129_v12 }
 0x6c0   :  { %v1425_v34 = vpop.f32.mrf.mxu0 }
 0x6c1   :  { %1220 = vst [vmem:[%s2078_s18 + $0x10] sm:$0xff] %v1425_v34 }
 0x6c2   :  { %v1203_v36 = vpop.f32.mrf.mxu0 }
 0x6c3   :  { %1218 = vst [vmem:[%s2078_s18] sm:$0xff] %v1203_v36 }
 0x6c4   :  { %v1426_v35 = vpop.f32.mrf.mxu0 }
 0x6c5   :  { %1221 = vst [vmem:[%s2078_s18 + $0x18] sm:$0xff] %v1426_v35 }
 0x6c6   :  { %v1206_v37 = vpop.f32.mrf.mxu0 }
 0x6c7   :  { %1219 = vst [vmem:[%s2078_s18 + $0x8] sm:$0xff] %v1206_v37 }

</bundles_post_ra>
